<compile_context>
chip_gen: v7x
topology: tpu7x:2x2x1
jax: 0.10.0
libtpu: 0.0.40
codegen_flags: <defaults>
</compile_context>

<pallas_src>
import numpy as np
import jax
import jax.numpy as jnp
from jax.experimental import pallas as pl
from jax.experimental.pallas import tpu as pltpu

BN_EPS = 1e-5
LANE = 128


def _pad128(d):
    return ((d + LANE - 1) // LANE) * LANE


def _slab_layout(padded_dims):
    """Static (offset, width) for each packed 1-D parameter vector.
    Widths are already multiples of 128, so every slice is lane-aligned."""
    n_layers = len(padded_dims) - 1
    offsets = {}
    off = 0

    def add(name, width):
        nonlocal off
        offsets[name] = (off, width)
        off += width

    for i in range(n_layers):
        width = padded_dims[i + 1]
        add(f"b{i}", width)                 # Linear bias
        if i < n_layers - 1:                # BN follows every layer except the last
            add(f"g{i}", width)             # gamma
            add(f"be{i}", width)            # beta
    return offsets, off


def make_mlp_kernel(padded_dims):
    offsets, _ = _slab_layout(padded_dims)

    def kernel(x_ref, vec_ref, w1_ref, w2_ref, w3_ref, w4_ref, w5_ref, o_ref):
        def v(name):
            off, width = offsets[name]          # static, lane-aligned slice
            return vec_ref[:, off:off + width]  # [1, width] f32

        def linear(h_bf16, w_ref, bname):
            # bf16 x bf16 -> f32 accumulation: single-pass native MXU mode.
            return jnp.dot(h_bf16, w_ref[...],
                           preferred_element_type=jnp.float32) + v(bname)

        def relu_bn(h, i):
            # Elementwise / BN math in f32 (v5e VPU/EUP have no bf16 path).
            h = jnp.maximum(h, 0.0)
            mean = jnp.mean(h, axis=0, keepdims=True)
            mean_sq = jnp.mean(h * h, axis=0, keepdims=True)
            var = jnp.maximum(mean_sq - mean * mean, 0.0)
            scale = jax.lax.rsqrt(var + BN_EPS) * v(f"g{i}")   # [1,F]
            offset = v(f"be{i}") - mean * scale                # [1,F]
            # One cast to bf16 per layer, required anyway as the next dot operand.
            return (h * scale + offset).astype(jnp.bfloat16)

        h = linear(x_ref[...], w1_ref, "b0")     # Linear(n_in, 512p)
        h = linear(relu_bn(h, 0), w2_ref, "b1")  # ReLU -> BN -> Linear(512p, 384p)
        h = linear(relu_bn(h, 1), w3_ref, "b2")  # ReLU -> BN -> Linear(384p, 256p)
        h = linear(relu_bn(h, 2), w4_ref, "b3")  # ReLU -> BN -> Linear(256p, 128p)
        h = linear(relu_bn(h, 3), w5_ref, "b4")  # ReLU -> BN -> Linear(128p, 128p)
        o_ref[...] = h.astype(o_ref.dtype)       # lane-dense [B,128] store

    return kernel


def net_forward(x_bf16, weights, vec_slab, layer_dim, padded_dims):
    """x_bf16: [B, n_inputs] bf16.  weights: 5 bf16 padded [in,out] matrices.
    vec_slab: [1,P] f32.  Returns [B, n_classes] f32 (pad lanes sliced off)."""
    B = x_bf16.shape[0]
    n_classes = layer_dim[-1]
    out_pad = padded_dims[-1]
    kernel = make_mlp_kernel(padded_dims)

    matmul_flops = 2 * B * sum(padded_dims[i] * padded_dims[i + 1]
                               for i in range(len(padded_dims) - 1))
    elementwise_flops = 8 * B * sum(padded_dims[1:-1])          # ReLU + BN (approx.)
    bytes_accessed = (x_bf16.size * 2 + vec_slab.size * 4 + B * out_pad * 4
                      + sum(int(w.size) * 2 for w in weights))  # bf16 weights

    vmem_spec = pl.BlockSpec(memory_space=pltpu.MemorySpace.VMEM)
    out_padded = pl.pallas_call(
        kernel,
        out_shape=jax.ShapeDtypeStruct((B, out_pad), jnp.float32),
        in_specs=[vmem_spec] * (2 + len(weights)),
        out_specs=vmem_spec,
        cost_estimate=pl.CostEstimate(
            flops=int(matmul_flops + elementwise_flops),
            transcendentals=int(sum(padded_dims[1:-1])),        # rsqrt per BN feature
            bytes_accessed=int(bytes_accessed)),
    )(x_bf16, vec_slab, *weights)
    return out_padded[:, :n_classes]


def init_params(key, n_inputs, n_hidden, n_classes):
    """PyTorch-default-style init on the TRUE dims, zero-padded to lane-aligned shapes.
    Linear: W,b ~ U(-1/sqrt(fan_in), 1/sqrt(fan_in)), W stored [in,out] bf16.
    BatchNorm1d: gamma=1 (0 on pad features), beta=0.  Pad cols/rows of W, pad
    entries of b/beta are exactly 0 so padded features stay 0 end-to-end."""
    layer_dim = [n_inputs, *n_hidden, n_classes]
    padded_dims = [n_inputs] + [_pad128(d) for d in layer_dim[1:]]
    offsets, slab_width = _slab_layout(padded_dims)
    slab = np.zeros((1, slab_width), np.float32)
    weights = []
    n_layers = len(layer_dim) - 1
    for i in range(n_layers):
        fan_in, fan_out = layer_dim[i], layer_dim[i + 1]
        p_in, p_out = padded_dims[i], padded_dims[i + 1]
        key, kw, kb = jax.random.split(key, 3)
        bound = 1.0 / np.sqrt(fan_in)
        w = jax.random.uniform(kw, (fan_in, fan_out), jnp.float32, -bound, bound)
        b = jax.random.uniform(kb, (fan_out,), jnp.float32, -bound, bound)
        w_pad = np.zeros((p_in, p_out), np.float32)
        w_pad[:fan_in, :fan_out] = np.asarray(w)
        weights.append(jnp.asarray(w_pad, dtype=jnp.bfloat16))
        off, _ = offsets[f"b{i}"]
        slab[0, off:off + fan_out] = np.asarray(b)
        if i < n_layers - 1:
            off, _ = offsets[f"g{i}"]
            slab[0, off:off + fan_out] = 1.0   # gamma=1 on real features, 0 on pad
            # beta stays 0 everywhere
    return tuple(weights), jnp.asarray(slab), layer_dim, padded_dims


def net_reference(x_bf16, weights, vec_slab, layer_dim, padded_dims):
    """Pure-JAX reference with the same parameter values, same bf16 dot operands,
    but the classic two-pass BN formulation."""
    offsets, _ = _slab_layout(padded_dims)
    slab = np.asarray(vec_slab)

    def v(name):
        off, wid = offsets[name]
        return jnp.asarray(slab[:, off:off + wid])

    def bn(h, g, be):
        mean = jnp.mean(h, axis=0, keepdims=True)
        var = jnp.mean((h - mean) ** 2, axis=0, keepdims=True)
        return (h - mean) * jax.lax.rsqrt(var + BN_EPS) * g + be

    h = x_bf16
    for i, w in enumerate(weights):
        if i > 0:
            h = bn(jnp.maximum(h, 0.0), v(f"g{i - 1}"), v(f"be{i - 1}"))
            h = h.astype(jnp.bfloat16)
        h = jnp.dot(h, w, preferred_element_type=jnp.float32) + v(f"b{i}")
    return h[:, :layer_dim[-1]]


if __name__ == "__main__":
    batch_size = 200          # matches the module spec
    n_inputs = 64             # x.reshape(batch, -1) -> [B, 64]
    n_hidden = [400, 300, 200, 100]
    n_classes = 10

    key = jax.random.PRNGKey(0)
    key, kx = jax.random.split(key)
    x = jax.random.normal(kx, (batch_size, n_inputs), jnp.float32)

    weights, vec_slab, layer_dim, padded_dims = init_params(
        key, n_inputs, n_hidden, n_classes)

    x_bf16 = x.astype(jnp.bfloat16)   # ship x as bf16: first dot needs no in-kernel cast

    out = jax.block_until_ready(
        net_forward(x_bf16, weights, vec_slab, layer_dim, padded_dims))
    ref = jax.block_until_ready(
        net_reference(x_bf16, weights, vec_slab, layer_dim, padded_dims))

    assert out.shape == (batch_size, n_classes)
    np.testing.assert_allclose(np.asarray(out), np.asarray(ref), rtol=5e-3, atol=5e-3)

    print("KERNEL_OK")
</pallas_src>

<mosaic_0001>
module attributes {stable_mosaic.version = 11 : i64} {
  func.func @kernel(%arg0: memref<200x64xbf16, #tpu.memory_space<vmem>>, %arg1: memref<1x3968xf32, #tpu.memory_space<vmem>>, %arg2: memref<64x512xbf16, #tpu.memory_space<vmem>>, %arg3: memref<512x384xbf16, #tpu.memory_space<vmem>>, %arg4: memref<384x256xbf16, #tpu.memory_space<vmem>>, %arg5: memref<256x128xbf16, #tpu.memory_space<vmem>>, %arg6: memref<128x128xbf16, #tpu.memory_space<vmem>>, %arg7: memref<200x128xf32, #tpu.memory_space<vmem>>) attributes {dimension_semantics = [], scalar_prefetch = 0 : i64, scratch_operands = 0 : i64, tpu.core_type = #tpu.core_type<tc>} {
    %c0 = arith.constant 0 : index
    %c0_0 = arith.constant 0 : index
    %0 = vector.load %arg0[%c0, %c0_0] : memref<200x64xbf16, #tpu.memory_space<vmem>>, vector<200x64xbf16>
    %c0_1 = arith.constant 0 : index
    %c0_2 = arith.constant 0 : index
    %1 = vector.load %arg2[%c0_1, %c0_2] : memref<64x512xbf16, #tpu.memory_space<vmem>>, vector<64x512xbf16>
    %cst = arith.constant dense<0.000000e+00> : vector<200x512xf32>
    %2 = tpu.matmul %0, %1, %cst {dimension_numbers = #tpu.dot_dimension_numbers<[1], [0], [0], [1], [0, 0, 1, 1], [], []>} : vector<200x64xbf16>, vector<64x512xbf16>, vector<200x512xf32> -> vector<200x512xf32>
    %c0_3 = arith.constant 0 : index
    %c0_4 = arith.constant 0 : index
    %3 = vector.load %arg1[%c0_3, %c0_4] : memref<1x3968xf32, #tpu.memory_space<vmem>>, vector<1x512xf32>
    %4 = vector.broadcast %3 : vector<1x512xf32> to vector<200x512xf32>
    %5 = arith.addf %2, %4 : vector<200x512xf32>
    %cst_5 = arith.constant 0.000000e+00 : f32
    %6 = vector.broadcast %cst_5 : f32 to vector<200x512xf32>
    %7 = arith.maximumf %5, %6 : vector<200x512xf32>
    %cst_6 = arith.constant dense<0.000000e+00> : vector<512xf32>
    %8 = vector.multi_reduction <add>, %7, %cst_6 [0] : vector<200x512xf32> to vector<512xf32>
    %9 = vector.shape_cast %8 : vector<512xf32> to vector<1x512xf32>
    %cst_7 = arith.constant 2.000000e+02 : f32
    %10 = vector.broadcast %cst_7 : f32 to vector<1x512xf32>
    %11 = arith.divf %9, %10 : vector<1x512xf32>
    %12 = arith.mulf %7, %7 : vector<200x512xf32>
    %cst_8 = arith.constant dense<0.000000e+00> : vector<512xf32>
    %13 = vector.multi_reduction <add>, %12, %cst_8 [0] : vector<200x512xf32> to vector<512xf32>
    %14 = vector.shape_cast %13 : vector<512xf32> to vector<1x512xf32>
    %cst_9 = arith.constant 2.000000e+02 : f32
    %15 = vector.broadcast %cst_9 : f32 to vector<1x512xf32>
    %16 = arith.divf %14, %15 : vector<1x512xf32>
    %17 = arith.mulf %11, %11 : vector<1x512xf32>
    %18 = arith.subf %16, %17 : vector<1x512xf32>
    %cst_10 = arith.constant 0.000000e+00 : f32
    %19 = vector.broadcast %cst_10 : f32 to vector<1x512xf32>
    %20 = arith.maximumf %18, %19 : vector<1x512xf32>
    %cst_11 = arith.constant 9.99999974E-6 : f32
    %21 = vector.broadcast %cst_11 : f32 to vector<1x512xf32>
    %22 = arith.addf %20, %21 : vector<1x512xf32>
    %23 = math.rsqrt %22 : vector<1x512xf32>
    %c0_12 = arith.constant 0 : index
    %c512 = arith.constant 512 : index
    %24 = vector.load %arg1[%c0_12, %c512] : memref<1x3968xf32, #tpu.memory_space<vmem>>, vector<1x512xf32>
    %25 = arith.mulf %23, %24 : vector<1x512xf32>
    %c0_13 = arith.constant 0 : index
    %c1024 = arith.constant 1024 : index
    %26 = vector.load %arg1[%c0_13, %c1024] : memref<1x3968xf32, #tpu.memory_space<vmem>>, vector<1x512xf32>
    %27 = arith.mulf %11, %25 : vector<1x512xf32>
    %28 = arith.subf %26, %27 : vector<1x512xf32>
    %29 = vector.broadcast %25 : vector<1x512xf32> to vector<200x512xf32>
    %30 = arith.mulf %7, %29 : vector<200x512xf32>
    %31 = vector.broadcast %28 : vector<1x512xf32> to vector<200x512xf32>
    %32 = arith.addf %30, %31 : vector<200x512xf32>
    %33 = arith.truncf %32 : vector<200x512xf32> to vector<200x512xbf16>
    %c0_14 = arith.constant 0 : index
    %c0_15 = arith.constant 0 : index
    %34 = vector.load %arg3[%c0_14, %c0_15] : memref<512x384xbf16, #tpu.memory_space<vmem>>, vector<512x384xbf16>
    %cst_16 = arith.constant dense<0.000000e+00> : vector<200x384xf32>
    %35 = tpu.matmul %33, %34, %cst_16 {dimension_numbers = #tpu.dot_dimension_numbers<[1], [0], [0], [1], [0, 0, 1, 1], [], []>} : vector<200x512xbf16>, vector<512x384xbf16>, vector<200x384xf32> -> vector<200x384xf32>
    %c0_17 = arith.constant 0 : index
    %c1536 = arith.constant 1536 : index
    %36 = vector.load %arg1[%c0_17, %c1536] : memref<1x3968xf32, #tpu.memory_space<vmem>>, vector<1x384xf32>
    %37 = vector.broadcast %36 : vector<1x384xf32> to vector<200x384xf32>
    %38 = arith.addf %35, %37 : vector<200x384xf32>
    %cst_18 = arith.constant 0.000000e+00 : f32
    %39 = vector.broadcast %cst_18 : f32 to vector<200x384xf32>
    %40 = arith.maximumf %38, %39 : vector<200x384xf32>
    %cst_19 = arith.constant dense<0.000000e+00> : vector<384xf32>
    %41 = vector.multi_reduction <add>, %40, %cst_19 [0] : vector<200x384xf32> to vector<384xf32>
    %42 = vector.shape_cast %41 : vector<384xf32> to vector<1x384xf32>
    %cst_20 = arith.constant 2.000000e+02 : f32
    %43 = vector.broadcast %cst_20 : f32 to vector<1x384xf32>
    %44 = arith.divf %42, %43 : vector<1x384xf32>
    %45 = arith.mulf %40, %40 : vector<200x384xf32>
    %cst_21 = arith.constant dense<0.000000e+00> : vector<384xf32>
    %46 = vector.multi_reduction <add>, %45, %cst_21 [0] : vector<200x384xf32> to vector<384xf32>
    %47 = vector.shape_cast %46 : vector<384xf32> to vector<1x384xf32>
    %cst_22 = arith.constant 2.000000e+02 : f32
    %48 = vector.broadcast %cst_22 : f32 to vector<1x384xf32>
    %49 = arith.divf %47, %48 : vector<1x384xf32>
    %50 = arith.mulf %44, %44 : vector<1x384xf32>
    %51 = arith.subf %49, %50 : vector<1x384xf32>
    %cst_23 = arith.constant 0.000000e+00 : f32
    %52 = vector.broadcast %cst_23 : f32 to vector<1x384xf32>
    %53 = arith.maximumf %51, %52 : vector<1x384xf32>
    %cst_24 = arith.constant 9.99999974E-6 : f32
    %54 = vector.broadcast %cst_24 : f32 to vector<1x384xf32>
    %55 = arith.addf %53, %54 : vector<1x384xf32>
    %56 = math.rsqrt %55 : vector<1x384xf32>
    %c0_25 = arith.constant 0 : index
    %c1920 = arith.constant 1920 : index
    %57 = vector.load %arg1[%c0_25, %c1920] : memref<1x3968xf32, #tpu.memory_space<vmem>>, vector<1x384xf32>
    %58 = arith.mulf %56, %57 : vector<1x384xf32>
    %c0_26 = arith.constant 0 : index
    %c2304 = arith.constant 2304 : index
    %59 = vector.load %arg1[%c0_26, %c2304] : memref<1x3968xf32, #tpu.memory_space<vmem>>, vector<1x384xf32>
    %60 = arith.mulf %44, %58 : vector<1x384xf32>
    %61 = arith.subf %59, %60 : vector<1x384xf32>
    %62 = vector.broadcast %58 : vector<1x384xf32> to vector<200x384xf32>
    %63 = arith.mulf %40, %62 : vector<200x384xf32>
    %64 = vector.broadcast %61 : vector<1x384xf32> to vector<200x384xf32>
    %65 = arith.addf %63, %64 : vector<200x384xf32>
    %66 = arith.truncf %65 : vector<200x384xf32> to vector<200x384xbf16>
    %c0_27 = arith.constant 0 : index
    %c0_28 = arith.constant 0 : index
    %67 = vector.load %arg4[%c0_27, %c0_28] : memref<384x256xbf16, #tpu.memory_space<vmem>>, vector<384x256xbf16>
    %cst_29 = arith.constant dense<0.000000e+00> : vector<200x256xf32>
    %68 = tpu.matmul %66, %67, %cst_29 {dimension_numbers = #tpu.dot_dimension_numbers<[1], [0], [0], [1], [0, 0, 1, 1], [], []>} : vector<200x384xbf16>, vector<384x256xbf16>, vector<200x256xf32> -> vector<200x256xf32>
    %c0_30 = arith.constant 0 : index
    %c2688 = arith.constant 2688 : index
    %69 = vector.load %arg1[%c0_30, %c2688] : memref<1x3968xf32, #tpu.memory_space<vmem>>, vector<1x256xf32>
    %70 = vector.broadcast %69 : vector<1x256xf32> to vector<200x256xf32>
    %71 = arith.addf %68, %70 : vector<200x256xf32>
    %cst_31 = arith.constant 0.000000e+00 : f32
    %72 = vector.broadcast %cst_31 : f32 to vector<200x256xf32>
    %73 = arith.maximumf %71, %72 : vector<200x256xf32>
    %cst_32 = arith.constant dense<0.000000e+00> : vector<256xf32>
    %74 = vector.multi_reduction <add>, %73, %cst_32 [0] : vector<200x256xf32> to vector<256xf32>
    %75 = vector.shape_cast %74 : vector<256xf32> to vector<1x256xf32>
    %cst_33 = arith.constant 2.000000e+02 : f32
    %76 = vector.broadcast %cst_33 : f32 to vector<1x256xf32>
    %77 = arith.divf %75, %76 : vector<1x256xf32>
    %78 = arith.mulf %73, %73 : vector<200x256xf32>
    %cst_34 = arith.constant dense<0.000000e+00> : vector<256xf32>
    %79 = vector.multi_reduction <add>, %78, %cst_34 [0] : vector<200x256xf32> to vector<256xf32>
    %80 = vector.shape_cast %79 : vector<256xf32> to vector<1x256xf32>
    %cst_35 = arith.constant 2.000000e+02 : f32
    %81 = vector.broadcast %cst_35 : f32 to vector<1x256xf32>
    %82 = arith.divf %80, %81 : vector<1x256xf32>
    %83 = arith.mulf %77, %77 : vector<1x256xf32>
    %84 = arith.subf %82, %83 : vector<1x256xf32>
    %cst_36 = arith.constant 0.000000e+00 : f32
    %85 = vector.broadcast %cst_36 : f32 to vector<1x256xf32>
    %86 = arith.maximumf %84, %85 : vector<1x256xf32>
    %cst_37 = arith.constant 9.99999974E-6 : f32
    %87 = vector.broadcast %cst_37 : f32 to vector<1x256xf32>
    %88 = arith.addf %86, %87 : vector<1x256xf32>
    %89 = math.rsqrt %88 : vector<1x256xf32>
    %c0_38 = arith.constant 0 : index
    %c2944 = arith.constant 2944 : index
    %90 = vector.load %arg1[%c0_38, %c2944] : memref<1x3968xf32, #tpu.memory_space<vmem>>, vector<1x256xf32>
    %91 = arith.mulf %89, %90 : vector<1x256xf32>
    %c0_39 = arith.constant 0 : index
    %c3200 = arith.constant 3200 : index
    %92 = vector.load %arg1[%c0_39, %c3200] : memref<1x3968xf32, #tpu.memory_space<vmem>>, vector<1x256xf32>
    %93 = arith.mulf %77, %91 : vector<1x256xf32>
    %94 = arith.subf %92, %93 : vector<1x256xf32>
    %95 = vector.broadcast %91 : vector<1x256xf32> to vector<200x256xf32>
    %96 = arith.mulf %73, %95 : vector<200x256xf32>
    %97 = vector.broadcast %94 : vector<1x256xf32> to vector<200x256xf32>
    %98 = arith.addf %96, %97 : vector<200x256xf32>
    %99 = arith.truncf %98 : vector<200x256xf32> to vector<200x256xbf16>
    %c0_40 = arith.constant 0 : index
    %c0_41 = arith.constant 0 : index
    %100 = vector.load %arg5[%c0_40, %c0_41] : memref<256x128xbf16, #tpu.memory_space<vmem>>, vector<256x128xbf16>
    %cst_42 = arith.constant dense<0.000000e+00> : vector<200x128xf32>
    %101 = tpu.matmul %99, %100, %cst_42 {dimension_numbers = #tpu.dot_dimension_numbers<[1], [0], [0], [1], [0, 0, 1, 1], [], []>} : vector<200x256xbf16>, vector<256x128xbf16>, vector<200x128xf32> -> vector<200x128xf32>
    %c0_43 = arith.constant 0 : index
    %c3456 = arith.constant 3456 : index
    %102 = vector.load %arg1[%c0_43, %c3456] : memref<1x3968xf32, #tpu.memory_space<vmem>>, vector<1x128xf32>
    %103 = vector.broadcast %102 : vector<1x128xf32> to vector<200x128xf32>
    %104 = arith.addf %101, %103 : vector<200x128xf32>
    %cst_44 = arith.constant 0.000000e+00 : f32
    %105 = vector.broadcast %cst_44 : f32 to vector<200x128xf32>
    %106 = arith.maximumf %104, %105 : vector<200x128xf32>
    %cst_45 = arith.constant dense<0.000000e+00> : vector<128xf32>
    %107 = vector.multi_reduction <add>, %106, %cst_45 [0] : vector<200x128xf32> to vector<128xf32>
    %108 = vector.shape_cast %107 : vector<128xf32> to vector<1x128xf32>
    %cst_46 = arith.constant 2.000000e+02 : f32
    %109 = vector.broadcast %cst_46 : f32 to vector<1x128xf32>
    %110 = arith.divf %108, %109 : vector<1x128xf32>
    %111 = arith.mulf %106, %106 : vector<200x128xf32>
    %cst_47 = arith.constant dense<0.000000e+00> : vector<128xf32>
    %112 = vector.multi_reduction <add>, %111, %cst_47 [0] : vector<200x128xf32> to vector<128xf32>
    %113 = vector.shape_cast %112 : vector<128xf32> to vector<1x128xf32>
    %cst_48 = arith.constant 2.000000e+02 : f32
    %114 = vector.broadcast %cst_48 : f32 to vector<1x128xf32>
    %115 = arith.divf %113, %114 : vector<1x128xf32>
    %116 = arith.mulf %110, %110 : vector<1x128xf32>
    %117 = arith.subf %115, %116 : vector<1x128xf32>
    %cst_49 = arith.constant 0.000000e+00 : f32
    %118 = vector.broadcast %cst_49 : f32 to vector<1x128xf32>
    %119 = arith.maximumf %117, %118 : vector<1x128xf32>
    %cst_50 = arith.constant 9.99999974E-6 : f32
    %120 = vector.broadcast %cst_50 : f32 to vector<1x128xf32>
    %121 = arith.addf %119, %120 : vector<1x128xf32>
    %122 = math.rsqrt %121 : vector<1x128xf32>
    %c0_51 = arith.constant 0 : index
    %c3584 = arith.constant 3584 : index
    %123 = vector.load %arg1[%c0_51, %c3584] : memref<1x3968xf32, #tpu.memory_space<vmem>>, vector<1x128xf32>
    %124 = arith.mulf %122, %123 : vector<1x128xf32>
    %c0_52 = arith.constant 0 : index
    %c3712 = arith.constant 3712 : index
    %125 = vector.load %arg1[%c0_52, %c3712] : memref<1x3968xf32, #tpu.memory_space<vmem>>, vector<1x128xf32>
    %126 = arith.mulf %110, %124 : vector<1x128xf32>
    %127 = arith.subf %125, %126 : vector<1x128xf32>
    %128 = vector.broadcast %124 : vector<1x128xf32> to vector<200x128xf32>
    %129 = arith.mulf %106, %128 : vector<200x128xf32>
    %130 = vector.broadcast %127 : vector<1x128xf32> to vector<200x128xf32>
    %131 = arith.addf %129, %130 : vector<200x128xf32>
    %132 = arith.truncf %131 : vector<200x128xf32> to vector<200x128xbf16>
    %c0_53 = arith.constant 0 : index
    %c0_54 = arith.constant 0 : index
    %133 = vector.load %arg6[%c0_53, %c0_54] : memref<128x128xbf16, #tpu.memory_space<vmem>>, vector<128x128xbf16>
    %cst_55 = arith.constant dense<0.000000e+00> : vector<200x128xf32>
    %134 = tpu.matmul %132, %133, %cst_55 {dimension_numbers = #tpu.dot_dimension_numbers<[1], [0], [0], [1], [0, 0, 1, 1], [], []>} : vector<200x128xbf16>, vector<128x128xbf16>, vector<200x128xf32> -> vector<200x128xf32>
    %c0_56 = arith.constant 0 : index
    %c3840 = arith.constant 3840 : index
    %135 = vector.load %arg1[%c0_56, %c3840] : memref<1x3968xf32, #tpu.memory_space<vmem>>, vector<1x128xf32>
    %136 = vector.broadcast %135 : vector<1x128xf32> to vector<200x128xf32>
    %137 = arith.addf %134, %136 : vector<200x128xf32>
    %c0_57 = arith.constant 0 : index
    %c0_58 = arith.constant 0 : index
    %138 = vector.load %arg7[%c0_57, %c0_58] : memref<200x128xf32, #tpu.memory_space<vmem>>, vector<200x128xf32>
    tpu.vector_store %arg7[%c0_57, %c0_58], %137 {strides = array<i32>} : memref<200x128xf32, #tpu.memory_space<vmem>>, vector<200x128xf32>,
    return
  }
}

</mosaic_0001>

<bundles_post_ra>
// kernel: tpu_custom_call.1
= control target key start
LH: loop header
LB: loop body
LE: loop exit
PB: predicated region body
PF: predicated region fallthrough
CT: control target
= control target key end

     0   :  { %12 = vsyncpa [#allocation3], 0  ;;  %s9866_s0 = inlined_call_operand.vmem [shape: bf16[200,64], index: 0, kind: input, shape index: {}]   ;;  %s9867_s1 = inlined_call_operand.vmem [shape: f32[1,3968], index: 1, kind: input, shape index: {}]   ;;  %s9868_s2 = inlined_call_operand.vmem [shape: bf16[64,512], index: 2, kind: input, shape index: {}]   ;;  %s9869_s3 = inlined_call_operand.hbm [shape: bf16[512,384], index: 3, kind: input, shape index: {}]   ;;  %s9870_s4 = inlined_call_operand.hbm [shape: bf16[384,256], index: 4, kind: input, shape index: {}]   ;;  %s9871_s5 = inlined_call_operand.hbm [shape: bf16[256,128], index: 5, kind: input, shape index: {}]   ;;  %s9872_s6 = inlined_call_operand.hbm [shape: bf16[128,128], index: 6, kind: input, shape index: {}]   ;;  %s9873_s7 = inlined_call_operand.hbm [shape: f32[200,128], index: 7, kind: output, shape index: {}]  }
   0x1   :  { %13 = vsyncpa [#allocation6], 0 }
   0x2   :  { %14 = vsyncpa [#allocation9], 0 }
   0x3   :  { %15 = vsyncpa [#allocation4], 0  ;;  %s6309_s24 = smov [#allocation5]   ;;  %s6191_s28 = scalar_lea.hbm %s9870_s4, 6144 }
   0x4   :  { %s39_s25 = sshll.u32 %s6309_s24, 4  ;;  %p6192_p0 = scmp.ne.s32.totalorder %s9870_s4, %s6191_s28  ;;  %s40_s25 = int_to_ptr.vmem [resolvable:$true] %s39_s25 }
   0x5   :  { %p6195_p1 = scmp.lt.u32.totalorder %s6191_s28, %s9870_s4 }
   0x7   :  { %p6197_p2 = pnand %p6195_p1, %p6192_p0 }
   0x9   :  { %6200 = shalt.err (!%p6197_p2)
}
   0xa   :  { %s6201_s10 = scalar_lea.vmem %s40_s25, 6144  ;;  %p6206_p4 = scmp.lt.s32.totalorder %s40_s25, %s40_s25 }
   0xb   :  { %p6202_p3 = scmp.ne.s32.totalorder %s40_s25, %s6201_s10  ;;  %p6207_p5 = scmp.lt.s32.totalorder %s6201_s10, %s6201_s10 }
   0xd   :  { %p6208_p6 = por %p6207_p5, %p6206_p4 }
   0xf   :  { %p6209_p7 = pnand %p6208_p6, %p6202_p3 }
  0x11   :  { %6212 = shalt.err (!%p6209_p7)
}
  0x12   :  { %s6310_s11 = smov 128   ;;  %s6311_s12 = smov 8  }
  0x13   :  { %45 = dma.hbm_to_vmem [thread:$0]  %s9870_s4, 6144, %s40_s25, [#allocation6], %s6310_s11, %s6310_s11, %s6311_s12  }
  0x14   :  { %s6312_s15 = smov [#allocation2]   ;;  %s6213_s19 = scalar_lea.hbm %s9869_s3, 12288 }
  0x15   :  { %s27_s16 = sshll.u32 %s6312_s15, 4  ;;  %p6214_p8 = scmp.ne.s32.totalorder %s9869_s3, %s6213_s19  ;;  %s28_s16 = int_to_ptr.vmem [resolvable:$true] %s27_s16 }
  0x16   :  { %p6217_p9 = scmp.lt.u32.totalorder %s6213_s19, %s9869_s3 }
  0x18   :  { %p6219_p10 = pnand %p6217_p9, %p6214_p8 }
  0x1a   :  { %6222 = shalt.err (!%p6219_p10)
}
  0x1b   :  { %s6223_s24 = scalar_lea.vmem %s28_s16, 12288  ;;  %p6228_p12 = scmp.lt.s32.totalorder %s28_s16, %s28_s16 }
  0x1c   :  { %p6224_p11 = scmp.ne.s32.totalorder %s28_s16, %s6223_s24  ;;  %p6229_p13 = scmp.lt.s32.totalorder %s6223_s24, %s6223_s24 }
  0x1e   :  { %p6230_p0 = por %p6229_p13, %p6228_p12 }
  0x20   :  { %p6231_p1 = pnand %p6230_p0, %p6224_p11 }
  0x22   :  { %6234 = shalt.err (!%p6231_p1)
}
  0x23   :  { %s6313_s4 = smov 192   ;;  %s6314_s25 = smov 12  }
  0x24   :  { %33 = dma.hbm_to_vmem [thread:$0]  %s9869_s3, 12288, %s28_s16, [#allocation3], %s6313_s4, %s6313_s4, %s6314_s25  }
  0x25   :  { %s6315_s28 = smov [#allocation7]   ;;  %s6235_s9 = scalar_lea.hbm %s9871_s5, 2048 }
  0x26   :  { %s51_s29 = sshll.u32 %s6315_s28, 4  ;;  %p6236_p2 = scmp.ne.s32.totalorder %s9871_s5, %s6235_s9  ;;  %s52_s29 = int_to_ptr.vmem [resolvable:$true] %s51_s29 }
  0x27   :  { %p6239_p3 = scmp.lt.u32.totalorder %s6235_s9, %s9871_s5 }
  0x29   :  { %p6241_p4 = pnand %p6239_p3, %p6236_p2 }
  0x2b   :  { %6244 = shalt.err (!%p6241_p4)
}
  0x2c   :  { %s6245_s17 = scalar_lea.vmem %s52_s29, 2048  ;;  %p6250_p6 = scmp.lt.s32.totalorder %s52_s29, %s52_s29 }
  0x2d   :  { %p6246_p5 = scmp.ne.s32.totalorder %s52_s29, %s6245_s17  ;;  %p6251_p7 = scmp.lt.s32.totalorder %s6245_s17, %s6245_s17 }
  0x2f   :  { %p6252_p8 = por %p6251_p7, %p6250_p6 }
  0x31   :  { %p6253_p9 = pnand %p6252_p8, %p6246_p5 }
  0x33   :  { %6256 = shalt.err (!%p6253_p9)
}
  0x34   :  { %s6316_s3 = smov 64   ;;  %s6317_s16 = smov 4  }
  0x35   :  { %57 = dma.hbm_to_vmem [thread:$0]  %s9871_s5, 2048, %s52_s29, [#allocation6], %s6316_s3, %s6316_s3, %s6317_s16  }
  0x36   :  { %s6318_s20 = smov [#allocation8]   ;;  %s6257_s24 = scalar_lea.hbm %s9872_s6, 1024 }
  0x37   :  { %s63_s21 = sshll.u32 %s6318_s20, 4  ;;  %p6258_p10 = scmp.ne.s32.totalorder %s9872_s6, %s6257_s24  ;;  %s64_s21 = int_to_ptr.vmem [resolvable:$true] %s63_s21 }
  0x38   :  { %p6261_p11 = scmp.lt.u32.totalorder %s6257_s24, %s9872_s6 }
  0x3a   :  { %p6263_p12 = pnand %p6261_p11, %p6258_p10 }
  0x3c   :  { %6266 = shalt.err (!%p6263_p12)
}
  0x3d   :  { %s6267_s28 = scalar_lea.vmem %s64_s21, 1024  ;;  %p6272_p0 = scmp.lt.s32.totalorder %s64_s21, %s64_s21 }
  0x3e   :  { %p6268_p13 = scmp.ne.s32.totalorder %s64_s21, %s6267_s28  ;;  %p6273_p1 = scmp.lt.s32.totalorder %s6267_s28, %s6267_s28 }
  0x40   :  { %p6274_p2 = por %p6273_p1, %p6272_p0 }
  0x42   :  { %p6275_p3 = pnand %p6274_p2, %p6268_p13 }
  0x44   :  { %6278 = shalt.err (!%p6275_p3)
}
  0x45   :  { %69 = dma.hbm_to_vmem [thread:$0]  %s9872_s6, 1024, %s64_s21, [#allocation9], %s6316_s3, %s6316_s3, %s6317_s16  }
  0x46   :  { %6301 = dma.done.wait [#allocation3], 12288  }
  0x47   :  { %6302 = vsyncadd [#allocation3], 4294955008 }
  0x48   :  { %6303 = dma.done.wait [#allocation6], 8192  }
  0x49   :  { %6304 = vsyncadd [#allocation6], 4294959104 }
  0x4a   :  { %6305 = dma.done.wait [#allocation9], 1024  }
  0x4b   :  { %6306 = vsyncadd [#allocation9], 4294966272  ;;  %v9874_v0 = vmov 0   ;;  %v5910_v1 = vld [vmem:[%s9868_s2 + $0x4] ss:$16 sps:$4 sm:$0xff]   ;;  %vm289_vm0 = vcmask 523264   ;;  %v126_v48 = vlaneseq }
  0x4c   :  { %361 = vmatprep.mubr.bf16.mxu0 %v9874_v0  ;;  %522 = vmatprep.mubr.bf16.mxu1 %v9874_v0  ;;  %v5912_v2 = vld [vmem:[%s9868_s2 + $0xc] ss:$16 sps:$4 sm:$0xff]   ;;  %v5914_v3 = vld [vmem:[%s9868_s2] ss:$16 sps:$4 sm:$0xff]   ;;  %v5915_v4 = vld [vmem:[%s9868_s2 + $0x8] ss:$16 sps:$4 sm:$0xff]  }
  0x4d   :  { %329 = vmatprep.subr.bf16.mxu0 %v5910_v1  ;;  %490 = vmatprep.subr.bf16.mxu1 %v5912_v2  ;;  %v5916_v5 = vld [vmem:[%s9868_s2 + $0x24] ss:$16 sps:$4 sm:$0xff]   ;;  %v5918_v6 = vld [vmem:[%s9868_s2 + $0x2c] ss:$16 sps:$4 sm:$0xff]   ;;  %v5920_v7 = vld [vmem:[%s9868_s2 + $0x20] ss:$16 sps:$4 sm:$0xff]  }
  0x4e   :  { %330 = vmatpush1.bf16.msra.mxu0 %v5914_v3  ;;  %491 = vmatpush1.bf16.msra.mxu1 %v5915_v4  ;;  %v5921_v8 = vld [vmem:[%s9868_s2 + $0x28] ss:$16 sps:$4 sm:$0xff]   ;;  %v5922_v9 = vld [vmem:[%s9868_s2 + $0x44] ss:$16 sps:$4 sm:$0xff]   ;;  %v5924_v10 = vld [vmem:[%s9868_s2 + $0x4c] ss:$16 sps:$4 sm:$0xff]  }
  0x4f   :  { %331 = vmatprep.subr.bf16.mxu0 %v5916_v5  ;;  %492 = vmatprep.subr.bf16.mxu1 %v5918_v6  ;;  %v5926_v11 = vld [vmem:[%s9868_s2 + $0x40] ss:$16 sps:$4 sm:$0xff]   ;;  %v5927_v12 = vld [vmem:[%s9868_s2 + $0x48] ss:$16 sps:$4 sm:$0xff]   ;;  %v5928_v13 = vld [vmem:[%s9868_s2 + $0x64] ss:$16 sps:$4 sm:$0xff]  }
  0x50   :  { %v5930_v14 = vld [vmem:[%s9868_s2 + $0x6c] ss:$16 sps:$4 sm:$0xff]   ;;  %v5932_v15 = vld [vmem:[%s9868_s2 + $0x60] ss:$16 sps:$4 sm:$0xff]   ;;  %v5933_v16 = vld [vmem:[%s9868_s2 + $0x68] ss:$16 sps:$4 sm:$0xff]  }
  0x51   :  { %v5934_v17 = vld [vmem:[%s9866_s0] sm:$0xff]   ;;  %v5935_v18 = vld [vmem:[%s9866_s0 + $0x8] sm:$0xff]   ;;  %v5936_v19 = vld [vmem:[%s9866_s0 + $0x10] sm:$0xff]   ;;  %v6554_v49 = vshrl.u32 %v126_v48, 7  ;;  %vm6322_vm1 = vmmov 0  }
  0x52   :  { %332 = vmatpush1.bf16.msra.mxu0 %v5920_v7  ;;  %493 = vmatpush1.bf16.msra.mxu1 %v5921_v8  ;;  %v5937_v20 = vld [vmem:[%s9866_s0 + $0x18] sm:$0xff]   ;;  %v5938_v21 = vld [vmem:[%s9866_s0 + $0x20] sm:$0xff]   ;;  %v5939_v22 = vld [vmem:[%s9866_s0 + $0x28] sm:$0xff]  }
  0x53   :  { %333 = vmatprep.subr.bf16.mxu0 %v5922_v9  ;;  %494 = vmatprep.subr.bf16.mxu1 %v5924_v10  ;;  %v5940_v23 = vld [vmem:[%s9866_s0 + $0x30] sm:$0xff]   ;;  %v5941_v24 = vld [vmem:[%s9866_s0 + $0x38] sm:$0xff]   ;;  %v5942_v25 = vld [vmem:[%s9866_s0 + $0x40] sm:$0xff]   ;;  %v6557_v53 = vsub.s32 0, %v6554_v49  ;;  %v6560_v54 = vsub.s32 2, %v6554_v49  ;;  %v6566_v57 = vsub.s32 1, %v6554_v49 }
  0x54   :  { %v5943_v26 = vld [vmem:[%s9866_s0 + $0x48] sm:$0xff]   ;;  %v5944_v27 = vld [vmem:[%s9866_s0 + $0x50] sm:$0xff]   ;;  %v5945_v28 = vld [vmem:[%s9866_s0 + $0x58] sm:$0xff]   ;;  %v6569_v58 = vsub.s32 3, %v6554_v49 }
  0x55   :  { %v5946_v29 = vld [vmem:[%s9866_s0 + $0x60] ss:$0 sps:$4 sm:$0xff]   ;;  %v5949_v31 = vld [vmem:[#allocation2 + $0x4] ss:$12 sps:$4 sm:$0xff]   ;;  %v5950_v32 = vld [vmem:[#allocation2 + $0xc8] ss:$12 sps:$4 sm:$0xff]  }
  0x56   :  { %334 = vmatpush1.bf16.msra.mxu0 %v5926_v11  ;;  %495 = vmatpush1.bf16.msra.mxu1 %v5927_v12  ;;  %v5947_v30 = vld [vmem:[#allocation2] ss:$12 sps:$4 sm:$0xff]   ;;  %v5951_v33 = vld [vmem:[#allocation2 + $0x8] ss:$12 sps:$4 sm:$0xff]   ;;  %v5952_v34 = vld [vmem:[#allocation2 + $0x18] ss:$12 sps:$4 sm:$0xff]  }
  0x57   :  { %335 = vmatprep.subr.bf16.mxu0 %v5928_v13  ;;  %496 = vmatprep.subr.bf16.mxu1 %v5930_v14  ;;  %v5954_v35 = vld [vmem:[#allocation2 + $0x1c] ss:$12 sps:$4 sm:$0xff]   ;;  %v5957_v37 = vld [vmem:[#allocation2 + $0x34] ss:$12 sps:$4 sm:$0xff]   ;;  %v5962_v41 = vld [vmem:[#allocation2 + $0x4c] ss:$12 sps:$4 sm:$0xff]  }
  0x58   :  { %v5955_v36 = vld [vmem:[#allocation2 + $0x30] ss:$12 sps:$4 sm:$0xff]   ;;  %v5958_v38 = vld [vmem:[#allocation2 + $0xe0] ss:$12 sps:$4 sm:$0xff]   ;;  %v5960_v40 = vld [vmem:[#allocation2 + $0x48] ss:$12 sps:$4 sm:$0xff]  }
  0x59   :  { %v5959_v39 = vld [vmem:[#allocation2 + $0x20] ss:$12 sps:$4 sm:$0xff]   ;;  %v5965_v43 = vld [vmem:[#allocation2 + $0x64] ss:$12 sps:$4 sm:$0xff]   ;;  %v5970_v47 = vld [vmem:[#allocation2 + $0x7c] ss:$12 sps:$4 sm:$0xff]  }
  0x5a   :  { %336 = vmatpush1.bf16.msra.mxu0 %v5932_v15  ;;  %497 = vmatpush1.bf16.msra.mxu1 %v5933_v16  ;;  %v5963_v42 = vld [vmem:[#allocation2 + $0x60] ss:$12 sps:$4 sm:$0xff]   ;;  %v5966_v44 = vld [vmem:[#allocation2 + $0xf8] ss:$12 sps:$4 sm:$0xff]   ;;  %v5971_v50 = vld [vmem:[#allocation2 + $0x90] ss:$12 sps:$4 sm:$0xff]  }
  0x5b   :  { %2127 = vmatprep.subr.bf16.mxu0 %v5949_v31  ;;  %5320 = vmatprep.subr.bf16.mxu1 %v5950_v32  ;;  %v5967_v45 = vld [vmem:[#allocation2 + $0x38] ss:$12 sps:$4 sm:$0xff]   ;;  %v5973_v51 = vld [vmem:[#allocation2 + $0x94] ss:$12 sps:$4 sm:$0xff]   ;;  %v5974_v52 = vld [vmem:[#allocation2 + $0x110] ss:$12 sps:$4 sm:$0xff]  }
  0x5c   :  { %v5968_v46 = vld [vmem:[#allocation2 + $0x78] ss:$12 sps:$4 sm:$0xff]   ;;  %10040 = vst [vmem:[#allocation15_spill] sm:$0xff] %v6557_v53  ;;  %10041 = vst [vmem:[#allocation16_spill] sm:$0xff] %v6560_v54  ;;  %v5975_v55 = vld [vmem:[#allocation2 + $0x50] ss:$12 sps:$4 sm:$0xff]  }
  0x5d   :  { %5124 = vmatmul.mubr.msk.bf16.vlgmr.msra.gmra.mrb[0].mxu0 %vm289_vm0, %v5934_v17  ;;  %5137 = vmatmul.mubr.msk.bf16.vlgmr.msra.gmra.mrb[0].mxu1 %vm289_vm0, %v5934_v17  ;;  %v124_v56 = vld [vmem:[%s9867_s1] sm:$0xf]  ;;  %10042 = vst [vmem:[#allocation17_spill] sm:$0xff] %v6566_v57  ;;  %10043 = vst [vmem:[#allocation18_spill] sm:$0xff] %v6569_v58 }
  0x5e   :  { %371 = vmatprep.mubr.bf16.mxu0 %v9874_v0  ;;  %532 = vmatprep.mubr.bf16.mxu1 %v9874_v0  ;;  %v6572_v59 = vrot.slane %v124_v56, %v6557_v53  ;;  %v6575_v60 = vrot.slane %v124_v56, %v6560_v54  ;;  %v6578_v61 = vrot.slane %v124_v56, %v6566_v57 }
  0x5f   :  { %2128 = vmatpush1.bf16.msra.mxu0 %v5947_v30  ;;  %5321 = vmatpush3.bf16.msra.mxu1 %v5951_v33  ;;  %v6581_v62 = vrot.slane %v124_v56, %v6569_v58 }
  0x60   :  { %2129 = vmatprep.subr.bf16.mxu0 %v5954_v35  ;;  %5322 = vmatprep.subr.bf16.mxu1 %v5958_v38 }
  0x63   :  { %2130 = vmatpush1.bf16.msra.mxu0 %v5952_v34  ;;  %5323 = vmatpush3.bf16.msra.mxu1 %v5959_v39 }
  0x64   :  { %2131 = vmatprep.subr.bf16.mxu0 %v5957_v37  ;;  %5324 = vmatprep.subr.bf16.mxu1 %v5966_v44 }
  0x65   :  { %5125 = vmatmul.mubr.msk.bf16.gmra.mrb[4].mxu0 %vm289_vm0, %v5935_v18  ;;  %5138 = vmatmul.mubr.msk.bf16.gmra.mrb[4].mxu1 %vm289_vm0, %v5935_v18 }
  0x66   :  { %381 = vmatprep.mubr.bf16.mxu0 %v9874_v0  ;;  %542 = vmatprep.mubr.bf16.mxu1 %v9874_v0 }
  0x67   :  { %2132 = vmatpush1.bf16.msra.mxu0 %v5955_v36  ;;  %5325 = vmatpush3.bf16.msra.mxu1 %v5967_v45 }
  0x68   :  { %2133 = vmatprep.subr.bf16.mxu0 %v5962_v41  ;;  %5326 = vmatprep.subr.bf16.mxu1 %v5974_v52 }
  0x6b   :  { %2134 = vmatpush1.bf16.msra.mxu0 %v5960_v40  ;;  %5327 = vmatpush3.bf16.msra.mxu1 %v5975_v55 }
  0x6c   :  { %2135 = vmatprep.subr.bf16.mxu0 %v5965_v43 }
  0x6d   :  { %5126 = vmatmul.mubr.msk.bf16.gmra.mrb[8].mxu0 %vm289_vm0, %v5936_v19  ;;  %5139 = vmatmul.mubr.msk.bf16.gmra.mrb[8].mxu1 %vm289_vm0, %v5936_v19 }
  0x6e   :  { %391 = vmatprep.mubr.bf16.mxu0 %v9874_v0  ;;  %552 = vmatprep.mubr.bf16.mxu1 %v9874_v0 }
  0x6f   :  { %2136 = vmatpush1.bf16.msra.mxu0 %v5963_v42 }
  0x70   :  { %2137 = vmatprep.subr.bf16.mxu0 %v5970_v47 }
  0x73   :  { %2138 = vmatpush1.bf16.msra.mxu0 %v5968_v46 }
  0x74   :  { %2139 = vmatprep.subr.bf16.mxu0 %v5973_v51 }
  0x75   :  { %5127 = vmatmul.mubr.msk.bf16.gmra.mrb[12].mxu0 %vm289_vm0, %v5937_v20  ;;  %5140 = vmatmul.mubr.msk.bf16.gmra.mrb[12].mxu1 %vm289_vm0, %v5937_v20 }
  0x76   :  { %401 = vmatprep.mubr.bf16.mxu0 %v9874_v0  ;;  %562 = vmatprep.mubr.bf16.mxu1 %v9874_v0 }
  0x77   :  { %2140 = vmatpush1.bf16.msra.mxu0 %v5971_v50 }
  0x7d   :  { %5128 = vmatmul.mubr.msk.bf16.gmra.mrb[16].mxu0 %vm289_vm0, %v5938_v21  ;;  %5141 = vmatmul.mubr.msk.bf16.gmra.mrb[16].mxu1 %vm289_vm0, %v5938_v21 }
  0x7e   :  { %411 = vmatprep.mubr.bf16.mxu0 %v9874_v0  ;;  %572 = vmatprep.mubr.bf16.mxu1 %v9874_v0 }
  0x85   :  { %5129 = vmatmul.mubr.msk.bf16.gmra.mrb[20].mxu0 %vm289_vm0, %v5939_v22  ;;  %5142 = vmatmul.mubr.msk.bf16.gmra.mrb[20].mxu1 %vm289_vm0, %v5939_v22 }
  0x86   :  { %421 = vmatprep.mubr.bf16.mxu0 %v9874_v0  ;;  %582 = vmatprep.mubr.bf16.mxu1 %v9874_v0 }
  0x8d   :  { %5130 = vmatmul.mubr.msk.bf16.gmra.mrb[24].mxu0 %vm289_vm0, %v5940_v23  ;;  %5143 = vmatmul.mubr.msk.bf16.gmra.mrb[24].mxu1 %vm289_vm0, %v5940_v23 }
  0x8e   :  { %431 = vmatprep.mubr.bf16.mxu0 %v9874_v0  ;;  %592 = vmatprep.mubr.bf16.mxu1 %v9874_v0 }
  0x95   :  { %5131 = vmatmul.mubr.msk.bf16.gmra.mrb[28].mxu0 %vm289_vm0, %v5941_v24  ;;  %5144 = vmatmul.mubr.msk.bf16.gmra.mrb[28].mxu1 %vm289_vm0, %v5941_v24 }
  0x96   :  { %441 = vmatprep.mubr.bf16.mxu0 %v9874_v0  ;;  %602 = vmatprep.mubr.bf16.mxu1 %v9874_v0 }
  0x9d   :  { %5132 = vmatmul.mubr.msk.bf16.gmra.mrb[32].mxu0 %vm289_vm0, %v5942_v25  ;;  %5145 = vmatmul.mubr.msk.bf16.gmra.mrb[32].mxu1 %vm289_vm0, %v5942_v25 }
  0x9e   :  { %451 = vmatprep.mubr.bf16.mxu0 %v9874_v0  ;;  %612 = vmatprep.mubr.bf16.mxu1 %v9874_v0 }
  0xa5   :  { %5133 = vmatmul.mubr.msk.bf16.gmra.mrb[36].mxu0 %vm289_vm0, %v5943_v26  ;;  %5146 = vmatmul.mubr.msk.bf16.gmra.mrb[36].mxu1 %vm289_vm0, %v5943_v26 }
  0xa6   :  { %461 = vmatprep.mubr.bf16.mxu0 %v9874_v0  ;;  %622 = vmatprep.mubr.bf16.mxu1 %v9874_v0 }
  0xad   :  { %5134 = vmatmul.mubr.msk.bf16.gmra.mrb[40].mxu0 %vm289_vm0, %v5944_v27  ;;  %5147 = vmatmul.mubr.msk.bf16.gmra.mrb[40].mxu1 %vm289_vm0, %v5944_v27 }
  0xae   :  { %471 = vmatprep.mubr.bf16.mxu0 %v9874_v0  ;;  %632 = vmatprep.mubr.bf16.mxu1 %v9874_v0 }
  0xb5   :  { %5135 = vmatmul.mubr.msk.bf16.gmra.mrb[44].mxu0 %vm289_vm0, %v5945_v28  ;;  %5148 = vmatmul.mubr.msk.bf16.gmra.mrb[44].mxu1 %vm289_vm0, %v5945_v28 }
  0xb6   :  { %481 = vmatprep.mubr.bf16.mxu0 %v9874_v0  ;;  %642 = vmatprep.mubr.bf16.mxu1 %v9874_v0 }
  0xbd   :  { %5136 = vmatmul.mubr.msk.bf16.gmra.mrb[48].mxu0 %vm289_vm0, %v5946_v29  ;;  %5149 = vmatmul.mubr.msk.bf16.gmra.mrb[48].mxu1 %vm289_vm0, %v5946_v29 }
 0x130   :  { %v363_v63 = vpop.f32.mrb[0].mxu0  ;;  %v524_v1 = vpop.f32.mrb[0].mxu1 }
 0x131   :  { %v364_v2 = vadd.f32 %v363_v63, %v6572_v59  ;;  %v525_v3 = vadd.f32 %v524_v1, %v6575_v60  ;;  %v365_v4 = vpop.f32.mrb[1].mxu0  ;;  %v526_v5 = vpop.f32.mrb[1].mxu1 }
 0x132   :  { %v366_v6 = vadd.f32 %v365_v4, %v6578_v61  ;;  %v527_v7 = vadd.f32 %v526_v5, %v6581_v62  ;;  %v367_v8 = vpop.f32.mrb[2].mxu0  ;;  %v528_v9 = vpop.f32.mrb[2].mxu1 }
 0x133   :  { %v6587_v10 = vmax.f32 %v364_v2, 0.0  ;;  %v368_v11 = vadd.f32 %v367_v8, %v6572_v59  ;;  %v529_v12 = vadd.f32 %v528_v9, %v6575_v60  ;;  %v369_v13 = vpop.f32.mrb[3].mxu0  ;;  %v530_v14 = vpop.f32.mrb[3].mxu1  ;;  %v6591_v15 = vmax.f32 %v525_v3, 0.0 }
 0x134   :  { %v6593_v16 = vmax.f32 %v366_v6, 0.0  ;;  %v370_v17 = vadd.f32 %v369_v13, %v6578_v61  ;;  %v531_v18 = vadd.f32 %v530_v14, %v6581_v62  ;;  %v6597_v19 = vmax.f32 %v527_v7, 0.0 }
 0x135   :  { %10044 = vst [vmem:[#allocation19_spill] sm:$0xff] %v6591_v15  ;;  %v6599_v20 = vmax.f32 %v368_v11, 0.0  ;;  %v6601_v21 = vmax.f32 %v529_v12, 0.0  ;;  %v876_v23 = vmul.f32 %v6587_v10, %v6587_v10  ;;  %v878_v24 = vmul.f32 %v6591_v15, %v6591_v15 }
 0x136   :  { %10045 = vst [vmem:[#allocation20_spill] sm:$0xff] %v6597_v19  ;;  %v6603_v22 = vmax.f32 %v370_v17, 0.0  ;;  %v877_v25 = vmul.f32 %v6593_v16, %v6593_v16  ;;  %v6611_v26 = vmax.f32 %v531_v18, 0.0  ;;  %v879_v29 = vmul.f32 %v6597_v19, %v6597_v19 }
 0x137   :  { %10046 = vst [vmem:[#allocation21_spill] sm:$0xff] %v6601_v21  ;;  %v751_v30 = vadd.f32 %v6599_v20, %v6587_v10  ;;  %v880_v35 = vmul.f32 %v6599_v20, %v6599_v20  ;;  %v882_v36 = vmul.f32 %v6601_v21, %v6601_v21  ;;  %v811_v55 = vadd.f32 %v6601_v21, %v6591_v15 }
 0x138   :  { %10047 = vst [vmem:[#allocation22_spill] sm:$0xff] %v6603_v22  ;;  %10048 = vst [vmem:[#allocation23_spill] sm:$0xff] %v6611_v26  ;;  %v373_v27 = vpop.f32.mrb[4].mxu0  ;;  %v534_v28 = vpop.f32.mrb[4].mxu1  ;;  %v881_v41 = vmul.f32 %v6603_v22, %v6603_v22  ;;  %v883_v47 = vmul.f32 %v6611_v26, %v6611_v26  ;;  %v781_v52 = vadd.f32 %v6603_v22, %v6593_v16 }
 0x139   :  { %v374_v31 = vadd.f32 %v373_v27, %v6572_v59  ;;  %v535_v32 = vadd.f32 %v534_v28, %v6575_v60  ;;  %v375_v33 = vpop.f32.mrb[5].mxu0  ;;  %v536_v34 = vpop.f32.mrb[5].mxu1  ;;  %v841_v56 = vadd.f32 %v6611_v26, %v6597_v19  ;;  %v976_v5 = vadd.f32 %v880_v35, %v876_v23  ;;  %v5978_v35 = vld [vmem:[#allocation2 + $0xac] ss:$12 sps:$4 sm:$0xff]  }
 0x13a   :  { %v376_v37 = vadd.f32 %v375_v33, %v6578_v61  ;;  %v537_v38 = vadd.f32 %v536_v34, %v6581_v62  ;;  %v377_v39 = vpop.f32.mrb[6].mxu0  ;;  %v538_v40 = vpop.f32.mrb[6].mxu1  ;;  %v1006_v9 = vadd.f32 %v881_v41, %v877_v25  ;;  %v1036_v11 = vadd.f32 %v882_v36, %v878_v24  ;;  %2141 = vmatprep.subr.bf16.mxu0 %v5978_v35 }
 0x13b   :  { %v6627_v42 = vmax.f32 %v374_v31, 0.0  ;;  %v6629_v43 = vmax.f32 %v535_v32, 0.0  ;;  %v378_v44 = vadd.f32 %v377_v39, %v6572_v59  ;;  %v379_v45 = vpop.f32.mrb[7].mxu0  ;;  %v540_v46 = vpop.f32.mrb[7].mxu1  ;;  %v539_v51 = vadd.f32 %v538_v40, %v6575_v60 }
 0x13c   :  { %v6634_v48 = vmax.f32 %v376_v37, 0.0  ;;  %v6636_v50 = vmax.f32 %v537_v38, 0.0  ;;  %v380_v63 = vadd.f32 %v379_v45, %v6578_v61  ;;  %v541_v4 = vadd.f32 %v540_v46, %v6581_v62 }
 0x13d   :  { %10049 = vst [vmem:[#allocation24_spill] sm:$0xff] %v6629_v43  ;;  %v884_v1 = vmul.f32 %v6627_v42, %v6627_v42  ;;  %v886_v2 = vmul.f32 %v6629_v43, %v6629_v43  ;;  %v752_v6 = vadd.f32 %v751_v30, %v6627_v42  ;;  %v6656_v8 = vmax.f32 %v378_v44, 0.0  ;;  %v5976_v44 = vld [vmem:[#allocation2 + $0xa8] ss:$12 sps:$4 sm:$0xff]  }
 0x13e   :  { %10050 = vst [vmem:[#allocation25_spill] sm:$0xff] %v6634_v48  ;;  %10051 = vst [vmem:[#allocation26_spill] sm:$0xff] %v6636_v50  ;;  %v885_v3 = vmul.f32 %v6634_v48, %v6634_v48  ;;  %v887_v7 = vmul.f32 %v6636_v50, %v6636_v50  ;;  %v1066_v12 = vadd.f32 %v883_v47, %v879_v29  ;;  %v6658_v13 = vmax.f32 %v539_v51, 0.0 }
 0x13f   :  { %10052 = vst [vmem:[#allocation27_spill] sm:$0xff] %v6656_v8  ;;  %v812_v18 = vadd.f32 %v811_v55, %v6629_v43  ;;  %v782_v27 = vadd.f32 %v781_v52, %v6634_v48  ;;  %v842_v23 = vadd.f32 %v841_v56, %v6636_v50  ;;  %v6663_v28 = vmax.f32 %v380_v63, 0.0  ;;  %2142 = vmatpush1.bf16.msra.mxu0 %v5976_v44 }
 0x140   :  { %10053 = vst [vmem:[#allocation28_spill] sm:$0xff] %v6658_v13  ;;  %v383_v14 = vpop.f32.mrb[8].mxu0  ;;  %v544_v17 = vpop.f32.mrb[8].mxu1  ;;  %v977_v32 = vadd.f32 %v976_v5, %v884_v1  ;;  %v1037_v33 = vadd.f32 %v1036_v11, %v886_v2  ;;  %v1007_v34 = vadd.f32 %v1006_v9, %v885_v3  ;;  %v6665_v25 = vmax.f32 %v541_v4, 0.0  ;;  %v5981_v5 = vld [vmem:[#allocation2 + $0xc4] ss:$12 sps:$4 sm:$0xff]  }
 0x141   :  { %10054 = vst [vmem:[#allocation29_spill] sm:$0xff] %v6663_v28  ;;  %v385_v30 = vpop.f32.mrb[9].mxu0  ;;  %v546_v31 = vpop.f32.mrb[9].mxu1  ;;  %v1067_v36 = vadd.f32 %v1066_v12, %v887_v7  ;;  %v753_v37 = vadd.f32 %v752_v6, %v6656_v8  ;;  %v384_v38 = vadd.f32 %v383_v14, %v6572_v59  ;;  %v545_v39 = vadd.f32 %v544_v17, %v6575_v60  ;;  %v5979_v12 = vld [vmem:[#allocation2 + $0xc0] ss:$12 sps:$4 sm:$0xff]  }
 0x142   :  { %10055 = vst [vmem:[#allocation30_spill] sm:$0xff] %v6665_v25  ;;  %v387_v24 = vpop.f32.mrb[10].mxu0  ;;  %v548_v29 = vpop.f32.mrb[10].mxu1  ;;  %v888_v45 = vmul.f32 %v6656_v8, %v6656_v8  ;;  %v890_v46 = vmul.f32 %v6658_v13, %v6658_v13  ;;  %v386_v47 = vadd.f32 %v385_v30, %v6578_v61  ;;  %v547_v51 = vadd.f32 %v546_v31, %v6581_v62 }
 0x143   :  { %v389_v40 = vpop.f32.mrb[11].mxu0  ;;  %v550_v41 = vpop.f32.mrb[11].mxu1  ;;  %v889_v52 = vmul.f32 %v6663_v28, %v6663_v28  ;;  %v6678_v55 = vmax.f32 %v384_v38, 0.0  ;;  %v6680_v56 = vmax.f32 %v545_v39, 0.0  ;;  %v388_v63 = vadd.f32 %v387_v24, %v6572_v59  ;;  %2143 = vmatprep.subr.bf16.mxu0 %v5981_v5 }
 0x144   :  { %v891_v1 = vmul.f32 %v6665_v25, %v6665_v25  ;;  %v6685_v2 = vmax.f32 %v386_v47, 0.0  ;;  %v6687_v3 = vmax.f32 %v547_v51, 0.0  ;;  %v549_v4 = vadd.f32 %v548_v29, %v6575_v60  ;;  %2144 = vmatpush1.bf16.msra.mxu0 %v5979_v12 }
 0x145   :  { %10056 = vst [vmem:[#allocation31_spill] sm:$0xff] %v6678_v55  ;;  %10057 = vst [vmem:[#allocation32_spill] sm:$0xff] %v6680_v56  ;;  %v813_v6 = vadd.f32 %v812_v18, %v6658_v13  ;;  %v783_v7 = vadd.f32 %v782_v27, %v6663_v28  ;;  %v843_v9 = vadd.f32 %v842_v23, %v6665_v25  ;;  %v6704_v35 = vmax.f32 %v388_v63, 0.0  ;;  %v5986_v13 = vld [vmem:[#allocation2 + $0xdc] ss:$12 sps:$4 sm:$0xff]  }
 0x146   :  { %10058 = vst [vmem:[#allocation33_spill] sm:$0xff] %v6685_v2  ;;  %10059 = vst [vmem:[#allocation34_spill] sm:$0xff] %v6687_v3  ;;  %v390_v11 = vadd.f32 %v389_v40, %v6578_v61  ;;  %v892_v14 = vmul.f32 %v6678_v55, %v6678_v55  ;;  %v894_v17 = vmul.f32 %v6680_v56, %v6680_v56  ;;  %v6706_v51 = vmax.f32 %v549_v4, 0.0  ;;  %v5984_v25 = vld [vmem:[#allocation2 + $0xd8] ss:$12 sps:$4 sm:$0xff]  }
 0x147   :  { %v893_v30 = vmul.f32 %v6685_v2, %v6685_v2  ;;  %v551_v31 = vadd.f32 %v550_v41, %v6581_v62  ;;  %v978_v27 = vadd.f32 %v977_v32, %v888_v45  ;;  %v754_v23 = vadd.f32 %v753_v37, %v6678_v55  ;;  %10060 = vst [vmem:[#allocation35_spill] sm:$0xff] %v6704_v35  ;;  %v5998_v55 = vld [vmem:[#allocation2 + $0x158] ss:$12 sps:$4 sm:$0xff]  }
 0x148   :  { %v393_v24 = vpop.f32.mrb[12].mxu0  ;;  %v554_v18 = vpop.f32.mrb[12].mxu1  ;;  %v895_v29 = vmul.f32 %v6687_v3, %v6687_v3  ;;  %v1038_v40 = vadd.f32 %v1037_v33, %v890_v46  ;;  %v1008_v44 = vadd.f32 %v1007_v34, %v889_v52  ;;  %v1068_v47 = vadd.f32 %v1067_v36, %v891_v1  ;;  %10061 = vst [vmem:[#allocation36_spill] sm:$0xff] %v6706_v51 }
 0x149   :  { %v395_v38 = vpop.f32.mrb[13].mxu0  ;;  %v556_v39 = vpop.f32.mrb[13].mxu1  ;;  %v814_v32 = vadd.f32 %v813_v6, %v6680_v56  ;;  %v784_v37 = vadd.f32 %v783_v7, %v6685_v2  ;;  %v844_v45 = vadd.f32 %v843_v9, %v6687_v3  ;;  %v6711_v5 = vmax.f32 %v390_v11, 0.0  ;;  %2145 = vmatprep.subr.bf16.mxu0 %v5986_v13  ;;  %v5992_v3 = vld [vmem:[#allocation2 + $0x108] ss:$12 sps:$4 sm:$0xff]  }
 0x14a   :  { %v397_v41 = vpop.f32.mrb[14].mxu0  ;;  %v558_v0 = vpop.f32.mrb[14].mxu1  ;;  %v979_v12 = vadd.f32 %v978_v27, %v892_v14  ;;  %v1039_v33 = vadd.f32 %v1038_v40, %v894_v17  ;;  %v1009_v34 = vadd.f32 %v1008_v44, %v893_v30  ;;  %v6713_v36 = vmax.f32 %v551_v31, 0.0  ;;  %2146 = vmatpush1.bf16.msra.mxu0 %v5984_v25  ;;  %v5989_v14 = vld [vmem:[#allocation2 + $0xf4] ss:$12 sps:$4 sm:$0xff]  }
 0x14b   :  { %10062 = vst [vmem:[#allocation37_spill] sm:$0xff] %v6711_v5  ;;  %v399_v63 = vpop.f32.mrb[15].mxu0  ;;  %v560_v43 = vpop.f32.mrb[15].mxu1  ;;  %v1069_v46 = vadd.f32 %v1068_v47, %v895_v29  ;;  %v755_v52 = vadd.f32 %v754_v23, %v6704_v35  ;;  %v394_v1 = vadd.f32 %v393_v24, %v6572_v59  ;;  %v555_v4 = vadd.f32 %v554_v18, %v6575_v60  ;;  %v5987_v31 = vld [vmem:[#allocation2 + $0xf0] ss:$12 sps:$4 sm:$0xff]  }
 0x14c   :  { %10063 = vst [vmem:[#allocation38_spill] sm:$0xff] %v6713_v36  ;;  %v896_v6 = vmul.f32 %v6704_v35, %v6704_v35  ;;  %v898_v7 = vmul.f32 %v6706_v51, %v6706_v51  ;;  %v396_v9 = vadd.f32 %v395_v38, %v6578_v61  ;;  %v557_v11 = vadd.f32 %v556_v39, %v6581_v62 }
 0x14d   :  { %v897_v13 = vmul.f32 %v6711_v5, %v6711_v5  ;;  %v6726_v17 = vmax.f32 %v394_v1, 0.0  ;;  %v6728_v30 = vmax.f32 %v555_v4, 0.0  ;;  %v398_v25 = vadd.f32 %v397_v41, %v6572_v59  ;;  %2147 = vmatprep.subr.bf16.mxu0 %v5989_v14  ;;  %v5994_v14 = vld [vmem:[#allocation2 + $0x10c] ss:$12 sps:$4 sm:$0xff]  }
 0x14e   :  { %v899_v24 = vmul.f32 %v6713_v36, %v6713_v36  ;;  %v6733_v18 = vmax.f32 %v396_v9, 0.0  ;;  %v6735_v27 = vmax.f32 %v557_v11, 0.0  ;;  %v559_v23 = vadd.f32 %v558_v0, %v6575_v60  ;;  %2148 = vmatpush1.bf16.msra.mxu0 %v5987_v31 }
 0x14f   :  { %10064 = vst [vmem:[#allocation39_spill] sm:$0xff] %v6726_v17  ;;  %10065 = vst [vmem:[#allocation40_spill] sm:$0xff] %v6728_v30  ;;  %v815_v39 = vadd.f32 %v814_v32, %v6706_v51  ;;  %v785_v40 = vadd.f32 %v784_v37, %v6711_v5  ;;  %v845_v44 = vadd.f32 %v844_v45, %v6713_v36  ;;  %v6752_v51 = vmax.f32 %v398_v25, 0.0  ;;  %v6005_v5 = vld [vmem:[#allocation2 + $0x154] ss:$12 sps:$4 sm:$0xff]  }
 0x150   :  { %10066 = vst [vmem:[#allocation41_spill] sm:$0xff] %v6733_v18  ;;  %10067 = vst [vmem:[#allocation42_spill] sm:$0xff] %v6735_v27  ;;  %v403_v29 = vpop.f32.mrb[16].mxu0  ;;  %v564_v38 = vpop.f32.mrb[16].mxu1  ;;  %v400_v47 = vadd.f32 %v399_v63, %v6578_v61  ;;  %v900_v4 = vmul.f32 %v6726_v17, %v6726_v17  ;;  %v902_v0 = vmul.f32 %v6728_v30, %v6728_v30  ;;  %v6754_v26 = vmax.f32 %v559_v23, 0.0 }
 0x151   :  { %v405_v41 = vpop.f32.mrb[17].mxu0  ;;  %v566_v1 = vpop.f32.mrb[17].mxu1  ;;  %v901_v9 = vmul.f32 %v6733_v18, %v6733_v18  ;;  %v561_v32 = vadd.f32 %v560_v43, %v6581_v62  ;;  %v980_v45 = vadd.f32 %v979_v12, %v896_v6  ;;  %v756_v63 = vadd.f32 %v755_v52, %v6726_v17  ;;  %10068 = vst [vmem:[#allocation43_spill] sm:$0xff] %v6752_v51  ;;  %v5983_v23 = vld [vmem:[#allocation2 + $0x68] ss:$12 sps:$4 sm:$0xff]  }
 0x152   :  { %v407_v11 = vpop.f32.mrb[18].mxu0  ;;  %v568_v37 = vpop.f32.mrb[18].mxu1  ;;  %v903_v31 = vmul.f32 %v6735_v27, %v6735_v27  ;;  %v1040_v50 = vadd.f32 %v1039_v33, %v898_v7  ;;  %v1010_v21 = vadd.f32 %v1009_v34, %v897_v13  ;;  %v1070_v15 = vadd.f32 %v1069_v46, %v899_v24  ;;  %10069 = vst [vmem:[#allocation44_spill] sm:$0xff] %v6754_v26  ;;  %v5982_v33 = vld [vmem:[#allocation2 + $0x128] ss:$12 sps:$4 sm:$0xff]  }
 0x153   :  { %v409_v56 = vpop.f32.mrb[19].mxu0  ;;  %v570_v36 = vpop.f32.mrb[19].mxu1  ;;  %2149 = vmatprep.subr.bf16.mxu0 %v5994_v14  ;;  %v816_v43 = vadd.f32 %v815_v39, %v6728_v30  ;;  %v786_v12 = vadd.f32 %v785_v40, %v6733_v18  ;;  %v846_v52 = vadd.f32 %v845_v44, %v6735_v27  ;;  %v6759_v6 = vmax.f32 %v400_v47, 0.0  ;;  %v5997_v34 = vld [vmem:[#allocation2 + $0x124] ss:$12 sps:$4 sm:$0xff]   ;;  %5328 = vmatprep.subr.bf16.mxu1 %v5982_v33 }
 0x154   :  { %2150 = vmatpush1.bf16.msra.mxu0 %v5992_v3  ;;  %v981_v25 = vadd.f32 %v980_v45, %v900_v4  ;;  %v1041_v19 = vadd.f32 %v1040_v50, %v902_v0  ;;  %v1011_v17 = vadd.f32 %v1010_v21, %v901_v9  ;;  %v6761_v35 = vmax.f32 %v561_v32, 0.0  ;;  %v5995_v39 = vld [vmem:[#allocation2 + $0x120] ss:$12 sps:$4 sm:$0xff]   ;;  %5329 = vmatpush3.bf16.msra.mxu1 %v5983_v23 }
 0x155   :  { %10070 = vst [vmem:[#allocation45_spill] sm:$0xff] %v6759_v6  ;;  %v1071_v46 = vadd.f32 %v1070_v15, %v903_v31  ;;  %v757_v7 = vadd.f32 %v756_v63, %v6752_v51  ;;  %v404_v13 = vadd.f32 %v403_v29, %v6572_v59  ;;  %v565_v24 = vadd.f32 %v564_v38, %v6575_v60 }
 0x156   :  { %10071 = vst [vmem:[#allocation46_spill] sm:$0xff] %v6761_v35  ;;  %v904_v40 = vmul.f32 %v6752_v51, %v6752_v51  ;;  %v906_v50 = vmul.f32 %v6754_v26, %v6754_v26  ;;  %v406_v21 = vadd.f32 %v405_v41, %v6578_v61  ;;  %v567_v3 = vadd.f32 %v566_v1, %v6581_v62 }
 0x157   :  { %v905_v29 = vmul.f32 %v6759_v6, %v6759_v6  ;;  %v6774_v47 = vmax.f32 %v404_v13, 0.0  ;;  %v6776_v38 = vmax.f32 %v565_v24, 0.0  ;;  %v408_v4 = vadd.f32 %v407_v11, %v6572_v59  ;;  %2151 = vmatprep.subr.bf16.mxu0 %v5997_v34  ;;  %v5990_v11 = vld [vmem:[#allocation2 + $0x140] ss:$12 sps:$4 sm:$0xff]  }
 0x158   :  { %v413_v44 = vpop.f32.mrb[20].mxu0  ;;  %v574_v15 = vpop.f32.mrb[20].mxu1  ;;  %v907_v41 = vmul.f32 %v6761_v35, %v6761_v35  ;;  %v6785_v1 = vmax.f32 %v406_v21, 0.0  ;;  %v6787_v32 = vmax.f32 %v567_v3, 0.0  ;;  %v569_v14 = vadd.f32 %v568_v37, %v6575_v60  ;;  %2152 = vmatpush1.bf16.msra.mxu0 %v5995_v39  ;;  %v5991_v21 = vld [vmem:[#allocation2 + $0x80] ss:$12 sps:$4 sm:$0xff]   ;;  %5330 = vmatprep.subr.bf16.mxu1 %v5990_v11 }
 0x159   :  { %10072 = vst [vmem:[#allocation47_spill] sm:$0xff] %v6774_v47  ;;  %10073 = vst [vmem:[#allocation48_spill] sm:$0xff] %v6776_v38  ;;  %v6779_v0 = vpop.f32.mrb[21].mxu0  ;;  %v6781_v9 = vpop.f32.mrb[21].mxu1  ;;  %v817_v31 = vadd.f32 %v816_v43, %v6754_v26  ;;  %v787_v33 = vadd.f32 %v786_v12, %v6759_v6  ;;  %v847_v34 = vadd.f32 %v846_v52, %v6761_v35  ;;  %v6000_v37 = vld [vmem:[#allocation2 + $0x138] ss:$12 sps:$4 sm:$0xff]   ;;  %5331 = vmatpush3.bf16.msra.mxu1 %v5991_v21 }
 0x15a   :  { %10074 = vst [vmem:[#allocation49_spill] sm:$0xff] %v6785_v1  ;;  %10075 = vst [vmem:[#allocation50_spill] sm:$0xff] %v6787_v32  ;;  %v6790_v45 = vpop.f32.mrb[22].mxu0  ;;  %v6792_v63 = vpop.f32.mrb[22].mxu1  ;;  %v410_v13 = vadd.f32 %v409_v56, %v6578_v61  ;;  %v908_v3 = vmul.f32 %v6774_v47, %v6774_v47  ;;  %v910_v39 = vmul.f32 %v6776_v38, %v6776_v38  ;;  %v6002_v52 = vld [vmem:[#allocation2 + $0x13c] ss:$12 sps:$4 sm:$0xff]   ;;  %5332 = vmatprep.subr.bf16.mxu1 %v5998_v55 }
 0x15b   :  { %v6798_v24 = vpop.f32.mrb[23].mxu0  ;;  %v6800_v23 = vpop.f32.mrb[23].mxu1  ;;  %v909_v43 = vmul.f32 %v6785_v1, %v6785_v1  ;;  %v571_v12 = vadd.f32 %v570_v36, %v6581_v62  ;;  %v982_v56 = vadd.f32 %v981_v25, %v904_v40  ;;  %v758_v26 = vadd.f32 %v757_v7, %v6774_v47  ;;  %2153 = vmatprep.subr.bf16.mxu0 %v6002_v52  ;;  %v5999_v11 = vld [vmem:[#allocation2 + $0x98] ss:$12 sps:$4 sm:$0xff]  }
 0x15c   :  { %v911_v30 = vmul.f32 %v6787_v32, %v6787_v32  ;;  %v6812_v35 = vmax.f32 %v408_v4, 0.0  ;;  %v1042_v27 = vadd.f32 %v1041_v19, %v906_v50  ;;  %v1012_v51 = vadd.f32 %v1011_v17, %v905_v29  ;;  %2154 = vmatpush1.bf16.msra.mxu0 %v6000_v37  ;;  %v6003_v4 = vld [vmem:[#allocation2 + $0x150] ss:$12 sps:$4 sm:$0xff]  }
 0x15d   :  { %v1072_v6 = vadd.f32 %v1071_v46, %v907_v41  ;;  %v6814_v18 = vmax.f32 %v569_v14, 0.0  ;;  %v818_v36 = vadd.f32 %v817_v31, %v6776_v38  ;;  %v788_v25 = vadd.f32 %v787_v33, %v6785_v1  ;;  %5333 = vmatpush3.bf16.msra.mxu1 %v5999_v11  ;;  %2155 = vmatprep.subr.bf16.mxu0 %v6005_v5 }
 0x15e   :  { %10076 = vst [vmem:[#allocation51_spill] sm:$0xff] %v6812_v35  ;;  %v848_v7 = vadd.f32 %v847_v34, %v6787_v32  ;;  %v6819_v40 = vmax.f32 %v410_v13, 0.0  ;;  %v983_v21 = vadd.f32 %v982_v56, %v908_v3  ;;  %v1043_v19 = vadd.f32 %v1042_v27, %v910_v39  ;;  %v6007_v27 = vld [vmem:[#allocation2 + $0xb0] ss:$12 sps:$4 sm:$0xff]  }
 0x15f   :  { %10077 = vst [vmem:[#allocation52_spill] sm:$0xff] %v6814_v18  ;;  %v1013_v17 = vadd.f32 %v1012_v51, %v909_v43  ;;  %v6821_v46 = vmax.f32 %v571_v12, 0.0  ;;  %v1073_v41 = vadd.f32 %v1072_v6, %v911_v30  ;;  %v759_v14 = vadd.f32 %v758_v26, %v6812_v35  ;;  %v6006_v51 = vld [vmem:[#allocation2 + $0x170] ss:$12 sps:$4 sm:$0xff]  }
 0x160   :  { %10078 = vst [vmem:[#allocation53_spill] sm:$0xff] %v6819_v40  ;;  %v6823_v50 = vpop.f32.mrb[24].mxu0  ;;  %v6825_v29 = vpop.f32.mrb[24].mxu1  ;;  %v414_v31 = vadd.f32 %v413_v44, %v6572_v59  ;;  %v575_v33 = vadd.f32 %v574_v15, %v6575_v60  ;;  %v912_v37 = vmul.f32 %v6812_v35, %v6812_v35  ;;  %v914_v55 = vmul.f32 %v6814_v18, %v6814_v18  ;;  %v6010_v15 = vld [vmem:[#allocation2 + $0x16c] ss:$12 sps:$4 sm:$0xff]  }
 0x161   :  { %10079 = vst [vmem:[#allocation54_spill] sm:$0xff] %v6821_v46  ;;  %v6830_v34 = vpop.f32.mrb[25].mxu0  ;;  %v6832_v13 = vpop.f32.mrb[25].mxu1  ;;  %v416_v26 = vadd.f32 %v6779_v0, %v6578_v61  ;;  %v577_v30 = vadd.f32 %v6781_v9, %v6581_v62  ;;  %v913_v3 = vmul.f32 %v6819_v40, %v6819_v40  ;;  %v418_v12 = vadd.f32 %v6790_v45, %v6572_v59  ;;  %v6008_v9 = vld [vmem:[#allocation2 + $0x168] ss:$12 sps:$4 sm:$0xff]  }
 0x162   :  { %v6842_v6 = vpop.f32.mrb[26].mxu0  ;;  %v6844_v44 = vpop.f32.mrb[26].mxu1  ;;  %v6848_v39 = vmax.f32 %v414_v31, 0.0  ;;  %v6850_v43 = vmax.f32 %v575_v33, 0.0  ;;  %5334 = vmatprep.subr.bf16.mxu1 %v6006_v51  ;;  %2156 = vmatpush1.bf16.msra.mxu0 %v6003_v4  ;;  %v915_v5 = vmul.f32 %v6821_v46, %v6821_v46  ;;  %v579_v31 = vadd.f32 %v6792_v63, %v6575_v60 }
 0x163   :  { %v6854_v0 = vpop.f32.mrb[27].mxu0  ;;  %v6856_v52 = vpop.f32.mrb[27].mxu1  ;;  %v6860_v56 = vmax.f32 %v416_v26, 0.0  ;;  %v6862_v11 = vmax.f32 %v577_v30, 0.0  ;;  %2157 = vmatprep.subr.bf16.mxu0 %v6010_v15  ;;  %v819_v45 = vadd.f32 %v818_v36, %v6814_v18  ;;  %v789_v33 = vadd.f32 %v788_v25, %v6819_v40  ;;  %5335 = vmatpush3.bf16.msra.mxu1 %v6007_v27  ;;  %v6013_v27 = vld [vmem:[#allocation2 + $0x184] ss:$12 sps:$4 sm:$0xff]  }
 0x164   :  { %10080 = vst [vmem:[#allocation55_spill] sm:$0xff] %v6848_v39  ;;  %10081 = vst [vmem:[#allocation56_spill] sm:$0xff] %v6850_v43  ;;  %v849_v38 = vadd.f32 %v848_v7, %v6821_v46  ;;  %v420_v4 = vadd.f32 %v6798_v24, %v6578_v61  ;;  %v916_v51 = vmul.f32 %v6848_v39, %v6848_v39  ;;  %v6882_v24 = vmax.f32 %v418_v12, 0.0 }
 0x165   :  { %10082 = vst [vmem:[#allocation57_spill] sm:$0xff] %v6860_v56  ;;  %10083 = vst [vmem:[#allocation58_spill] sm:$0xff] %v6862_v11  ;;  %v918_v26 = vmul.f32 %v6850_v43, %v6850_v43  ;;  %v917_v63 = vmul.f32 %v6860_v56, %v6860_v56  ;;  %v581_v36 = vadd.f32 %v6800_v23, %v6581_v62  ;;  %v6884_v32 = vmax.f32 %v579_v31, 0.0  ;;  %v6014_v23 = vld [vmem:[#allocation2 + $0x248] ss:$12 sps:$4 sm:$0xff]  }
 0x166   :  { %v984_v30 = vadd.f32 %v983_v21, %v912_v37  ;;  %v760_v25 = vadd.f32 %v759_v14, %v6848_v39  ;;  %v919_v7 = vmul.f32 %v6862_v11, %v6862_v11  ;;  %10084 = vst [vmem:[#allocation59_spill] sm:$0xff] %v6882_v24  ;;  %2158 = vmatpush1.bf16.msra.mxu0 %v6008_v9  ;;  %v6893_v12 = vmax.f32 %v420_v4, 0.0 }
 0x167   :  { %v1044_v15 = vadd.f32 %v1043_v19, %v914_v55  ;;  %v1014_v18 = vadd.f32 %v1013_v17, %v913_v3  ;;  %v1074_v46 = vadd.f32 %v1073_v41, %v915_v5  ;;  %10085 = vst [vmem:[#allocation60_spill] sm:$0xff] %v6884_v32  ;;  %v820_v21 = vadd.f32 %v819_v45, %v6850_v43 }
 0x168   :  { %v6886_v35 = vpop.f32.mrb[28].mxu0  ;;  %v6888_v47 = vpop.f32.mrb[28].mxu1  ;;  %v790_v14 = vadd.f32 %v789_v33, %v6860_v56  ;;  %v850_v37 = vadd.f32 %v849_v38, %v6862_v11  ;;  %10086 = vst [vmem:[#allocation61_spill] sm:$0xff] %v6893_v12  ;;  %2288 = vmatprep.subr.bf16.mxu0 %v6013_v27  ;;  %v985_v17 = vadd.f32 %v984_v30, %v916_v51  ;;  %v6899_v3 = vmax.f32 %v581_v36, 0.0 }
 0x169   :  { %v6895_v9 = vpop.f32.mrb[29].mxu0  ;;  %v6897_v19 = vpop.f32.mrb[29].mxu1  ;;  %v1045_v41 = vadd.f32 %v1044_v15, %v918_v26  ;;  %v1015_v55 = vadd.f32 %v1014_v18, %v917_v63  ;;  %5414 = vmatprep.subr.bf16.mxu1 %v6014_v23  ;;  %v1075_v45 = vadd.f32 %v1074_v46, %v919_v7  ;;  %v761_v38 = vadd.f32 %v760_v25, %v6882_v24 }
 0x16a   :  { %10087 = vst [vmem:[#allocation62_spill] sm:$0xff] %v6899_v3  ;;  %v6901_v5 = vpop.f32.mrb[30].mxu0  ;;  %v6903_v31 = vpop.f32.mrb[30].mxu1  ;;  %v424_v33 = vadd.f32 %v6823_v50, %v6572_v59  ;;  %v585_v4 = vadd.f32 %v6825_v29, %v6575_v60  ;;  %v920_v18 = vmul.f32 %v6882_v24, %v6882_v24  ;;  %v922_v26 = vmul.f32 %v6884_v32, %v6884_v32 }
 0x16b   :  { %v6910_v27 = vpop.f32.mrb[31].mxu0  ;;  %v6912_v51 = vpop.f32.mrb[31].mxu1  ;;  %v426_v46 = vadd.f32 %v6830_v34, %v6578_v61  ;;  %v587_v63 = vadd.f32 %v6832_v13, %v6581_v62  ;;  %v921_v50 = vmul.f32 %v6893_v12, %v6893_v12  ;;  %v428_v30 = vadd.f32 %v6842_v6, %v6572_v59 }
 0x16c   :  { %v6924_v29 = vmax.f32 %v424_v33, 0.0  ;;  %v6926_v36 = vmax.f32 %v585_v4, 0.0  ;;  %v923_v25 = vmul.f32 %v6899_v3, %v6899_v3  ;;  %v589_v34 = vadd.f32 %v6844_v44, %v6575_v60 }
 0x16d   :  { %v6932_v7 = vmax.f32 %v426_v46, 0.0  ;;  %v6934_v15 = vmax.f32 %v587_v63, 0.0  ;;  %v821_v13 = vadd.f32 %v820_v21, %v6884_v32  ;;  %v791_v23 = vadd.f32 %v790_v14, %v6893_v12 }
 0x16e   :  { %10088 = vst [vmem:[#allocation63_spill] sm:$0xff] %v6924_v29  ;;  %10089 = vst [vmem:[#allocation64_spill] sm:$0xff] %v6926_v36  ;;  %v851_v33 = vadd.f32 %v850_v37, %v6899_v3  ;;  %v430_v4 = vadd.f32 %v6854_v0, %v6578_v61  ;;  %v924_v6 = vmul.f32 %v6924_v29, %v6924_v29  ;;  %v6958_v43 = vmax.f32 %v428_v30, 0.0 }
 0x16f   :  { %10090 = vst [vmem:[#allocation65_spill] sm:$0xff] %v6932_v7  ;;  %10091 = vst [vmem:[#allocation66_spill] sm:$0xff] %v6934_v15  ;;  %v926_v46 = vmul.f32 %v6926_v36, %v6926_v36  ;;  %v925_v63 = vmul.f32 %v6932_v7, %v6932_v7  ;;  %v591_v44 = vadd.f32 %v6856_v52, %v6581_v62  ;;  %v6964_v52 = vmax.f32 %v589_v34, 0.0 }
 0x170   :  { %v6951_v21 = vpop.f32.mrb[32].mxu0  ;;  %v6953_v14 = vpop.f32.mrb[32].mxu1  ;;  %v986_v37 = vadd.f32 %v985_v17, %v920_v18  ;;  %v762_v32 = vadd.f32 %v761_v38, %v6924_v29  ;;  %v927_v0 = vmul.f32 %v6934_v15, %v6934_v15  ;;  %10092 = vst [vmem:[#allocation67_spill] sm:$0xff] %v6958_v43  ;;  %v1046_v24 = vadd.f32 %v1045_v41, %v922_v26 }
 0x171   :  { %v6960_v3 = vpop.f32.mrb[33].mxu0  ;;  %v6962_v11 = vpop.f32.mrb[33].mxu1  ;;  %v1016_v39 = vadd.f32 %v1015_v55, %v921_v50  ;;  %v1076_v12 = vadd.f32 %v1075_v45, %v923_v25  ;;  %10093 = vst [vmem:[#allocation68_spill] sm:$0xff] %v6964_v52  ;;  %v822_v17 = vadd.f32 %v821_v13, %v6926_v36  ;;  %v792_v38 = vadd.f32 %v791_v23, %v6932_v7 }
 0x172   :  { %v6966_v56 = vpop.f32.mrb[34].mxu0  ;;  %v6968_v40 = vpop.f32.mrb[34].mxu1  ;;  %v852_v18 = vadd.f32 %v851_v33, %v6934_v15  ;;  %v6973_v30 = vmax.f32 %v430_v4, 0.0  ;;  %v987_v41 = vadd.f32 %v986_v37, %v924_v6  ;;  %v1047_v55 = vadd.f32 %v1046_v24, %v926_v46 }
 0x173   :  { %v6975_v29 = vpop.f32.mrb[35].mxu0  ;;  %v6977_v1 = vpop.f32.mrb[35].mxu1  ;;  %v1017_v45 = vadd.f32 %v1016_v39, %v925_v63  ;;  %v6979_v26 = vmax.f32 %v591_v44, 0.0  ;;  %v1077_v50 = vadd.f32 %v1076_v12, %v927_v0  ;;  %v763_v25 = vadd.f32 %v762_v32, %v6958_v43 }
 0x174   :  { %10094 = vst [vmem:[#allocation69_spill] sm:$0xff] %v6973_v30  ;;  %v434_v34 = vadd.f32 %v6886_v35, %v6572_v59  ;;  %v595_v13 = vadd.f32 %v6888_v47, %v6575_v60  ;;  %v928_v23 = vmul.f32 %v6958_v43, %v6958_v43  ;;  %v930_v33 = vmul.f32 %v6964_v52, %v6964_v52 }
 0x175   :  { %10095 = vst [vmem:[#allocation70_spill] sm:$0xff] %v6979_v26  ;;  %v436_v39 = vadd.f32 %v6895_v9, %v6578_v61  ;;  %v597_v24 = vadd.f32 %v6897_v19, %v6581_v62  ;;  %v929_v32 = vmul.f32 %v6973_v30, %v6973_v30  ;;  %v438_v47 = vadd.f32 %v6901_v5, %v6572_v59 }
 0x176   :  { %v6996_v12 = vmax.f32 %v434_v34, 0.0  ;;  %v6998_v35 = vmax.f32 %v595_v13, 0.0  ;;  %v931_v4 = vmul.f32 %v6979_v26, %v6979_v26  ;;  %v599_v9 = vadd.f32 %v6903_v31, %v6575_v60 }
 0x177   :  { %v7004_v6 = vmax.f32 %v436_v39, 0.0  ;;  %v7006_v46 = vmax.f32 %v597_v24, 0.0  ;;  %v823_v44 = vadd.f32 %v822_v17, %v6964_v52  ;;  %v793_v37 = vadd.f32 %v792_v38, %v6973_v30 }
 0x178   :  { %10096 = vst [vmem:[#allocation71_spill] sm:$0xff] %v6996_v12  ;;  %10097 = vst [vmem:[#allocation72_spill] sm:$0xff] %v6998_v35  ;;  %v7010_v19 = vpop.f32.mrb[36].mxu0  ;;  %v7012_v63 = vpop.f32.mrb[36].mxu1  ;;  %v853_v5 = vadd.f32 %v852_v18, %v6979_v26  ;;  %v440_v0 = vadd.f32 %v6910_v27, %v6578_v61  ;;  %v932_v31 = vmul.f32 %v6996_v12, %v6996_v12  ;;  %v7038_v26 = vmax.f32 %v438_v47, 0.0 }
 0x179   :  { %10098 = vst [vmem:[#allocation73_spill] sm:$0xff] %v7004_v6  ;;  %10099 = vst [vmem:[#allocation74_spill] sm:$0xff] %v7006_v46  ;;  %v7019_v34 = vpop.f32.mrb[37].mxu0  ;;  %v7021_v13 = vpop.f32.mrb[37].mxu1  ;;  %v934_v39 = vmul.f32 %v6998_v35, %v6998_v35  ;;  %v933_v17 = vmul.f32 %v7004_v6, %v7004_v6  ;;  %v601_v38 = vadd.f32 %v6912_v51, %v6581_v62  ;;  %v7044_v51 = vmax.f32 %v599_v9, 0.0 }
 0x17a   :  { %v7031_v18 = vpop.f32.mrb[38].mxu0  ;;  %v7033_v24 = vpop.f32.mrb[38].mxu1  ;;  %v988_v27 = vadd.f32 %v987_v41, %v928_v23  ;;  %v764_v52 = vadd.f32 %v763_v25, %v6996_v12  ;;  %v935_v36 = vmul.f32 %v7006_v46, %v7006_v46  ;;  %10100 = vst [vmem:[#allocation75_spill] sm:$0xff] %v7038_v26  ;;  %v1048_v30 = vadd.f32 %v1047_v55, %v930_v33 }
 0x17b   :  { %v7040_v15 = vpop.f32.mrb[39].mxu0  ;;  %v7042_v43 = vpop.f32.mrb[39].mxu1  ;;  %v1018_v7 = vadd.f32 %v1017_v45, %v929_v32  ;;  %v1078_v2 = vadd.f32 %v1077_v50, %v931_v4  ;;  %10101 = vst [vmem:[#allocation76_spill] sm:$0xff] %v7044_v51  ;;  %v824_v8 = vadd.f32 %v823_v44, %v6998_v35  ;;  %v794_v41 = vadd.f32 %v793_v37, %v7004_v6 }
 0x17c   :  { %v854_v25 = vadd.f32 %v853_v5, %v7006_v46  ;;  %v7049_v23 = vmax.f32 %v440_v0, 0.0  ;;  %v989_v12 = vadd.f32 %v988_v27, %v932_v31  ;;  %v1049_v47 = vadd.f32 %v1048_v30, %v934_v39 }
 0x17d   :  { %v1019_v28 = vadd.f32 %v1018_v7, %v933_v17  ;;  %v7051_v48 = vmax.f32 %v601_v38, 0.0  ;;  %v1079_v22 = vadd.f32 %v1078_v2, %v935_v36  ;;  %v765_v55 = vadd.f32 %v764_v52, %v7038_v26 }
 0x17e   :  { %10102 = vst [vmem:[#allocation77_spill] sm:$0xff] %v7049_v23  ;;  %v444_v45 = vadd.f32 %v6951_v21, %v6572_v59  ;;  %v605_v50 = vadd.f32 %v6953_v14, %v6575_v60  ;;  %v936_v33 = vmul.f32 %v7038_v26, %v7038_v26  ;;  %v938_v32 = vmul.f32 %v7044_v51, %v7044_v51 }
 0x17f   :  { %10103 = vst [vmem:[#allocation78_spill] sm:$0xff] %v7051_v48  ;;  %v446_v7 = vadd.f32 %v6960_v3, %v6578_v61  ;;  %v607_v2 = vadd.f32 %v6962_v11, %v6581_v62  ;;  %v937_v21 = vmul.f32 %v7049_v23, %v7049_v23  ;;  %v448_v4 = vadd.f32 %v6966_v56, %v6572_v59 }
 0x180   :  { %v7066_v36 = vpop.f32.mrb[40].mxu0  ;;  %v7068_v52 = vpop.f32.mrb[40].mxu1  ;;  %v7072_v14 = vmax.f32 %v444_v45, 0.0  ;;  %v7074_v30 = vmax.f32 %v605_v50, 0.0  ;;  %v939_v11 = vmul.f32 %v7051_v48, %v7051_v48  ;;  %v609_v5 = vadd.f32 %v6968_v40, %v6575_v60 }
 0x181   :  { %v7078_v9 = vpop.f32.mrb[41].mxu0  ;;  %v7080_v3 = vpop.f32.mrb[41].mxu1  ;;  %v7084_v44 = vmax.f32 %v446_v7, 0.0  ;;  %v7086_v37 = vmax.f32 %v607_v2, 0.0  ;;  %v825_v56 = vadd.f32 %v824_v8, %v7044_v51  ;;  %v795_v39 = vadd.f32 %v794_v41, %v7049_v23 }
 0x182   :  { %10104 = vst [vmem:[#allocation79_spill] sm:$0xff] %v7072_v14  ;;  %10105 = vst [vmem:[#allocation80_spill] sm:$0xff] %v7074_v30  ;;  %v7090_v0 = vpop.f32.mrb[42].mxu0  ;;  %v7092_v31 = vpop.f32.mrb[42].mxu1  ;;  %v855_v17 = vadd.f32 %v854_v25, %v7051_v48  ;;  %v450_v38 = vadd.f32 %v6975_v29, %v6578_v61  ;;  %v940_v40 = vmul.f32 %v7072_v14, %v7072_v14  ;;  %v7114_v2 = vmax.f32 %v448_v4, 0.0 }
 0x183   :  { %10106 = vst [vmem:[#allocation81_spill] sm:$0xff] %v7084_v44  ;;  %10107 = vst [vmem:[#allocation82_spill] sm:$0xff] %v7086_v37  ;;  %v7099_v27 = vpop.f32.mrb[43].mxu0  ;;  %v7101_v45 = vpop.f32.mrb[43].mxu1  ;;  %v942_v50 = vmul.f32 %v7074_v30, %v7074_v30  ;;  %v941_v8 = vmul.f32 %v7084_v44, %v7084_v44  ;;  %v611_v41 = vadd.f32 %v6977_v1, %v6581_v62  ;;  %v7116_v46 = vmax.f32 %v609_v5, 0.0 }
 0x184   :  { %v990_v25 = vadd.f32 %v989_v12, %v936_v33  ;;  %v766_v7 = vadd.f32 %v765_v55, %v7072_v14  ;;  %v943_v29 = vmul.f32 %v7086_v37, %v7086_v37  ;;  %10108 = vst [vmem:[#allocation83_spill] sm:$0xff] %v7114_v2  ;;  %v1050_v51 = vadd.f32 %v1049_v47, %v938_v32 }
 0x185   :  { %v1020_v35 = vadd.f32 %v1019_v28, %v937_v21  ;;  %v1080_v48 = vadd.f32 %v1079_v22, %v939_v11  ;;  %10109 = vst [vmem:[#allocation84_spill] sm:$0xff] %v7116_v46  ;;  %v826_v26 = vadd.f32 %v825_v56, %v7074_v30  ;;  %v796_v23 = vadd.f32 %v795_v39, %v7084_v44 }
 0x186   :  { %v856_v6 = vadd.f32 %v855_v17, %v7086_v37  ;;  %v7121_v1 = vmax.f32 %v450_v38, 0.0  ;;  %v991_v12 = vadd.f32 %v990_v25, %v940_v40  ;;  %v1051_v55 = vadd.f32 %v1050_v51, %v942_v50 }
 0x187   :  { %v1021_v33 = vadd.f32 %v1020_v35, %v941_v8  ;;  %v7123_v14 = vmax.f32 %v611_v41, 0.0  ;;  %v1081_v22 = vadd.f32 %v1080_v48, %v943_v29  ;;  %v767_v28 = vadd.f32 %v766_v7, %v7114_v2 }
 0x188   :  { %10110 = vst [vmem:[#allocation85_spill] sm:$0xff] %v7121_v1  ;;  %v7125_v4 = vpop.f32.mrb[44].mxu0  ;;  %v7127_v47 = vpop.f32.mrb[44].mxu1  ;;  %v454_v32 = vadd.f32 %v7010_v19, %v6572_v59  ;;  %v615_v21 = vadd.f32 %v7012_v63, %v6575_v60  ;;  %v944_v35 = vmul.f32 %v7114_v2, %v7114_v2  ;;  %v946_v51 = vmul.f32 %v7116_v46, %v7116_v46 }
 0x189   :  { %10111 = vst [vmem:[#allocation86_spill] sm:$0xff] %v7123_v14  ;;  %v7134_v11 = vpop.f32.mrb[45].mxu0  ;;  %v7136_v5 = vpop.f32.mrb[45].mxu1  ;;  %v456_v48 = vadd.f32 %v7019_v34, %v6578_v61  ;;  %v617_v56 = vadd.f32 %v7021_v13, %v6581_v62  ;;  %v945_v63 = vmul.f32 %v7121_v1, %v7121_v1  ;;  %v458_v40 = vadd.f32 %v7031_v18, %v6572_v59 }
 0x18a   :  { %v7146_v19 = vpop.f32.mrb[46].mxu0  ;;  %v7148_v39 = vpop.f32.mrb[46].mxu1  ;;  %v7152_v17 = vmax.f32 %v454_v32, 0.0  ;;  %v7154_v38 = vmax.f32 %v615_v21, 0.0  ;;  %v947_v13 = vmul.f32 %v7123_v14, %v7123_v14  ;;  %v619_v25 = vadd.f32 %v7033_v24, %v6575_v60 }
 0x18b   :  { %v7158_v50 = vpop.f32.mrb[47].mxu0  ;;  %v7160_v34 = vpop.f32.mrb[47].mxu1  ;;  %v7164_v8 = vmax.f32 %v456_v48, 0.0  ;;  %v7166_v41 = vmax.f32 %v617_v56, 0.0  ;;  %v827_v7 = vadd.f32 %v826_v26, %v7116_v46  ;;  %v797_v29 = vadd.f32 %v796_v23, %v7121_v1 }
 0x18c   :  { %10112 = vst [vmem:[#allocation87_spill] sm:$0xff] %v7154_v38  ;;  %v857_v18 = vadd.f32 %v856_v6, %v7123_v14  ;;  %v460_v32 = vadd.f32 %v7040_v15, %v6578_v61  ;;  %v948_v21 = vmul.f32 %v7152_v17, %v7152_v17  ;;  %v950_v48 = vmul.f32 %v7154_v38, %v7154_v38 }
 0x18d   :  { %10113 = vst [vmem:[#allocation88_spill] sm:$0xff] %v7166_v41  ;;  %v949_v56 = vmul.f32 %v7164_v8, %v7164_v8  ;;  %v621_v24 = vadd.f32 %v7042_v43, %v6581_v62  ;;  %v992_v26 = vadd.f32 %v991_v12, %v944_v35  ;;  %v768_v23 = vadd.f32 %v767_v28, %v7152_v17 }
 0x18e   :  { %v951_v6 = vmul.f32 %v7166_v41, %v7166_v41  ;;  %v7186_v46 = vmax.f32 %v458_v40, 0.0  ;;  %v1052_v15 = vadd.f32 %v1051_v55, %v946_v51  ;;  %v1022_v30 = vadd.f32 %v1021_v33, %v945_v63 }
 0x18f   :  { %v1082_v14 = vadd.f32 %v1081_v22, %v947_v13  ;;  %v7188_v37 = vmax.f32 %v619_v25, 0.0  ;;  %v828_v44 = vadd.f32 %v827_v7, %v7154_v38  ;;  %v798_v43 = vadd.f32 %v797_v29, %v7164_v8 }
 0x190   :  { %10114 = vst [vmem:[#allocation89_spill] sm:$0xff] %v7186_v46  ;;  %v7190_v2 = vpop.f32.mrb[48].mxu0  ;;  %v7192_v1 = vpop.f32.mrb[48].mxu1  ;;  %v858_v12 = vadd.f32 %v857_v18, %v7166_v41  ;;  %v7197_v28 = vmax.f32 %v460_v32, 0.0  ;;  %v993_v55 = vadd.f32 %v992_v26, %v948_v21  ;;  %v1053_v33 = vadd.f32 %v1052_v15, %v950_v48 }
 0x191   :  { %10115 = vst [vmem:[#allocation90_spill] sm:$0xff] %v7188_v37  ;;  %v7199_v35 = vpop.f32.mrb[49].mxu0  ;;  %v7201_v40 = vpop.f32.mrb[49].mxu1  ;;  %v1023_v22 = vadd.f32 %v1022_v30, %v949_v56  ;;  %v7203_v51 = vmax.f32 %v621_v24, 0.0  ;;  %v1083_v25 = vadd.f32 %v1082_v14, %v951_v6  ;;  %v769_v7 = vadd.f32 %v768_v23, %v7186_v46 }
 0x192   :  { %v487_v63 = vpop.f32.mrb[50].mxu0  ;;  %v648_v13 = vpop.f32.mrb[50].mxu1  ;;  %v464_v29 = vadd.f32 %v7066_v36, %v6572_v59  ;;  %v625_v18 = vadd.f32 %v7068_v52, %v6575_v60  ;;  %v952_v21 = vmul.f32 %v7186_v46, %v7186_v46  ;;  %v954_v30 = vmul.f32 %v7188_v37, %v7188_v37 }
 0x193   :  { %10116 = vst [vmem:[#allocation91_spill] sm:$0xff] %v7203_v51  ;;  %v488_v32 = vpop.f32.mrb[51].mxu0  ;;  %v649_v38 = vpop.f32.mrb[51].mxu1  ;;  %v466_v48 = vadd.f32 %v7078_v9, %v6578_v61  ;;  %v627_v14 = vadd.f32 %v7080_v3, %v6581_v62  ;;  %v953_v36 = vmul.f32 %v7197_v28, %v7197_v28  ;;  %v955_v24 = vmul.f32 %v7203_v51, %v7203_v51 }
 0x194   :  { %v7220_v56 = vmax.f32 %v464_v29, 0.0  ;;  %v7222_v52 = vmax.f32 %v625_v18, 0.0  ;;  %v468_v38 = vadd.f32 %v7090_v0, %v6572_v59  ;;  %v470_v9 = vadd.f32 %v7099_v27, %v6578_v61 }
 0x195   :  { %v7228_v26 = vmax.f32 %v466_v48, 0.0  ;;  %v7230_v23 = vmax.f32 %v627_v14, 0.0  ;;  %v829_v3 = vadd.f32 %v828_v44, %v7188_v37  ;;  %v799_v6 = vadd.f32 %v798_v43, %v7197_v28 }
 0x196   :  { %10117 = vst [vmem:[#allocation92_spill] sm:$0xff] %v7220_v56  ;;  %10118 = vst [vmem:[#allocation93_spill] sm:$0xff] %v7222_v52  ;;  %v859_v15 = vadd.f32 %v858_v12, %v7203_v51  ;;  %v956_v63 = vmul.f32 %v7220_v56, %v7220_v56  ;;  %v958_v0 = vmul.f32 %v7222_v52, %v7222_v52  ;;  %v7248_v18 = vmax.f32 %v468_v38, 0.0 }
 0x197   :  { %10119 = vst [vmem:[#allocation94_spill] sm:$0xff] %v7230_v23  ;;  %v957_v13 = vmul.f32 %v7228_v26, %v7228_v26  ;;  %v959_v29 = vmul.f32 %v7230_v23, %v7230_v23  ;;  %v629_v27 = vadd.f32 %v7092_v31, %v6575_v60  ;;  %v994_v44 = vadd.f32 %v993_v55, %v952_v21 }
 0x198   :  { %v770_v43 = vadd.f32 %v769_v7, %v7220_v56  ;;  %v631_v12 = vadd.f32 %v7101_v45, %v6581_v62  ;;  %v1054_v32 = vadd.f32 %v1053_v33, %v954_v30  ;;  %v1024_v48 = vadd.f32 %v1023_v22, %v953_v36 }
 0x199   :  { %v1084_v14 = vadd.f32 %v1083_v25, %v955_v24  ;;  %v7252_v37 = vmax.f32 %v470_v9, 0.0  ;;  %v995_v51 = vadd.f32 %v994_v44, %v956_v63  ;;  %v830_v41 = vadd.f32 %v829_v3, %v7222_v52 }
 0x19a   :  { %v800_v46 = vadd.f32 %v799_v6, %v7228_v26  ;;  %v860_v31 = vadd.f32 %v859_v15, %v7230_v23  ;;  %v1055_v55 = vadd.f32 %v1054_v32, %v958_v0  ;;  %v1025_v21 = vadd.f32 %v1024_v48, %v957_v13  ;;  %v10161_v23 = vld [vmem:[#allocation81_spill] sm:$0xff] }
 0x19b   :  { %v1085_v7 = vadd.f32 %v1084_v14, %v959_v29  ;;  %v7257_v38 = vmax.f32 %v629_v27, 0.0  ;;  %v771_v56 = vadd.f32 %v770_v43, %v7248_v18  ;;  %v7260_v45 = vmax.f32 %v631_v12, 0.0 }
 0x19c   :  { %v474_v33 = vadd.f32 %v7125_v4, %v6572_v59  ;;  %v635_v22 = vadd.f32 %v7127_v47, %v6575_v60  ;;  %v960_v25 = vmul.f32 %v7248_v18, %v7248_v18  ;;  %v961_v30 = vmul.f32 %v7252_v37, %v7252_v37 }
 0x19d   :  { %10120 = vst [vmem:[#allocation95_spill] sm:$0xff] %v7257_v38  ;;  %10121 = vst [vmem:[#allocation96_spill] sm:$0xff] %v7260_v45  ;;  %v476_v36 = vadd.f32 %v7134_v11, %v6578_v61  ;;  %v637_v24 = vadd.f32 %v7136_v5, %v6581_v62  ;;  %v801_v9 = vadd.f32 %v800_v46, %v7252_v37 }
 0x19e   :  { %v7275_v3 = vmax.f32 %v474_v33, 0.0  ;;  %v7277_v4 = vmax.f32 %v635_v22, 0.0  ;;  %v478_v47 = vadd.f32 %v7146_v19, %v6572_v59  ;;  %v639_v63 = vadd.f32 %v7148_v39, %v6575_v60 }
 0x19f   :  { %v7281_v6 = vmax.f32 %v476_v36, 0.0  ;;  %v7283_v15 = vmax.f32 %v637_v24, 0.0  ;;  %v480_v11 = vadd.f32 %v7158_v50, %v6578_v61  ;;  %v831_v5 = vadd.f32 %v830_v41, %v7257_v38 }
 0x1a0   :  { %10122 = vst [vmem:[#allocation97_spill] sm:$0xff] %v7277_v4  ;;  %v962_v46 = vmul.f32 %v7257_v38, %v7257_v38  ;;  %v861_v0 = vadd.f32 %v860_v31, %v7260_v45  ;;  %v963_v19 = vmul.f32 %v7260_v45, %v7260_v45  ;;  %v1026_v13 = vadd.f32 %v1025_v21, %v961_v30  ;;  %v10158_v38 = vld [vmem:[#allocation77_spill] sm:$0xff]  ;;  %v10160_v45 = vld [vmem:[#allocation75_spill] sm:$0xff] }
 0x1a1   :  { %10123 = vst [vmem:[#allocation98_spill] sm:$0xff] %v7283_v15  ;;  %v802_v29 = vadd.f32 %v801_v9, %v7281_v6  ;;  %v965_v27 = vmul.f32 %v7281_v6, %v7281_v6  ;;  %v641_v39 = vadd.f32 %v7160_v34, %v6581_v62  ;;  %v996_v50 = vadd.f32 %v995_v51, %v960_v25 }
 0x1a2   :  { %v964_v41 = vmul.f32 %v7275_v3, %v7275_v3  ;;  %v966_v44 = vmul.f32 %v7277_v4, %v7277_v4  ;;  %v7304_v43 = vmax.f32 %v478_v47, 0.0  ;;  %v967_v32 = vmul.f32 %v7283_v15, %v7283_v15 }
 0x1a3   :  { %v1027_v12 = vadd.f32 %v1026_v13, %v965_v27  ;;  %v7308_v48 = vmax.f32 %v639_v63, 0.0  ;;  %v7310_v14 = vmax.f32 %v480_v11, 0.0  ;;  %v1056_v31 = vadd.f32 %v1055_v55, %v962_v46 }
 0x1a4   :  { %v1086_v21 = vadd.f32 %v1085_v7, %v963_v19  ;;  %v772_v34 = vadd.f32 %v771_v56, %v7275_v3  ;;  %v832_v51 = vadd.f32 %v831_v5, %v7277_v4  ;;  %v862_v33 = vadd.f32 %v861_v0, %v7283_v15 }
 0x1a5   :  { %10124 = vst [vmem:[#allocation99_spill] sm:$0xff] %v7308_v48  ;;  %v803_v22 = vadd.f32 %v802_v29, %v7310_v14  ;;  %v969_v25 = vmul.f32 %v7310_v14, %v7310_v14  ;;  %v7318_v30 = vmax.f32 %v641_v39, 0.0  ;;  %v997_v36 = vadd.f32 %v996_v50, %v964_v41 }
 0x1a6   :  { %v1057_v24 = vadd.f32 %v1056_v31, %v966_v44  ;;  %v968_v9 = vmul.f32 %v7304_v43, %v7304_v43  ;;  %v484_v55 = vadd.f32 %v7190_v2, %v6572_v59  ;;  %v1087_v56 = vadd.f32 %v1086_v21, %v967_v32 }
 0x1a7   :  { %10125 = vst [vmem:[#allocation100_spill] sm:$0xff] %v7318_v30  ;;  %v970_v7 = vmul.f32 %v7308_v48, %v7308_v48  ;;  %v1028_v47 = vadd.f32 %v1027_v12, %v969_v25  ;;  %v645_v63 = vadd.f32 %v7192_v1, %v6575_v60  ;;  %v773_v11 = vadd.f32 %v772_v34, %v7304_v43 }
 0x1a8   :  { %v833_v5 = vadd.f32 %v832_v51, %v7308_v48  ;;  %v7330_v46 = vmax.f32 %v484_v55, 0.0  ;;  %v486_v0 = vadd.f32 %v7199_v35, %v6578_v61  ;;  %v863_v19 = vadd.f32 %v862_v33, %v7318_v30 }
 0x1a9   :  { %v971_v59 = vmul.f32 %v7318_v30, %v7318_v30  ;;  %v7337_v2 = vmax.f32 %v645_v63, 0.0  ;;  %v647_v13 = vadd.f32 %v7201_v40, %v6581_v62  ;;  %v998_v60 = vadd.f32 %v997_v36, %v968_v9  ;;  %v10157_v30 = vld [vmem:[#allocation73_spill] sm:$0xff] }
 0x1aa   :  { %v774_v1 = vadd.f32 %v773_v11, %v7330_v46  ;;  %v972_v29 = vmul.f32 %v7330_v46, %v7330_v46  ;;  %v7344_v27 = vmax.f32 %v486_v0, 0.0  ;;  %v1058_v39 = vadd.f32 %v1057_v24, %v970_v7 }
 0x1ab   :  { %10126 = vst [vmem:[#allocation101_spill] sm:$0xff] %v7337_v2  ;;  %v834_v61 = vadd.f32 %v833_v5, %v7337_v2  ;;  %v974_v35 = vmul.f32 %v7337_v2, %v7337_v2  ;;  %v7349_v50 = vmax.f32 %v647_v13, 0.0  ;;  %v1088_v12 = vadd.f32 %v1087_v56, %v971_v59 }
 0x1ac   :  { %v775_v41 = vrot.slane %v774_v1, 4  ;;  %v999_v44 = vadd.f32 %v998_v60, %v972_v29  ;;  %v804_v62 = vadd.f32 %v803_v22, %v7344_v27  ;;  %v973_v40 = vmul.f32 %v7344_v27, %v7344_v27 }
 0x1ad   :  { %10127 = vst [vmem:[#allocation102_spill] sm:$0xff] %v7349_v50  ;;  %v835_v32 = vrot.slane %v834_v61, 4  ;;  %v1059_v31 = vadd.f32 %v1058_v39, %v974_v35  ;;  %v864_v21 = vadd.f32 %v863_v19, %v7349_v50  ;;  %v975_v55 = vmul.f32 %v7349_v50, %v7349_v50 }
 0x1ae   :  { %v776_v34 = vadd.f32 %v775_v41, %v774_v1  ;;  %v1000_v51 = vrot.slane %v999_v44, 4  ;;  %v805_v33 = vrot.slane %v804_v62, 4  ;;  %v1029_v25 = vadd.f32 %v1028_v47, %v973_v40 }
 0x1af   :  { %v836_v36 = vadd.f32 %v835_v32, %v834_v61  ;;  %v1060_v24 = vrot.slane %v1059_v31, 4  ;;  %v865_v9 = vrot.slane %v864_v21, 4  ;;  %v1089_v59 = vadd.f32 %v1088_v12, %v975_v55 }
 0x1b0   :  { %v777_v7 = vrot.slane %v776_v34, 2  ;;  %v1001_v22 = vadd.f32 %v1000_v51, %v999_v44  ;;  %v806_v63 = vadd.f32 %v805_v33, %v804_v62  ;;  %v1030_v11 = vrot.slane %v1029_v25, 4 }
 0x1b1   :  { %v837_v5 = vrot.slane %v836_v36, 2  ;;  %v1061_v56 = vadd.f32 %v1060_v24, %v1059_v31  ;;  %v866_v0 = vadd.f32 %v865_v9, %v864_v21  ;;  %v1090_v61 = vrot.slane %v1089_v59, 4 }
 0x1b2   :  { %v778_v13 = vadd.f32 %v777_v7, %v776_v34  ;;  %v1002_v19 = vrot.slane %v1001_v22, 2  ;;  %v807_v60 = vrot.slane %v806_v63, 2  ;;  %v1031_v1 = vadd.f32 %v1030_v11, %v1029_v25 }
 0x1b3   :  { %v838_v29 = vadd.f32 %v837_v5, %v836_v36  ;;  %v1062_v47 = vrot.slane %v1061_v56, 2  ;;  %v867_v39 = vrot.slane %v866_v0, 2  ;;  %v1091_v51 = vadd.f32 %v1090_v61, %v1089_v59 }
 0x1b4   :  { %v779_v35 = vrot.slane %v778_v13, 1  ;;  %v1003_v41 = vadd.f32 %v1002_v19, %v1001_v22  ;;  %v808_v40 = vadd.f32 %v807_v60, %v806_v63  ;;  %v1032_v32 = vrot.slane %v1031_v1, 2 }
 0x1b5   :  { %v839_v48 = vrot.slane %v838_v29, 1  ;;  %v1063_v44 = vadd.f32 %v1062_v47, %v1061_v56  ;;  %v868_v62 = vadd.f32 %v867_v39, %v866_v0  ;;  %v1092_v25 = vrot.slane %v1091_v51, 2 }
 0x1b6   :  { %v780_v33 = vadd.f32 %v779_v35, %v778_v13  ;;  %v1004_v31 = vrot.slane %v1003_v41, 1  ;;  %v809_v21 = vrot.slane %v808_v40, 1  ;;  %v1033_v12 = vadd.f32 %v1032_v32, %v1031_v1 }
 0x1b7   :  { %v840_v34 = vadd.f32 %v839_v48, %v838_v29  ;;  %v1064_v24 = vrot.slane %v1063_v44, 1  ;;  %v869_v9 = vrot.slane %v868_v62, 1  ;;  %v1093_v19 = vadd.f32 %v1092_v25, %v1091_v51  ;;  %v1120_v25 = vld [vmem:[%s9867_s1 + $0x4] sm:$0xf] }
 0x1b8   :  { %v872_v36 = vmul.f32 0.005, %v780_v33  ;;  %v1005_v55 = vadd.f32 %v1004_v31, %v1003_v41  ;;  %v810_v7 = vadd.f32 %v809_v21, %v808_v40  ;;  %v1034_v11 = vrot.slane %v1033_v12, 1 }
 0x1b9   :  { %v874_v5 = vmul.f32 0.005, %v840_v34  ;;  %v1065_v22 = vadd.f32 %v1064_v24, %v1063_v44  ;;  %v870_v63 = vadd.f32 %v869_v9, %v868_v62  ;;  %v1094_v1 = vrot.slane %v1093_v19, 1 }
 0x1ba   :  { %v1096_v60 = vmul.f32 0.005, %v1005_v55  ;;  %v1100_v56 = vmul.f32 %v872_v36, %v872_v36  ;;  %v873_v0 = vmul.f32 0.005, %v810_v7  ;;  %v1035_v59 = vadd.f32 %v1034_v11, %v1033_v12 }
 0x1bb   :  { %v1098_v13 = vmul.f32 0.005, %v1065_v22  ;;  %v1102_v47 = vmul.f32 %v874_v5, %v874_v5  ;;  %v875_v39 = vmul.f32 0.005, %v870_v63  ;;  %v1095_v32 = vadd.f32 %v1094_v1, %v1093_v19 }
 0x1bc   :  { %v1104_v48 = vsub.f32 %v1096_v60, %v1100_v56  ;;  %v1097_v29 = vmul.f32 0.005, %v1035_v59  ;;  %v1101_v61 = vmul.f32 %v873_v0, %v873_v0  ;;  %v1125_v55 = vrot.slane %v1120_v25, %v6557_v53 }
 0x1bd   :  { %v1106_v35 = vsub.f32 %v1098_v13, %v1102_v47  ;;  %v1103_v41 = vmul.f32 %v875_v39, %v875_v39  ;;  %v1099_v44 = vmul.f32 0.005, %v1095_v32  ;;  %v6320_v7 = vmov 1966171168  }
 0x1be   :  { %v1108_v40 = vmax.f32 %v1104_v48, 0.0  ;;  %v1105_v33 = vsub.f32 %v1097_v29, %v1101_v61  ;;  %v1158_v11 = vunpack.c.l.s4 %v6320_v7  ;;  %v1133_v22 = vrot.slane %v1120_v25, %v6560_v54  ;;  %v10137_v7 = vld [vmem:[#allocation33_spill] sm:$0xff] }
 0x1bf   :  { %v1110_v31 = vmax.f32 %v1106_v35, 0.0  ;;  %v1107_v34 = vsub.f32 %v1099_v44, %v1103_v41  ;;  %v1129_v63 = vrot.slane %v1120_v25, %v6566_v57  ;;  %v1137_v1 = vrot.slane %v1120_v25, %v6569_v58 }
 0x1c0   :  { %v1112_v62 = vadd.f32 1e-05, %v1108_v40  ;;  %v1109_v51 = vmax.f32 %v1105_v33, 0.0  ;;  %v1159_v59 = vunpack.c.0.s8 %v1158_v11  ;;  %v10138_v11 = vld [vmem:[#allocation37_spill] sm:$0xff] }
 0x1c1   :  { %v1114_v21 = vadd.f32 1e-05, %v1110_v31  ;;  %v1111_v24 = vmax.f32 %v1107_v34, 0.0  ;;  %v10133_v34 = vld [vmem:[#allocation22_spill] sm:$0xff] }
 0x1c2   :  { %6171 = vrsqrt.f32 %v1112_v62  ;;  %v1113_v12 = vadd.f32 1e-05, %v1109_v51  ;;  %v7374_v40 = vsub.s32 %v1159_v59, %v6554_v49  ;;  %v10142_v59 = vld [vmem:[#allocation45_spill] sm:$0xff] }
 0x1c3   :  { %6173 = vrsqrt.f32 %v1114_v21  ;;  %v1115_v9 = vadd.f32 1e-05, %v1111_v24  ;;  %v10134_v24 = vld [vmem:[#allocation25_spill] sm:$0xff] }
 0x1c4   :  { %6175 = vrsqrt.f32 %v1113_v12  ;;  %10130 = vst [vmem:[#allocation105_spill] sm:$0xff] %v7374_v40 }
 0x1c5   :  { %6177 = vrsqrt.f32 %v1115_v9  ;;  %v10135_v9 = vld [vmem:[#allocation29_spill] sm:$0xff] }
 0x1cc   :  { %v6172_v19 = vpop.eup %6171 }
 0x1cd   :  { %v6174_v60 = vpop.eup %6173  ;;  %v1142_v56 = vmul.f32 %v6172_v19, %v1125_v55 }
 0x1ce   :  { %v6176_v13 = vpop.eup %6175  ;;  %v7363_v47 = vmul.f32 %v6174_v60, %v1133_v22  ;;  %v10141_v60 = vld [vmem:[#allocation41_spill] sm:$0xff] }
 0x1cf   :  { %v1147_v48 = vmul.f32 %v1142_v56, %v872_v36  ;;  %v7367_v29 = vrot.slane %v1142_v56, %v6557_v53  ;;  %v1143_v61 = vmul.f32 %v6176_v13, %v1129_v63  ;;  %v6178_v35 = vpop.eup %6177 }
 0x1d0   :  { %10128 = vst [vmem:[#allocation103_spill] sm:$0xff] %v7363_v47  ;;  %v1149_v31 = vmul.f32 %v7363_v47, %v874_v5  ;;  %v7378_v44 = vmul.f32 %v6178_v35, %v1137_v1  ;;  %v10144_v35 = vld [vmem:[#allocation43_spill] sm:$0xff] }
 0x1d1   :  { %v7371_v32 = vmul.f32 %v7367_v29, %v7330_v46  ;;  %v1148_v41 = vmul.f32 %v1143_v61, %v873_v0  ;;  %v1188_v33 = vrot.slane %v1143_v61, %v6557_v53  ;;  %v1197_v51 = vmul.f32 %v7367_v29, %v6587_v10  ;;  %v10136_v10 = vld [vmem:[#allocation27_spill] sm:$0xff] }
 0x1d2   :  { %10131 = vst [vmem:[#allocation106_spill] sm:$0xff] %v7378_v44  ;;  %v1150_v46 = vmul.f32 %v7378_v44, %v875_v39  ;;  %v1201_v49 = vmul.f32 %v7367_v29, %v6599_v20  ;;  %v1205_v21 = vmul.f32 %v7367_v29, %v6627_v42  ;;  %v1209_v39 = vmul.f32 %v7367_v29, %v10136_v10  ;;  %v10139_v20 = vld [vmem:[#allocation31_spill] sm:$0xff] }
 0x1d3   :  { %10129 = vst [vmem:[#allocation104_spill] sm:$0xff] %v7371_v32  ;;  %v1155_v36 = vcombine.low %v1147_v48, %v1148_v41  ;;  %v7381_v62 = vmul.f32 %v1188_v33, %v7344_v27  ;;  %v1198_v0 = vmul.f32 %v1188_v33, %v6593_v16  ;;  %v1202_v12 = vmul.f32 %v1188_v33, %v10133_v34  ;;  %v10140_v42 = vld [vmem:[#allocation35_spill] sm:$0xff] }
 0x1d4   :  { %v1206_v27 = vmul.f32 %v1188_v33, %v10134_v24  ;;  %v1210_v25 = vmul.f32 %v1188_v33, %v10135_v9  ;;  %v1156_v55 = vcombine.low %v1149_v31, %v1150_v46  ;;  %v1214_v16 = vmul.f32 %v1188_v33, %v10137_v7  ;;  %v10143_v48 = vld [vmem:[#allocation39_spill] sm:$0xff]  ;;  %v10145_v31 = vld [vmem:[#allocation49_spill] sm:$0xff] }
 0x1d5   :  { %10132 = vst [vmem:[#allocation107_spill] sm:$0xff] %v7381_v62  ;;  %v1163_v5 = vrot.slane %v1155_v36, %v7374_v40  ;;  %v1218_v22 = vmul.f32 %v1188_v33, %v10138_v11  ;;  %v1213_v63 = vmul.f32 %v7367_v29, %v10139_v20  ;;  %v1217_v19 = vmul.f32 %v7367_v29, %v10140_v42  ;;  %v10146_v46 = vld [vmem:[#allocation53_spill] sm:$0xff]  ;;  %v10147_v24 = vld [vmem:[#allocation47_spill] sm:$0xff] }
 0x1d6   :  { %v7404_v56 = vmul.f32 %v1188_v33, %v10141_v60  ;;  %v7407_v13 = vmul.f32 %v1188_v33, %v10142_v59  ;;  %v1170_v1 = vrot.slane %v1156_v55, %v7374_v40  ;;  %v7412_v61 = vmul.f32 %v7367_v29, %v10143_v48  ;;  %v10148_v10 = vld [vmem:[#allocation51_spill] sm:$0xff]  ;;  %v10149_v7 = vld [vmem:[#allocation57_spill] sm:$0xff] }
 0x1d7   :  { %v7416_v41 = vmul.f32 %v7367_v29, %v10144_v35  ;;  %v7419_v36 = vmul.f32 %v1188_v33, %v10145_v31  ;;  %v7422_v34 = vmul.f32 %v1188_v33, %v10146_v46  ;;  %v7426_v9 = vmul.f32 %v7367_v29, %v10147_v24  ;;  %v10150_v42 = vld [vmem:[#allocation61_spill] sm:$0xff]  ;;  %v10151_v59 = vld [vmem:[#allocation55_spill] sm:$0xff] }
 0x1d8   :  { %v7430_v55 = vmul.f32 %v7367_v29, %v10148_v10  ;;  %v7433_v11 = vmul.f32 %v1188_v33, %v10149_v7  ;;  %v1171_v20 = vcombine.low %v1163_v5, %v1170_v1  ;;  %v7436_v60 = vmul.f32 %v1188_v33, %v10150_v42  ;;  %v10152_v35 = vld [vmem:[#allocation59_spill] sm:$0xff]  ;;  %v10153_v24 = vld [vmem:[#allocation65_spill] sm:$0xff] }
 0x1d9   :  { %v7440_v48 = vmul.f32 %v7367_v29, %v10151_v59  ;;  %v7444_v31 = vmul.f32 %v7367_v29, %v10152_v35  ;;  %v1146_v46 = vld [vmem:[%s9867_s1 + $0x8] sm:$0xf]  ;;  %v7450_v10 = vmul.f32 %v1188_v33, %v10153_v24  ;;  %v10154_v7 = vld [vmem:[#allocation69_spill] sm:$0xff]  ;;  %v7465_v15 = vmul.f32 %v1188_v33, %v10157_v30  ;;  %v6022_v62 = vld [vmem:[#allocation2 + $0x260] ss:$12 sps:$4 sm:$0xff]  }
 0x1da   :  { %v7453_v5 = vmul.f32 %v1188_v33, %v10154_v7  ;;  %v10155_v1 = vld [vmem:[#allocation63_spill] sm:$0xff]  ;;  %v1178_v35 = vrot.slane %v1171_v20, %v7374_v40  ;;  %v7468_v52 = vmul.f32 %v1188_v33, %v10158_v38  ;;  %v7479_v2 = vmul.f32 %v1188_v33, %v10161_v23 }
 0x1db   :  { %v7457_v42 = vmul.f32 %v7367_v29, %v10155_v1  ;;  %v10156_v59 = vld [vmem:[#allocation67_spill] sm:$0xff]  ;;  %v7476_v1 = vmul.f32 %v7367_v29, %v10160_v45  ;;  %v7495_v54 = vmul.f32 %v1188_v33, %v7164_v8  ;;  %v7498_v45 = vmul.f32 %v1188_v33, %v7197_v28 }
 0x1dc   :  { %v7461_v4 = vmul.f32 %v7367_v29, %v10156_v59  ;;  %v10159_v24 = vld [vmem:[#allocation71_spill] sm:$0xff]  ;;  %v10162_v59 = vld [vmem:[#allocation85_spill] sm:$0xff]  ;;  %v7488_v38 = vsub.f32 %v1146_v46, %v1178_v35  ;;  %v7502_v23 = vmul.f32 %v7367_v29, %v7152_v17  ;;  %v7509_v46 = vmul.f32 %v1188_v33, %v7228_v26  ;;  %v10167_v17 = vld [vmem:[#allocation92_spill] sm:$0xff] }
 0x1dd   :  { %v7472_v7 = vmul.f32 %v7367_v29, %v10159_v24  ;;  %v7482_v50 = vmul.f32 %v1188_v33, %v10162_v59  ;;  %v10163_v20 = vld [vmem:[#allocation79_spill] sm:$0xff]  ;;  %v10166_v59 = vld [vmem:[#allocation89_spill] sm:$0xff]  ;;  %v7524_v35 = vmul.f32 %v7367_v29, %v10167_v17  ;;  %v7531_v26 = vmul.f32 %v1188_v33, %v7281_v6 }
 0x1de   :  { %v7486_v30 = vmul.f32 %v7367_v29, %v10163_v20  ;;  %10164 = vst [vmem:[#allocation22_spill] sm:$0xff] %v7488_v38  ;;  %v10165_v40 = vld [vmem:[#allocation83_spill] sm:$0xff]  ;;  %v7506_v20 = vmul.f32 %v7367_v29, %v10166_v59  ;;  %v7516_v8 = vrot.slane %v7488_v38, %v6557_v53  ;;  %v7520_v28 = vrot.slane %v7488_v38, %v6566_v57 }
 0x1df   :  { %v7492_v24 = vmul.f32 %v7367_v29, %v10165_v40  ;;  %v7512_v40 = vmul.f32 %v1188_v33, %v7252_v37  ;;  %v7528_v59 = vmul.f32 %v7367_v29, %v7248_v18  ;;  %v7534_v37 = vmul.f32 %v1188_v33, %v7310_v14  ;;  %v6011_v53 = vld [vmem:[#allocation2 + $0x180] ss:$12 sps:$4 sm:$0xff]  }
 0x1e0   :  { %v7538_v58 = vmul.f32 %v7367_v29, %v7275_v3  ;;  %v7542_v57 = vmul.f32 %v7367_v29, %v7304_v43  ;;  %v1319_v17 = vadd.f32 %v7520_v28, %v1198_v0  ;;  %v1323_v38 = vadd.f32 %v7520_v28, %v1202_v12  ;;  %v6015_v29 = vld [vmem:[#allocation2 + $0x188] ss:$12 sps:$4 sm:$0xff]  }
 0x1e1   :  { %v1318_v18 = vadd.f32 %v7516_v8, %v1197_v51  ;;  %v1322_v6 = vadd.f32 %v7516_v8, %v1201_v49  ;;  %v1327_v47 = vadd.f32 %v7520_v28, %v1206_v27  ;;  %v1331_v14 = vadd.f32 %v7520_v28, %v1210_v25  ;;  %v6018_v25 = vld [vmem:[#allocation2 + $0x19c] ss:$12 sps:$4 sm:$0xff]  }
 0x1e2   :  { %v1326_v33 = vadd.f32 %v7516_v8, %v1205_v21  ;;  %v1330_v3 = vadd.f32 %v7516_v8, %v1209_v39  ;;  %v1419_v44 = vpack.c.bf16 %v1323_v38, %v1319_v17  ;;  %v1335_v0 = vadd.f32 %v7520_v28, %v1214_v16  ;;  %v6021_v17 = vld [vmem:[#allocation2 + $0x1b4] ss:$12 sps:$4 sm:$0xff]  }
 0x1e3   :  { %v1418_v43 = vpack.c.bf16 %v1322_v6, %v1318_v18  ;;  %v1339_v12 = vadd.f32 %v7520_v28, %v1218_v22  ;;  %v1423_v32 = vpack.c.bf16 %v1331_v14, %v1327_v47  ;;  %v1334_v49 = vadd.f32 %v7516_v8, %v1213_v63  ;;  %v6023_v63 = vld [vmem:[#allocation2 + $0x1a0] ss:$12 sps:$4 sm:$0xff]  }
 0x1e4   :  { %v1422_v51 = vpack.c.bf16 %v1330_v3, %v1326_v33  ;;  %v1338_v27 = vadd.f32 %v7516_v8, %v1217_v19  ;;  %2159 = vmatprep.mubr.bf16.mxu0 %v1419_v44  ;;  %2481 = vmatprep.mubr.bf16.mxu1 %v1419_v44  ;;  %v1343_v39 = vadd.f32 %v7520_v28, %v7404_v56  ;;  %v6016_v44 = vld [vmem:[#allocation2 + $0x198] ss:$12 sps:$4 sm:$0xff]   ;;  %v6019_v33 = vld [vmem:[#allocation2 + $0x1b0] ss:$12 sps:$4 sm:$0xff]  }
 0x1e5   :  { %v1427_v21 = vpack.c.bf16 %v1339_v12, %v1335_v0  ;;  %v1347_v38 = vadd.f32 %v7520_v28, %v7407_v13  ;;  %2160 = vmatmul.mubr.bf16.vlgmr.msra.gmra.mrb[52].mxu0 %v1418_v43  ;;  %2482 = vmatmul.mubr.bf16.vlgmr.msra.gmra.mrb[52].mxu1 %v1418_v43  ;;  %v1342_v47 = vadd.f32 %v7516_v8, %v7412_v61  ;;  %v6030_v61 = vld [vmem:[#allocation2 + $0x278] ss:$12 sps:$4 sm:$0xff]  }
 0x1e6   :  { %v7560_v16 = vpack.c.bf16 %v1338_v27, %v1334_v49  ;;  %v1346_v22 = vadd.f32 %v7516_v8, %v7416_v41  ;;  %2289 = vmatpush1.bf16.msra.mxu0 %v6011_v53  ;;  %5415 = vmatpush3.bf16.msra.mxu1 %v6015_v29  ;;  %v1351_v56 = vadd.f32 %v7520_v28, %v7419_v36  ;;  %v6026_v43 = vld [vmem:[#allocation2 + $0x1cc] ss:$12 sps:$4 sm:$0xff]   ;;  %v6038_v29 = vld [vmem:[#allocation2 + $0x290] ss:$12 sps:$4 sm:$0xff]  }
 0x1e7   :  { %v7566_v19 = vpack.c.bf16 %v1347_v38, %v1343_v39  ;;  %v1355_v13 = vadd.f32 %v7520_v28, %v7422_v34  ;;  %2169 = vmatprep.mubr.bf16.mxu0 %v1423_v32  ;;  %2489 = vmatprep.mubr.bf16.mxu1 %v1423_v32  ;;  %v1350_v53 = vadd.f32 %v7516_v8, %v7426_v9  ;;  %v6046_v39 = vld [vmem:[#allocation2 + $0x2a8] ss:$12 sps:$4 sm:$0xff]  }
 0x1e8   :  { %v7572_v18 = vpack.c.bf16 %v1346_v22, %v1342_v47  ;;  %v1354_v41 = vadd.f32 %v7516_v8, %v7430_v55  ;;  %2290 = vmatprep.subr.bf16.mxu0 %v6018_v25  ;;  %5416 = vmatprep.subr.bf16.mxu1 %v6022_v62  ;;  %v1359_v36 = vadd.f32 %v7520_v28, %v7433_v11 }
 0x1e9   :  { %v7578_v6 = vpack.c.bf16 %v1355_v13, %v1351_v56  ;;  %v1363_v32 = vadd.f32 %v7520_v28, %v7436_v60  ;;  %v1358_v14 = vadd.f32 %v7516_v8, %v7440_v48  ;;  %v1362_v9 = vadd.f32 %v7516_v8, %v7444_v31  ;;  %v6031_v48 = vld [vmem:[#allocation2 + $0x1b8] ss:$12 sps:$4 sm:$0xff]   ;;  %v6027_v56 = vld [vmem:[#allocation2 + $0x1e0] ss:$12 sps:$4 sm:$0xff]  }
 0x1ea   :  { %v7584_v34 = vpack.c.bf16 %v1354_v41, %v1350_v53  ;;  %v1367_v55 = vadd.f32 %v7520_v28, %v7450_v10  ;;  %2291 = vmatpush1.bf16.msra.mxu0 %v6016_v44  ;;  %5417 = vmatpush3.bf16.msra.mxu1 %v6023_v63  ;;  %v1371_v11 = vadd.f32 %v7520_v28, %v7453_v5  ;;  %v10168_v53 = vld [vmem:[#allocation107_spill] sm:$0xff] }
 0x1eb   :  { %v7592_v62 = vpack.c.bf16 %v1363_v32, %v1359_v36  ;;  %v1366_v60 = vadd.f32 %v7516_v8, %v7457_v42  ;;  %2292 = vmatprep.subr.bf16.mxu0 %v6021_v17  ;;  %5418 = vmatprep.subr.bf16.mxu1 %v6030_v61  ;;  %v7598_v3 = vpack.c.bf16 %v1362_v9, %v1358_v14  ;;  %v6034_v17 = vld [vmem:[#allocation2 + $0x1fc] ss:$12 sps:$4 sm:$0xff]   ;;  %v6054_v61 = vld [vmem:[#allocation2 + $0x2c0] ss:$12 sps:$4 sm:$0xff]  }
 0x1ec   :  { %v1370_v31 = vadd.f32 %v7516_v8, %v7461_v4  ;;  %v1375_v10 = vadd.f32 %v7520_v28, %v7465_v15  ;;  %v7604_v0 = vpack.c.bf16 %v1371_v11, %v1367_v55  ;;  %v1379_v5 = vadd.f32 %v7520_v28, %v7468_v52  ;;  %v6037_v14 = vld [vmem:[#allocation2 + $0x214] ss:$12 sps:$4 sm:$0xff]   ;;  %v6035_v9 = vld [vmem:[#allocation2 + $0x210] ss:$12 sps:$4 sm:$0xff]   ;;  %v6063_v55 = vld [vmem:[#allocation2 + $0x218] ss:$12 sps:$4 sm:$0xff]  }
 0x1ed   :  { %v1374_v42 = vadd.f32 %v7516_v8, %v7472_v7  ;;  %v1378_v12 = vadd.f32 %v7516_v8, %v7476_v1  ;;  %2170 = vmatmul.mubr.bf16.gmra.mrb[56].mxu0 %v1422_v51  ;;  %2490 = vmatmul.mubr.bf16.gmra.mrb[56].mxu1 %v1422_v51  ;;  %v1383_v4 = vadd.f32 %v7520_v28, %v7479_v2  ;;  %v6024_v1 = vld [vmem:[#allocation2 + $0x1c8] ss:$12 sps:$4 sm:$0xff]   ;;  %v6039_v51 = vld [vmem:[#allocation2 + $0x1d0] ss:$12 sps:$4 sm:$0xff]  }
 0x1ee   :  { %v7612_v49 = vpack.c.bf16 %v1370_v31, %v1366_v60  ;;  %v1387_v15 = vadd.f32 %v7520_v28, %v7482_v50  ;;  %2179 = vmatprep.mubr.bf16.mxu0 %v1427_v21  ;;  %2497 = vmatprep.mubr.bf16.mxu1 %v1427_v21  ;;  %v7618_v27 = vpack.c.bf16 %v1379_v5, %v1375_v10  ;;  %v6029_v21 = vld [vmem:[#allocation2 + $0x1e4] ss:$12 sps:$4 sm:$0xff]   ;;  %v6050_v31 = vld [vmem:[#allocation2 + $0x25c] ss:$12 sps:$4 sm:$0xff]  }
 0x1ef   :  { %v7620_v52 = vpack.c.bf16 %v1378_v12, %v1374_v42  ;;  %v1382_v7 = vadd.f32 %v7516_v8, %v7486_v30  ;;  %2293 = vmatpush1.bf16.msra.mxu0 %v6019_v33  ;;  %5419 = vmatpush3.bf16.msra.mxu1 %v6031_v48  ;;  %v1386_v2 = vadd.f32 %v7516_v8, %v7492_v24  ;;  %v6070_v11 = vld [vmem:[#allocation2 + $0x2f0] ss:$12 sps:$4 sm:$0xff]   ;;  %v6043_v48 = vld [vmem:[#allocation2 + $0x240] ss:$12 sps:$4 sm:$0xff]  }
 0x1f0   :  { %v7624_v25 = vpack.c.bf16 %v1387_v15, %v1383_v4  ;;  %v1391_v50 = vadd.f32 %v7520_v28, %v7495_v54  ;;  %2294 = vmatprep.subr.bf16.mxu0 %v6026_v43  ;;  %5420 = vmatprep.subr.bf16.mxu1 %v6038_v29  ;;  %v1395_v38 = vadd.f32 %v7520_v28, %v7498_v45  ;;  %v6071_v60 = vld [vmem:[#allocation2 + $0x230] ss:$12 sps:$4 sm:$0xff]   ;;  %v6058_v43 = vld [vmem:[#allocation2 + $0x28c] ss:$12 sps:$4 sm:$0xff]   ;;  %v10171_v5 = vld [vmem:[#allocation106_spill] sm:$0xff] }
 0x1f1   :  { %v1390_v30 = vadd.f32 %v7516_v8, %v7502_v23  ;;  %v1394_v47 = vadd.f32 %v7516_v8, %v7506_v20  ;;  %v7636_v22 = vpack.c.bf16 %v1386_v2, %v1382_v7  ;;  %v1399_v24 = vadd.f32 %v7520_v28, %v7509_v46  ;;  %v6047_v46 = vld [vmem:[#allocation2 + $0x1e8] ss:$12 sps:$4 sm:$0xff]   ;;  %v6045_v33 = vld [vmem:[#allocation2 + $0x244] ss:$12 sps:$4 sm:$0xff]  }
 0x1f2   :  { %v1403_v54 = vadd.f32 %v7520_v28, %v7512_v40  ;;  %v1398_v44 = vadd.f32 %v7516_v8, %v7524_v35  ;;  %v7644_v63 = vpack.c.bf16 %v1395_v38, %v1391_v50  ;;  %v1402_v23 = vadd.f32 %v7516_v8, %v7528_v59  ;;  %v6051_v10 = vld [vmem:[#allocation2 + $0x270] ss:$12 sps:$4 sm:$0xff]   ;;  %v10170_v29 = vld [vmem:[#allocation15_spill] sm:$0xff]  ;;  %v10173_v15 = vld [vmem:[#allocation18_spill] sm:$0xff] }
 0x1f3   :  { %v7646_v45 = vpack.c.bf16 %v1394_v47, %v1390_v30  ;;  %v1407_v20 = vadd.f32 %v7520_v28, %v7531_v26  ;;  %2295 = vmatpush1.bf16.msra.mxu0 %v6024_v1  ;;  %5421 = vmatpush3.bf16.msra.mxu1 %v6039_v51  ;;  %v1411_v40 = vadd.f32 %v7520_v28, %v7534_v37  ;;  %v10172_v12 = vld [vmem:[#allocation103_spill] sm:$0xff]  ;;  %v10174_v7 = vld [vmem:[#allocation22_spill] sm:$0xff]  ;;  %v10175_v51 = vld [vmem:[#allocation16_spill] sm:$0xff] }
 0x1f4   :  { %v7652_v13 = vpack.c.bf16 %v1403_v54, %v1399_v24  ;;  %v1406_v35 = vadd.f32 %v7516_v8, %v7538_v58  ;;  %2296 = vmatprep.subr.bf16.mxu0 %v6029_v21  ;;  %5422 = vmatprep.subr.bf16.mxu1 %v6046_v39  ;;  %v7658_v59 = vpack.c.bf16 %v1402_v23, %v1398_v44  ;;  %v10169_v58 = vld [vmem:[#allocation104_spill] sm:$0xff]  ;;  %v6066_v2 = vld [vmem:[#allocation2 + $0x2bc] ss:$12 sps:$4 sm:$0xff]   ;;  %v10176_v50 = vld [vmem:[#allocation102_spill] sm:$0xff] }
 0x1f5   :  { %v1410_v26 = vadd.f32 %v7516_v8, %v7542_v57  ;;  %v7664_v41 = vadd.f32 %v7520_v28, %v10168_v53  ;;  %2180 = vmatmul.mubr.bf16.gmra.mrb[60].mxu0 %v7560_v16  ;;  %2498 = vmatmul.mubr.bf16.gmra.mrb[60].mxu1 %v7560_v16  ;;  %v7668_v37 = vpack.c.bf16 %v1411_v40, %v1407_v20  ;;  %v6032_v57 = vld [vmem:[#allocation2 + $0x1f8] ss:$12 sps:$4 sm:$0xff]   ;;  %v6055_v28 = vld [vmem:[#allocation2 + $0x200] ss:$12 sps:$4 sm:$0xff]   ;;  %v6067_v44 = vld [vmem:[#allocation2 + $0x2d0] ss:$12 sps:$4 sm:$0xff]  }
 0x1f6   :  { %v7672_v36 = vadd.f32 %v7516_v8, %v10169_v58  ;;  %2189 = vmatprep.mubr.bf16.mxu0 %v7566_v19  ;;  %2505 = vmatprep.mubr.bf16.mxu1 %v7566_v19  ;;  %v6062_v16 = vld [vmem:[#allocation2 + $0x2d8] ss:$12 sps:$4 sm:$0xff]   ;;  %v6040_v19 = vld [vmem:[#allocation2 + $0x228] ss:$12 sps:$4 sm:$0xff]   ;;  %v7692_v42 = vrot.slane %v10171_v5, %v10170_v29  ;;  %v7696_v4 = vrot.slane %v10172_v12, %v10170_v29 }
 0x1f7   :  { %v7676_v32 = vpack.c.bf16 %v1410_v26, %v1406_v35  ;;  %2297 = vmatpush1.bf16.msra.mxu0 %v6027_v56  ;;  %5423 = vmatpush3.bf16.msra.mxu1 %v6047_v46  ;;  %v6042_v8 = vld [vmem:[#allocation2 + $0x22c] ss:$12 sps:$4 sm:$0xff]   ;;  %v7700_v1 = vrot.slane %v10174_v7, %v10173_v15  ;;  %v6069_v24 = vld [vmem:[#allocation2 + $0x2d4] ss:$12 sps:$4 sm:$0xff]  }
 0x1f8   :  { %2298 = vmatprep.subr.bf16.mxu0 %v6034_v17  ;;  %5424 = vmatprep.subr.bf16.mxu1 %v6054_v61  ;;  %v1296_v21 = vmul.f32 %v7692_v42, %v10176_v50  ;;  %v10177_v39 = vld [vmem:[#allocation101_spill] sm:$0xff]  ;;  %v1466_v56 = vpack.c.bf16 %v7672_v36, %v7672_v36  ;;  %v10182_v61 = vld [vmem:[#allocation26_spill] sm:$0xff] }
 0x1f9   :  { %v1295_v38 = vmul.f32 %v7696_v4, %v10177_v39  ;;  %v6064_v30 = vld [vmem:[#allocation2 + $0x2b8] ss:$12 sps:$4 sm:$0xff]  }
 0x1fa   :  { %v7715_v47 = vadd.f32 %v7700_v1, %v1296_v21  ;;  %v10181_v35 = vld [vmem:[#allocation21_spill] sm:$0xff]  ;;  %v10183_v26 = vld [vmem:[#allocation30_spill] sm:$0xff] }
 0x1fb   :  { %2299 = vmatpush1.bf16.msra.mxu0 %v6032_v57  ;;  %5425 = vmatpush3.bf16.msra.mxu1 %v6055_v28  ;;  %v1203_v17 = vmul.f32 %v7696_v4, %v10181_v35  ;;  %v1212_v53 = vmul.f32 %v7692_v42, %v10183_v26  ;;  %v10184_v28 = vld [vmem:[#allocation24_spill] sm:$0xff]  ;;  %v10190_v5 = vld [vmem:[#allocation42_spill] sm:$0xff] }
 0x1fc   :  { %2300 = vmatprep.subr.bf16.mxu0 %v6037_v14  ;;  %5426 = vmatprep.subr.bf16.mxu1 %v6062_v16  ;;  %v1207_v14 = vmul.f32 %v7696_v4, %v10184_v28  ;;  %v10185_v16 = vld [vmem:[#allocation28_spill] sm:$0xff]  ;;  %v1224_v12 = vmul.f32 %v7692_v42, %v10190_v5  ;;  %v10191_v15 = vld [vmem:[#allocation46_spill] sm:$0xff] }
 0x1fd   :  { %2190 = vmatmul.mubr.bf16.gmra.mrb[64].mxu0 %v7572_v18  ;;  %2506 = vmatmul.mubr.bf16.gmra.mrb[64].mxu1 %v7572_v18  ;;  %v6048_v18 = vld [vmem:[#allocation2 + $0x258] ss:$12 sps:$4 sm:$0xff]   ;;  %v1333_v36 = vadd.f32 %v7700_v1, %v1212_v53  ;;  %v10197_v35 = vld [vmem:[#allocation52_spill] sm:$0xff] }
 0x1fe   :  { %2199 = vmatprep.mubr.bf16.mxu0 %v7578_v6  ;;  %2513 = vmatprep.mubr.bf16.mxu1 %v7578_v6  ;;  %v6053_v6 = vld [vmem:[#allocation2 + $0x274] ss:$12 sps:$4 sm:$0xff]   ;;  %v1345_v50 = vadd.f32 %v7700_v1, %v1224_v12 }
 0x1ff   :  { %2301 = vmatpush1.bf16.msra.mxu0 %v6035_v9  ;;  %5427 = vmatpush3.bf16.msra.mxu1 %v6063_v55  ;;  %v1211_v9 = vmul.f32 %v7696_v4, %v10185_v16  ;;  %v10186_v55 = vld [vmem:[#allocation34_spill] sm:$0xff]  ;;  %v10200_v28 = vld [vmem:[#allocation56_spill] sm:$0xff] }
 0x200   :  { %2302 = vmatprep.subr.bf16.mxu0 %v6042_v8  ;;  %5428 = vmatprep.subr.bf16.mxu1 %v6070_v11  ;;  %v1216_v8 = vmul.f32 %v7692_v42, %v10186_v55  ;;  %v10187_v11 = vld [vmem:[#allocation38_spill] sm:$0xff]  ;;  %v10201_v16 = vld [vmem:[#allocation60_spill] sm:$0xff] }
 0x201   :  { %v10199_v26 = vld [vmem:[#allocation62_spill] sm:$0xff] }
 0x202   :  { %v1244_v53 = vmul.f32 %v7692_v42, %v10199_v26  ;;  %v10202_v55 = vld [vmem:[#allocation66_spill] sm:$0xff]  ;;  %v10215_v26 = vld [vmem:[#allocation91_spill] sm:$0xff] }
 0x203   :  { %2303 = vmatpush1.bf16.msra.mxu0 %v6040_v19  ;;  %5429 = vmatpush3.bf16.msra.mxu1 %v6071_v60  ;;  %v1220_v19 = vmul.f32 %v7692_v42, %v10187_v11  ;;  %v10203_v11 = vld [vmem:[#allocation70_spill] sm:$0xff] }
 0x204   :  { %2304 = vmatprep.subr.bf16.mxu0 %v6045_v33  ;;  %v10206_v5 = vld [vmem:[#allocation74_spill] sm:$0xff] }
 0x205   :  { %2200 = vmatmul.mubr.bf16.gmra.mrb[68].mxu0 %v7584_v34  ;;  %2514 = vmatmul.mubr.bf16.gmra.mrb[68].mxu1 %v7584_v34  ;;  %v6056_v34 = vld [vmem:[#allocation2 + $0x288] ss:$12 sps:$4 sm:$0xff]   ;;  %v1256_v12 = vmul.f32 %v7692_v42, %v10206_v5  ;;  %v10222_v5 = vld [vmem:[#allocation98_spill] sm:$0xff] }
 0x206   :  { %2209 = vmatprep.mubr.bf16.mxu0 %v7592_v62  ;;  %2521 = vmatprep.mubr.bf16.mxu1 %v7592_v62  ;;  %v6061_v62 = vld [vmem:[#allocation2 + $0x2a4] ss:$12 sps:$4 sm:$0xff]  }
 0x207   :  { %2305 = vmatpush1.bf16.msra.mxu0 %v6043_v48  ;;  %v1337_v48 = vadd.f32 %v7700_v1, %v1216_v8  ;;  %v1248_v8 = vmul.f32 %v7692_v42, %v10202_v55  ;;  %v10218_v55 = vld [vmem:[#allocation94_spill] sm:$0xff] }
 0x208   :  { %2306 = vmatprep.subr.bf16.mxu0 %v6050_v31  ;;  %v1341_v31 = vadd.f32 %v7700_v1, %v1220_v19  ;;  %v1252_v19 = vmul.f32 %v7692_v42, %v10203_v11  ;;  %v10219_v11 = vld [vmem:[#allocation96_spill] sm:$0xff] }
 0x20b   :  { %2307 = vmatpush1.bf16.msra.mxu0 %v6048_v18 }
 0x20c   :  { %2308 = vmatprep.subr.bf16.mxu0 %v6053_v6  ;;  %v1429_v6 = vpack.c.bf16 %v1341_v31, %v1337_v48  ;;  %v1369_v48 = vadd.f32 %v7700_v1, %v1248_v8  ;;  %v1373_v31 = vadd.f32 %v7700_v1, %v1252_v19  ;;  %v1280_v8 = vmul.f32 %v7692_v42, %v10218_v55 }
 0x20d   :  { %2210 = vmatmul.mubr.bf16.gmra.mrb[72].mxu0 %v7598_v3  ;;  %2522 = vmatmul.mubr.bf16.gmra.mrb[72].mxu1 %v7598_v3  ;;  %v6059_v3 = vld [vmem:[#allocation2 + $0x2a0] ss:$12 sps:$4 sm:$0xff]   ;;  %v1284_v19 = vmul.f32 %v7692_v42, %v10219_v11 }
 0x20e   :  { %2219 = vmatprep.mubr.bf16.mxu0 %v7604_v0  ;;  %2529 = vmatprep.mubr.bf16.mxu1 %v7604_v0  ;;  %v7704_v0 = vrot.slane %v10174_v7, %v10175_v51  ;;  %v1228_v7 = vmul.f32 %v7692_v42, %v10191_v15  ;;  %v10207_v15 = vld [vmem:[#allocation78_spill] sm:$0xff] }
 0x20f   :  { %2309 = vmatpush1.bf16.msra.mxu0 %v6051_v10  ;;  %v10188_v10 = vld [vmem:[#allocation32_spill] sm:$0xff]  ;;  %v6077_v11 = vld [vmem:[#allocation5 + $0x4] ss:$8 sps:$4 sm:$0xff]  }
 0x210   :  { %2310 = vmatprep.subr.bf16.mxu0 %v6058_v43  ;;  %v7718_v54 = vadd.f32 %v7704_v0, %v1295_v38  ;;  %v1328_v60 = vadd.f32 %v7704_v0, %v1207_v14  ;;  %v1332_v33 = vadd.f32 %v7704_v0, %v1211_v9  ;;  %v1215_v43 = vmul.f32 %v7696_v4, %v10188_v10  ;;  %v10204_v10 = vld [vmem:[#allocation64_spill] sm:$0xff] }
 0x211   :  { %v1349_v21 = vadd.f32 %v7700_v1, %v1228_v7  ;;  %v1239_v14 = vmul.f32 %v7696_v4, %v10200_v28  ;;  %v1243_v9 = vmul.f32 %v7696_v4, %v10201_v16  ;;  %v1260_v7 = vmul.f32 %v7692_v42, %v10207_v15  ;;  %v10216_v28 = vld [vmem:[#allocation87_spill] sm:$0xff]  ;;  %v10217_v16 = vld [vmem:[#allocation90_spill] sm:$0xff]  ;;  %v10223_v15 = vld [vmem:[#allocation100_spill] sm:$0xff] }
 0x212   :  { %v1424_v18 = vpack.c.bf16 %v1332_v33, %v1328_v60 }
 0x213   :  { %2311 = vmatpush1.bf16.msra.mxu0 %v6056_v34  ;;  %v10189_v34 = vld [vmem:[#allocation36_spill] sm:$0xff]  ;;  %v1433_v38 = vpack.c.bf16 %v1349_v21, %v1345_v50  ;;  %v1360_v60 = vadd.f32 %v7704_v0, %v1239_v14  ;;  %v1364_v33 = vadd.f32 %v7704_v0, %v1243_v9  ;;  %v1377_v50 = vadd.f32 %v7700_v1, %v1256_v12 }
 0x214   :  { %2312 = vmatprep.subr.bf16.mxu0 %v6061_v62  ;;  %v1219_v62 = vmul.f32 %v7696_v4, %v10189_v34  ;;  %v10205_v34 = vld [vmem:[#allocation68_spill] sm:$0xff]  ;;  %v1381_v21 = vadd.f32 %v7700_v1, %v1260_v7  ;;  %v1271_v14 = vmul.f32 %v7696_v4, %v10216_v28  ;;  %v1275_v9 = vmul.f32 %v7696_v4, %v10217_v16 }
 0x215   :  { %2220 = vmatmul.mubr.bf16.gmra.mrb[76].mxu0 %v7612_v49  ;;  %2530 = vmatmul.mubr.bf16.gmra.mrb[76].mxu1 %v7612_v49  ;;  %v6074_v49 = vld [vmem:[#allocation2 + $0x2ec] ss:$12 sps:$4 sm:$0xff]   ;;  %v1288_v12 = vmul.f32 %v7692_v42, %v10222_v5  ;;  %v1292_v7 = vmul.f32 %v7692_v42, %v10223_v15 }
 0x216   :  { %2229 = vmatprep.mubr.bf16.mxu0 %v7618_v27  ;;  %2537 = vmatprep.mubr.bf16.mxu1 %v7618_v27  ;;  %v6072_v27 = vld [vmem:[#allocation2 + $0x2e8] ss:$12 sps:$4 sm:$0xff]  }
 0x217   :  { %2313 = vmatpush1.bf16.msra.mxu0 %v6059_v3  ;;  %v1336_v3 = vadd.f32 %v7704_v0, %v1215_v43  ;;  %v1247_v43 = vmul.f32 %v7696_v4, %v10204_v10  ;;  %v10220_v10 = vld [vmem:[#allocation93_spill] sm:$0xff] }
 0x218   :  { %2314 = vmatprep.subr.bf16.mxu0 %v6066_v2  ;;  %v1340_v2 = vadd.f32 %v7704_v0, %v1219_v62  ;;  %v1251_v62 = vmul.f32 %v7696_v4, %v10205_v34  ;;  %v10221_v34 = vld [vmem:[#allocation95_spill] sm:$0xff] }
 0x21a   :  { %v1428_v39 = vpack.c.bf16 %v1340_v2, %v1336_v3  ;;  %v1368_v3 = vadd.f32 %v7704_v0, %v1247_v43  ;;  %v1372_v2 = vadd.f32 %v7704_v0, %v1251_v62  ;;  %v1279_v43 = vmul.f32 %v7696_v4, %v10220_v10  ;;  %v6078_v10 = vld [vmem:[#allocation5 + $0x10] ss:$8 sps:$4 sm:$0xff]  }
 0x21b   :  { %2315 = vmatpush1.bf16.msra.mxu0 %v6064_v30  ;;  %v10192_v30 = vld [vmem:[#allocation40_spill] sm:$0xff]  ;;  %v1283_v62 = vmul.f32 %v7696_v4, %v10221_v34 }
 0x21c   :  { %2316 = vmatprep.subr.bf16.mxu0 %v6069_v24  ;;  %v1223_v24 = vmul.f32 %v7696_v4, %v10192_v30  ;;  %v10208_v30 = vld [vmem:[#allocation72_spill] sm:$0xff] }
 0x21d   :  { %2230 = vmatmul.mubr.bf16.gmra.mrb[80].mxu0 %v7620_v52  ;;  %2538 = vmatmul.mubr.bf16.gmra.mrb[80].mxu1 %v7620_v52  ;;  %v1467_v52 = vpack.c.bf16 %v7664_v41, %v7664_v41 }
 0x21e   :  { %2239 = vmatprep.mubr.bf16.mxu0 %v7624_v25  ;;  %2545 = vmatprep.mubr.bf16.mxu1 %v7624_v25  ;;  %v10178_v25 = vld [vmem:[#allocation20_spill] sm:$0xff] }
 0x21f   :  { %2317 = vmatpush1.bf16.msra.mxu0 %v6067_v44  ;;  %v10193_v44 = vld [vmem:[#allocation44_spill] sm:$0xff] }
 0x220   :  { %2318 = vmatprep.subr.bf16.mxu0 %v6074_v49  ;;  %v1227_v49 = vmul.f32 %v7696_v4, %v10193_v44  ;;  %v10209_v44 = vld [vmem:[#allocation76_spill] sm:$0xff] }
 0x223   :  { %2319 = vmatpush1.bf16.msra.mxu0 %v6072_v27  ;;  %v10194_v27 = vld [vmem:[#allocation50_spill] sm:$0xff] }
 0x224   :  { %3641 = vmatprep.subr.bf16.mxu0 %v6077_v11 }
 0x225   :  { %2240 = vmatmul.mubr.bf16.gmra.mrb[84].mxu0 %v7636_v22  ;;  %2546 = vmatmul.mubr.bf16.gmra.mrb[84].mxu1 %v7636_v22  ;;  %v1200_v22 = vmul.f32 %v7692_v42, %v10178_v25  ;;  %v10195_v25 = vld [vmem:[#allocation54_spill] sm:$0xff] }
 0x226   :  { %2249 = vmatprep.mubr.bf16.mxu0 %v7644_v63  ;;  %2553 = vmatprep.mubr.bf16.mxu1 %v7644_v63  ;;  %v10179_v63 = vld [vmem:[#allocation23_spill] sm:$0xff] }
 0x227   :  { %v1321_v23 = vadd.f32 %v7700_v1, %v1200_v22  ;;  %v1236_v22 = vmul.f32 %v7692_v42, %v10195_v25  ;;  %v10211_v25 = vld [vmem:[#allocation86_spill] sm:$0xff] }
 0x22d   :  { %2250 = vmatmul.mubr.bf16.gmra.mrb[88].mxu0 %v7646_v45  ;;  %2554 = vmatmul.mubr.bf16.gmra.mrb[88].mxu1 %v7646_v45  ;;  %v1204_v45 = vmul.f32 %v7692_v42, %v10179_v63  ;;  %v1344_v63 = vadd.f32 %v7704_v0, %v1223_v24  ;;  %v1255_v24 = vmul.f32 %v7696_v4, %v10208_v30  ;;  %v10224_v30 = vld [vmem:[#allocation97_spill] sm:$0xff] }
 0x22e   :  { %2259 = vmatprep.mubr.bf16.mxu0 %v7652_v13  ;;  %2561 = vmatprep.mubr.bf16.mxu1 %v7652_v13  ;;  %v10180_v13 = vld [vmem:[#allocation19_spill] sm:$0xff] }
 0x22f   :  { %v1325_v20 = vadd.f32 %v7700_v1, %v1204_v45  ;;  %v1199_v40 = vmul.f32 %v7696_v4, %v10180_v13  ;;  %v1348_v45 = vadd.f32 %v7704_v0, %v1227_v49  ;;  %v10196_v13 = vld [vmem:[#allocation48_spill] sm:$0xff]  ;;  %v1259_v49 = vmul.f32 %v7696_v4, %v10209_v44  ;;  %v10225_v44 = vld [vmem:[#allocation99_spill] sm:$0xff] }
 0x231   :  { %v1421_v46 = vpack.c.bf16 %v1325_v20, %v1321_v23  ;;  %v1320_v41 = vadd.f32 %v7704_v0, %v1199_v40  ;;  %v1357_v20 = vadd.f32 %v7700_v1, %v1236_v22  ;;  %v1231_v40 = vmul.f32 %v7696_v4, %v10196_v13  ;;  %v10212_v13 = vld [vmem:[#allocation80_spill] sm:$0xff] }
 0x232   :  { %v1268_v22 = vmul.f32 %v7692_v42, %v10211_v25  ;;  %v1468_v25 = vpack.c.bf16 %v7718_v54, %v7718_v54 }
 0x235   :  { %2260 = vmatmul.mubr.bf16.gmra.mrb[92].mxu0 %v7658_v59  ;;  %2562 = vmatmul.mubr.bf16.gmra.mrb[92].mxu1 %v7658_v59  ;;  %v1208_v59 = vmul.f32 %v7692_v42, %v10182_v61  ;;  %v10198_v61 = vld [vmem:[#allocation58_spill] sm:$0xff] }
 0x236   :  { %2269 = vmatprep.mubr.bf16.mxu0 %v7668_v37  ;;  %2569 = vmatprep.mubr.bf16.mxu1 %v7668_v37  ;;  %v1324_v37 = vadd.f32 %v7704_v0, %v1203_v17  ;;  %v1235_v17 = vmul.f32 %v7696_v4, %v10197_v35  ;;  %v10213_v35 = vld [vmem:[#allocation84_spill] sm:$0xff] }
 0x237   :  { %v1329_v58 = vadd.f32 %v7700_v1, %v1208_v59  ;;  %v1240_v59 = vmul.f32 %v7692_v42, %v10198_v61  ;;  %v10214_v61 = vld [vmem:[#allocation88_spill] sm:$0xff] }
 0x239   :  { %v1425_v57 = vpack.c.bf16 %v1333_v36, %v1329_v58  ;;  %v1361_v58 = vadd.f32 %v7700_v1, %v1240_v59  ;;  %v1365_v36 = vadd.f32 %v7700_v1, %v1244_v53  ;;  %v1272_v59 = vmul.f32 %v7692_v42, %v10214_v61 }
 0x23a   :  { %v1276_v53 = vmul.f32 %v7692_v42, %v10215_v26 }
 0x23d   :  { %2270 = vmatmul.mubr.bf16.gmra.mrb[96].mxu0 %v7676_v32  ;;  %2570 = vmatmul.mubr.bf16.gmra.mrb[96].mxu1 %v7676_v32  ;;  %v1420_v32 = vpack.c.bf16 %v1324_v37, %v1320_v41  ;;  %v1352_v41 = vadd.f32 %v7704_v0, %v1231_v40  ;;  %v1356_v37 = vadd.f32 %v7704_v0, %v1235_v17 }
 0x23e   :  { %2279 = vmatprep.mubr.bf16.mxu0 %v1467_v52  ;;  %2577 = vmatprep.mubr.bf16.mxu1 %v1467_v52  ;;  %v1232_v52 = vmul.f32 %v7692_v42, %v10194_v27  ;;  %v10210_v27 = vld [vmem:[#allocation82_spill] sm:$0xff]  ;;  %v1263_v40 = vmul.f32 %v7696_v4, %v10212_v13  ;;  %v1267_v17 = vmul.f32 %v7696_v4, %v10213_v35 }
 0x240   :  { %v1353_v23 = vadd.f32 %v7700_v1, %v1232_v52  ;;  %v1264_v52 = vmul.f32 %v7692_v42, %v10210_v27 }
 0x245   :  { %2280 = vmatmul.mubr.bf16.gmra.mrb[100].mxu0 %v1466_v56  ;;  %2578 = vmatmul.mubr.bf16.gmra.mrb[100].mxu1 %v1466_v56  ;;  %v1432_v56 = vpack.c.bf16 %v1348_v45, %v1344_v63  ;;  %v1376_v63 = vadd.f32 %v7704_v0, %v1255_v24  ;;  %v1380_v45 = vadd.f32 %v7704_v0, %v1259_v49 }
 0x246   :  { %2320 = vmatprep.mubr.bf16.mxu0 %v1421_v46  ;;  %2617 = vmatprep.mubr.bf16.mxu1 %v1421_v46  ;;  %v1437_v46 = vpack.c.bf16 %v1357_v20, %v1353_v23  ;;  %v1385_v23 = vadd.f32 %v7700_v1, %v1264_v52  ;;  %v1389_v20 = vadd.f32 %v7700_v1, %v1268_v22 }
 0x247   :  { %v1287_v24 = vmul.f32 %v7696_v4, %v10224_v30  ;;  %v1291_v49 = vmul.f32 %v7696_v4, %v10225_v44  ;;  %v6084_v30 = vld [vmem:[#allocation5 + $0x30] ss:$8 sps:$4 sm:$0xff]  }
 0x249   :  { %v1408_v42 = vadd.f32 %v7704_v0, %v1287_v24  ;;  %v1412_v27 = vadd.f32 %v7704_v0, %v1291_v49  ;;  %v6086_v24 = vld [vmem:[#allocation5 + $0x34] ss:$8 sps:$4 sm:$0xff]  }
 0x24b   :  { %v1464_v52 = vpack.c.bf16 %v1412_v27, %v1408_v42  ;;  %v6087_v42 = vld [vmem:[#allocation5 + $0x40] ss:$8 sps:$4 sm:$0xff]   ;;  %v6089_v27 = vld [vmem:[#allocation5 + $0x44] ss:$8 sps:$4 sm:$0xff]  }
 0x24d   :  { %2321 = vmatmul.mubr.bf16.vlgmr.msra.gmra.mrb[52].mxu0 %v1420_v32  ;;  %2618 = vmatmul.mubr.bf16.vlgmr.msra.gmra.mrb[104].mxu1 %v1420_v32  ;;  %v1436_v32 = vpack.c.bf16 %v1356_v37, %v1352_v41  ;;  %v1384_v41 = vadd.f32 %v7704_v0, %v1263_v40  ;;  %v1388_v37 = vadd.f32 %v7704_v0, %v1267_v17 }
 0x24e   :  { %2330 = vmatprep.mubr.bf16.mxu0 %v1425_v57  ;;  %2625 = vmatprep.mubr.bf16.mxu1 %v1425_v57  ;;  %v1441_v57 = vpack.c.bf16 %v1365_v36, %v1361_v58  ;;  %v1393_v58 = vadd.f32 %v7700_v1, %v1272_v59  ;;  %v1397_v36 = vadd.f32 %v7700_v1, %v1276_v53 }
 0x255   :  { %2331 = vmatmul.mubr.bf16.gmra.mrb[56].mxu0 %v1424_v18  ;;  %2626 = vmatmul.mubr.bf16.gmra.mrb[108].mxu1 %v1424_v18  ;;  %v1440_v18 = vpack.c.bf16 %v1364_v33, %v1360_v60  ;;  %v1392_v60 = vadd.f32 %v7704_v0, %v1271_v14  ;;  %v1396_v33 = vadd.f32 %v7704_v0, %v1275_v9 }
 0x256   :  { %2340 = vmatprep.mubr.bf16.mxu0 %v1429_v6  ;;  %2633 = vmatprep.mubr.bf16.mxu1 %v1429_v6  ;;  %v1445_v6 = vpack.c.bf16 %v1373_v31, %v1369_v48  ;;  %v1401_v48 = vadd.f32 %v7700_v1, %v1280_v8  ;;  %v1405_v31 = vadd.f32 %v7700_v1, %v1284_v19  ;;  %v6075_v8 = vld [vmem:[#allocation5] ss:$8 sps:$4 sm:$0xff]  }
 0x257   :  { %3642 = vmatpush1.bf16.msra.mxu0 %v6075_v8 }
 0x25d   :  { %2341 = vmatmul.mubr.bf16.gmra.mrb[60].mxu0 %v1428_v39  ;;  %2634 = vmatmul.mubr.bf16.gmra.mrb[112].mxu1 %v1428_v39  ;;  %v1444_v39 = vpack.c.bf16 %v1372_v2, %v1368_v3  ;;  %v1400_v3 = vadd.f32 %v7704_v0, %v1279_v43  ;;  %v1404_v2 = vadd.f32 %v7704_v0, %v1283_v62  ;;  %v6080_v43 = vld [vmem:[#allocation5 + $0x14] ss:$8 sps:$4 sm:$0xff]  }
 0x25e   :  { %2350 = vmatprep.mubr.bf16.mxu0 %v1433_v38  ;;  %2641 = vmatprep.mubr.bf16.mxu1 %v1433_v38  ;;  %v1449_v38 = vpack.c.bf16 %v1381_v21, %v1377_v50  ;;  %v1409_v50 = vadd.f32 %v7700_v1, %v1288_v12  ;;  %v1413_v21 = vadd.f32 %v7700_v1, %v1292_v7  ;;  %v6081_v7 = vld [vmem:[#allocation5 + $0x20] ss:$8 sps:$4 sm:$0xff]  }
 0x25f   :  { %v1469_v1 = vpack.c.bf16 %v7715_v47, %v7715_v47  ;;  %3643 = vmatprep.subr.bf16.mxu0 %v6080_v43 }
 0x260   :  { %3644 = vmatpush1.bf16.msra.mxu0 %v6078_v10 }
 0x265   :  { %2351 = vmatmul.mubr.bf16.gmra.mrb[64].mxu0 %v1432_v56  ;;  %2642 = vmatmul.mubr.bf16.gmra.mrb[116].mxu1 %v1432_v56  ;;  %v1448_v56 = vpack.c.bf16 %v1380_v45, %v1376_v63 }
 0x266   :  { %2360 = vmatprep.mubr.bf16.mxu0 %v1437_v46  ;;  %2649 = vmatprep.mubr.bf16.mxu1 %v1437_v46  ;;  %v1453_v46 = vpack.c.bf16 %v1389_v20, %v1385_v23 }
 0x26d   :  { %2361 = vmatmul.mubr.bf16.gmra.mrb[68].mxu0 %v1436_v32  ;;  %2650 = vmatmul.mubr.bf16.gmra.mrb[120].mxu1 %v1436_v32  ;;  %v1452_v32 = vpack.c.bf16 %v1388_v37, %v1384_v41 }
 0x26e   :  { %2370 = vmatprep.mubr.bf16.mxu0 %v1441_v57  ;;  %2657 = vmatprep.mubr.bf16.mxu1 %v1441_v57  ;;  %v1457_v57 = vpack.c.bf16 %v1397_v36, %v1393_v58 }
 0x275   :  { %2371 = vmatmul.mubr.bf16.gmra.mrb[72].mxu0 %v1440_v18  ;;  %2658 = vmatmul.mubr.bf16.gmra.mrb[124].mxu1 %v1440_v18  ;;  %v1456_v18 = vpack.c.bf16 %v1396_v33, %v1392_v60 }
 0x276   :  { %2380 = vmatprep.mubr.bf16.mxu0 %v1445_v6  ;;  %2665 = vmatprep.mubr.bf16.mxu1 %v1445_v6  ;;  %v1461_v6 = vpack.c.bf16 %v1405_v31, %v1401_v48 }
 0x27d   :  { %2381 = vmatmul.mubr.bf16.gmra.mrb[76].mxu0 %v1444_v39  ;;  %2666 = vmatmul.mubr.bf16.gmra.mrb[128].mxu1 %v1444_v39  ;;  %v1460_v39 = vpack.c.bf16 %v1404_v2, %v1400_v3  ;;  %v6083_v3 = vld [vmem:[#allocation5 + $0x24] ss:$8 sps:$4 sm:$0xff]  }
 0x27e   :  { %2390 = vmatprep.mubr.bf16.mxu0 %v1449_v38  ;;  %2673 = vmatprep.mubr.bf16.mxu1 %v1449_v38  ;;  %v1465_v38 = vpack.c.bf16 %v1413_v21, %v1409_v50 }
 0x27f   :  { %3645 = vmatprep.subr.bf16.mxu0 %v6083_v3 }
 0x280   :  { %3646 = vmatpush1.bf16.msra.mxu0 %v6081_v7  ;;  %v10226_v7 = vld [vmem:[#allocation17_spill] sm:$0xff] }
 0x281   :  { %3647 = vmatprep.subr.bf16.mxu0 %v6086_v24 }
 0x284   :  { %3648 = vmatpush1.bf16.msra.mxu0 %v6084_v30 }
 0x285   :  { %2391 = vmatmul.mubr.bf16.gmra.mrb[80].mxu0 %v1448_v56  ;;  %2674 = vmatmul.mubr.bf16.gmra.mrb[132].mxu1 %v1448_v56 }
 0x286   :  { %2400 = vmatprep.mubr.bf16.mxu0 %v1453_v46  ;;  %2681 = vmatprep.mubr.bf16.mxu1 %v1453_v46 }
 0x287   :  { %3649 = vmatprep.subr.bf16.mxu0 %v6089_v27 }
 0x288   :  { %3650 = vmatpush1.bf16.msra.mxu0 %v6087_v42 }
 0x28d   :  { %2401 = vmatmul.mubr.bf16.gmra.mrb[84].mxu0 %v1452_v32  ;;  %2682 = vmatmul.mubr.bf16.gmra.mrb[136].mxu1 %v1452_v32 }
 0x28e   :  { %2410 = vmatprep.mubr.bf16.mxu0 %v1457_v57  ;;  %2689 = vmatprep.mubr.bf16.mxu1 %v1457_v57 }
 0x295   :  { %2411 = vmatmul.mubr.bf16.gmra.mrb[88].mxu0 %v1456_v18  ;;  %2690 = vmatmul.mubr.bf16.gmra.mrb[140].mxu1 %v1456_v18 }
 0x296   :  { %2420 = vmatprep.mubr.bf16.mxu0 %v1461_v6  ;;  %2697 = vmatprep.mubr.bf16.mxu1 %v1461_v6 }
 0x29d   :  { %2421 = vmatmul.mubr.bf16.gmra.mrb[92].mxu0 %v1460_v39  ;;  %2698 = vmatmul.mubr.bf16.gmra.mrb[144].mxu1 %v1460_v39 }
 0x29e   :  { %2430 = vmatprep.mubr.bf16.mxu0 %v1465_v38  ;;  %2705 = vmatprep.mubr.bf16.mxu1 %v1465_v38 }
 0x2a5   :  { %2431 = vmatmul.mubr.bf16.gmra.mrb[96].mxu0 %v1464_v52  ;;  %2706 = vmatmul.mubr.bf16.gmra.mrb[148].mxu1 %v1464_v52 }
 0x2a6   :  { %2440 = vmatprep.mubr.bf16.mxu0 %v1469_v1  ;;  %2713 = vmatprep.mubr.bf16.mxu1 %v1469_v1 }
 0x2ad   :  { %2441 = vmatmul.mubr.bf16.gmra.mrb[100].mxu0 %v1468_v25  ;;  %2714 = vmatmul.mubr.bf16.gmra.mrb[152].mxu1 %v1468_v25 }
 0x2b8   :  { %v5336_v4 = vpop.f32.mrb[52].mxu1 }
 0x2b9   :  { %v5337_v22 = vpop.f32.mrb[53].mxu1 }
 0x2ba   :  { %v7890_v63 = vadd.f32 %v5337_v22, %v5336_v4  ;;  %v5339_v45 = vpop.f32.mrb[54].mxu1 }
 0x2bb   :  { %v5340_v23 = vpop.f32.mrb[55].mxu1 }
 0x2bc   :  { %v7892_v0 = vadd.f32 %v5340_v23, %v5339_v45 }
 0x2c0   :  { %v5342_v20 = vpop.f32.mrb[56].mxu1 }
 0x2c1   :  { %v5343_v56 = vpop.f32.mrb[57].mxu1 }
 0x2c2   :  { %v7894_v47 = vadd.f32 %v5343_v56, %v5342_v20  ;;  %v5345_v46 = vpop.f32.mrb[58].mxu1  ;;  %v6090_v20 = vld [vmem:[#allocation5 + $0x50] ss:$8 sps:$4 sm:$0xff]   ;;  %v6092_v56 = vld [vmem:[#allocation5 + $0x54] ss:$8 sps:$4 sm:$0xff]  }
 0x2c3   :  { %v5346_v13 = vpop.f32.mrb[59].mxu1  ;;  %3651 = vmatprep.subr.bf16.mxu0 %v6092_v56 }
 0x2c4   :  { %v7896_v40 = vadd.f32 %v5346_v13, %v5345_v46  ;;  %3652 = vmatpush1.bf16.msra.mxu0 %v6090_v20 }
 0x2c8   :  { %v5348_v35 = vpop.f32.mrb[60].mxu1 }
 0x2c9   :  { %v5349_v54 = vpop.f32.mrb[61].mxu1 }
 0x2ca   :  { %v7898_v17 = vadd.f32 %v5349_v54, %v5348_v35  ;;  %v5351_v61 = vpop.f32.mrb[62].mxu1 }
 0x2cb   :  { %v5352_v59 = vpop.f32.mrb[63].mxu1 }
 0x2cc   :  { %v7900_v26 = vadd.f32 %v5352_v59, %v5351_v61  ;;  %v6093_v61 = vld [vmem:[#allocation5 + $0x60] ss:$8 sps:$4 sm:$0xff]   ;;  %v6095_v59 = vld [vmem:[#allocation5 + $0x64] ss:$8 sps:$4 sm:$0xff]  }
 0x2cd   :  { %3653 = vmatprep.subr.bf16.mxu0 %v6095_v59 }
 0x2ce   :  { %3654 = vmatpush1.bf16.msra.mxu0 %v6093_v61 }
 0x2d0   :  { %v5354_v53 = vpop.f32.mrb[64].mxu1 }
 0x2d1   :  { %v5355_v41 = vpop.f32.mrb[65].mxu1 }
 0x2d2   :  { %v7902_v37 = vadd.f32 %v5355_v41, %v5354_v53  ;;  %v5357_v58 = vpop.f32.mrb[66].mxu1 }
 0x2d3   :  { %v5358_v36 = vpop.f32.mrb[67].mxu1 }
 0x2d4   :  { %v7904_v32 = vadd.f32 %v5358_v36, %v5357_v58 }
 0x2d8   :  { %v5360_v57 = vpop.f32.mrb[68].mxu1 }
 0x2d9   :  { %v5361_v28 = vpop.f32.mrb[69].mxu1 }
 0x2da   :  { %v7906_v14 = vadd.f32 %v5361_v28, %v5360_v57  ;;  %v5363_v16 = vpop.f32.mrb[70].mxu1 }
 0x2db   :  { %v5364_v9 = vpop.f32.mrb[71].mxu1 }
 0x2dc   :  { %v7908_v55 = vadd.f32 %v5364_v9, %v5363_v16 }
 0x2e0   :  { %v5366_v19 = vpop.f32.mrb[72].mxu1 }
 0x2e1   :  { %v5367_v60 = vpop.f32.mrb[73].mxu1 }
 0x2e2   :  { %v7910_v33 = vadd.f32 %v5367_v60, %v5366_v19  ;;  %v5369_v48 = vpop.f32.mrb[74].mxu1 }
 0x2e3   :  { %v5370_v31 = vpop.f32.mrb[75].mxu1 }
 0x2e4   :  { %v7912_v18 = vadd.f32 %v5370_v31, %v5369_v48 }
 0x2e8   :  { %v5372_v6 = vpop.f32.mrb[76].mxu1 }
 0x2e9   :  { %v5373_v34 = vpop.f32.mrb[77].mxu1 }
 0x2ea   :  { %v7914_v62 = vadd.f32 %v5373_v34, %v5372_v6  ;;  %v5375_v5 = vpop.f32.mrb[78].mxu1  ;;  %v1598_v6 = vld [vmem:[%s9867_s1 + $0xc] sm:$0x7] }
 0x2eb   :  { %v5376_v12 = vpop.f32.mrb[79].mxu1  ;;  %v7950_v3 = vrot.slane %v1598_v6, %v10226_v7 }
 0x2ec   :  { %v7916_v15 = vadd.f32 %v5376_v12, %v5375_v5  ;;  %v7944_v5 = vrot.slane %v1598_v6, %v10175_v51  ;;  %v7947_v12 = vrot.slane %v1598_v6, %v10170_v29 }
 0x2ee   :  { %v2492_v42 = vadd.f32 %v7894_v47, %v7944_v5  ;;  %v2495_v27 = vadd.f32 %v7896_v40, %v7944_v5  ;;  %v7977_v56 = vadd.f32 %v7904_v32, %v7944_v5 }
 0x2f0   :  { %v5378_v2 = vpop.f32.mrb[80].mxu1 }
 0x2f1   :  { %v5379_v50 = vpop.f32.mrb[81].mxu1 }
 0x2f2   :  { %v7918_v21 = vadd.f32 %v5379_v50, %v5378_v2  ;;  %v5381_v39 = vpop.f32.mrb[82].mxu1 }
 0x2f3   :  { %v5382_v38 = vpop.f32.mrb[83].mxu1 }
 0x2f4   :  { %v7920_v44 = vadd.f32 %v5382_v38, %v5381_v39  ;;  %v2484_v39 = vadd.f32 %v7890_v63, %v7944_v5  ;;  %v2487_v38 = vadd.f32 %v7892_v0, %v7944_v5  ;;  %v7964_v63 = vadd.f32 %v7898_v17, %v7944_v5 }
 0x2f5   :  { %v7968_v0 = vadd.f32 %v7900_v26, %v7944_v5  ;;  %v7982_v26 = vadd.f32 %v7906_v14, %v7944_v5  ;;  %v8004_v14 = vadd.f32 %v7912_v18, %v7944_v5 }
 0x2f8   :  { %v5384_v49 = vpop.f32.mrb[84].mxu1 }
 0x2f9   :  { %v5385_v52 = vpop.f32.mrb[85].mxu1 }
 0x2fa   :  { %v7922_v1 = vadd.f32 %v5385_v52, %v5384_v49  ;;  %v5387_v25 = vpop.f32.mrb[86].mxu1 }
 0x2fb   :  { %v5388_v4 = vpop.f32.mrb[87].mxu1 }
 0x2fc   :  { %v7924_v22 = vadd.f32 %v5388_v4, %v5387_v25  ;;  %v8024_v18 = vadd.f32 %v7922_v1, %v7944_v5 }
 0x300   :  { %v5390_v45 = vpop.f32.mrb[88].mxu1 }
 0x301   :  { %v5391_v23 = vpop.f32.mrb[89].mxu1 }
 0x302   :  { %v7926_v46 = vadd.f32 %v5391_v23, %v5390_v45  ;;  %v5393_v13 = vpop.f32.mrb[90].mxu1  ;;  %v7972_v23 = vadd.f32 %v7902_v37, %v7944_v5 }
 0x303   :  { %v5394_v35 = vpop.f32.mrb[91].mxu1 }
 0x304   :  { %v7928_v54 = vadd.f32 %v5394_v35, %v5393_v13 }
 0x308   :  { %v5396_v53 = vpop.f32.mrb[92].mxu1 }
 0x309   :  { %v5397_v41 = vpop.f32.mrb[93].mxu1 }
 0x30a   :  { %v7930_v58 = vadd.f32 %v5397_v41, %v5396_v53  ;;  %v5399_v36 = vpop.f32.mrb[94].mxu1  ;;  %v7992_v53 = vadd.f32 %v7908_v55, %v7944_v5  ;;  %v8012_v55 = vadd.f32 %v7916_v15, %v7944_v5 }
 0x30b   :  { %v5400_v57 = vpop.f32.mrb[95].mxu1 }
 0x30c   :  { %v7932_v28 = vadd.f32 %v5400_v57, %v5399_v36  ;;  %v8000_v57 = vadd.f32 %v7910_v33, %v7944_v5  ;;  %v8020_v33 = vadd.f32 %v7920_v44, %v7944_v5 }
 0x310   :  { %v5402_v16 = vpop.f32.mrb[96].mxu1 }
 0x311   :  { %v5403_v9 = vpop.f32.mrb[97].mxu1 }
 0x312   :  { %v7934_v8 = vadd.f32 %v5403_v9, %v5402_v16  ;;  %v5405_v11 = vpop.f32.mrb[98].mxu1  ;;  %v8008_v16 = vadd.f32 %v7914_v62, %v7944_v5  ;;  %v8016_v9 = vadd.f32 %v7918_v21, %v7944_v5 }
 0x313   :  { %v5406_v19 = vpop.f32.mrb[99].mxu1 }
 0x314   :  { %v7936_v60 = vadd.f32 %v5406_v19, %v5405_v11 }
 0x318   :  { %v5408_v48 = vpop.f32.mrb[100].mxu1 }
 0x319   :  { %v5409_v31 = vpop.f32.mrb[101].mxu1 }
 0x31a   :  { %v7941_v10 = vadd.f32 %v5409_v31, %v5408_v48  ;;  %v5411_v43 = vpop.f32.mrb[102].mxu1 }
 0x31b   :  { %v5412_v34 = vpop.f32.mrb[103].mxu1 }
 0x320   :  { %v2322_v2 = vpop.f32.mrb[52].mxu0  ;;  %v5430_v50 = vpop.f32.mrb[104].mxu1 }
 0x321   :  { %v5691_v30 = vadd.f32 %v2322_v2, %v7947_v12  ;;  %v2324_v24 = vpop.f32.mrb[53].mxu0  ;;  %v5431_v49 = vpop.f32.mrb[105].mxu1 }
 0x322   :  { %v5692_v52 = vadd.f32 %v2324_v24, %v7950_v3  ;;  %v5432_v25 = vadd.f32 %v5431_v49, %v5430_v50  ;;  %v2326_v4 = vpop.f32.mrb[54].mxu0  ;;  %v5433_v45 = vpop.f32.mrb[106].mxu1 }
 0x323   :  { %v5693_v47 = vadd.f32 %v2326_v4, %v7947_v12  ;;  %v2328_v40 = vpop.f32.mrb[55].mxu0  ;;  %v5434_v20 = vpop.f32.mrb[107].mxu1  ;;  %v7984_v61 = vmax.f32 %v5691_v30, 0.0 }
 0x324   :  { %v2620_v13 = vadd.f32 %v5432_v25, %v2484_v39  ;;  %v5694_v17 = vadd.f32 %v2328_v40, %v7950_v3  ;;  %v5435_v35 = vadd.f32 %v5434_v20, %v5433_v45  ;;  %v7986_v37 = vmax.f32 %v5692_v52, 0.0 }
 0x325   :  { %v7988_v59 = vmax.f32 %v5693_v47, 0.0  ;;  %v2889_v15 = vmul.f32 %v7984_v61, %v7984_v61 }
 0x326   :  { %v7994_v32 = vmax.f32 %v2620_v13, 0.0  ;;  %v7996_v41 = vmax.f32 %v5694_v17, 0.0  ;;  %v2623_v36 = vadd.f32 %v5435_v35, %v2487_v38  ;;  %v2890_v48 = vmul.f32 %v7986_v37, %v7986_v37 }
 0x327   :  { %v2796_v21 = vadd.f32 %v7988_v59, %v7984_v61  ;;  %v2892_v43 = vmul.f32 %v7988_v59, %v7988_v59 }
 0x328   :  { %10227 = vst [vmem:[#allocation25_spill] sm:$0xff] %v7994_v32  ;;  %v8026_v11 = vmax.f32 %v2623_v36, 0.0  ;;  %v2332_v62 = vpop.f32.mrb[56].mxu0  ;;  %v5436_v19 = vpop.f32.mrb[108].mxu1  ;;  %v2891_v1 = vmul.f32 %v7994_v32, %v7994_v32  ;;  %v2893_v34 = vmul.f32 %v7996_v41, %v7996_v41  ;;  %v2826_v4 = vadd.f32 %v7996_v41, %v7986_v37 }
 0x329   :  { %v5695_v44 = vadd.f32 %v2332_v62, %v7947_v12  ;;  %v2334_v31 = vpop.f32.mrb[57].mxu0  ;;  %v5437_v6 = vpop.f32.mrb[109].mxu1  ;;  %v2964_v36 = vadd.f32 %v2892_v43, %v2889_v15 }
 0x32a   :  { %10228 = vst [vmem:[#allocation29_spill] sm:$0xff] %v8026_v11  ;;  %v5696_v2 = vadd.f32 %v2334_v31, %v7950_v3  ;;  %v2336_v50 = vpop.f32.mrb[58].mxu0  ;;  %v5439_v39 = vpop.f32.mrb[110].mxu1  ;;  %v2894_v38 = vmul.f32 %v8026_v11, %v8026_v11  ;;  %v5438_v24 = vadd.f32 %v5437_v6, %v5436_v19  ;;  %v2994_v31 = vadd.f32 %v2893_v34, %v2890_v48 }
 0x32b   :  { %v8044_v30 = vmax.f32 %v5695_v44, 0.0  ;;  %v5697_v49 = vadd.f32 %v2336_v50, %v7947_v12  ;;  %v2338_v52 = vpop.f32.mrb[59].mxu0  ;;  %v5440_v25 = vpop.f32.mrb[111].mxu1  ;;  %v2856_v6 = vadd.f32 %v8026_v11, %v7994_v32 }
 0x32c   :  { %v8049_v45 = vmax.f32 %v5696_v2, 0.0  ;;  %v5698_v47 = vadd.f32 %v2338_v52, %v7950_v3  ;;  %v5441_v40 = vadd.f32 %v5440_v25, %v5439_v39  ;;  %v2628_v17 = vadd.f32 %v5438_v24, %v2492_v42 }
 0x32d   :  { %v2797_v20 = vadd.f32 %v2796_v21, %v8044_v30  ;;  %v2895_v13 = vmul.f32 %v8044_v30, %v8044_v30  ;;  %v8055_v35 = vmax.f32 %v5697_v49, 0.0  ;;  %v3024_v2 = vadd.f32 %v2894_v38, %v2891_v1 }
 0x32e   :  { %v2896_v62 = vmul.f32 %v8049_v45, %v8049_v45  ;;  %v8059_v19 = vmax.f32 %v5698_v47, 0.0  ;;  %v2631_v44 = vadd.f32 %v5441_v40, %v2495_v27  ;;  %v8063_v50 = vmax.f32 %v2628_v17, 0.0 }
 0x32f   :  { %v2965_v21 = vadd.f32 %v2964_v36, %v2895_v13  ;;  %v2827_v39 = vadd.f32 %v2826_v4, %v8049_v45  ;;  %v2798_v42 = vadd.f32 %v2797_v20, %v8055_v35  ;;  %v2898_v48 = vmul.f32 %v8055_v35, %v8055_v35 }
 0x330   :  { %10229 = vst [vmem:[#allocation27_spill] sm:$0xff] %v8063_v50  ;;  %v8067_v24 = vmax.f32 %v2631_v44, 0.0  ;;  %v2342_v15 = vpop.f32.mrb[60].mxu0  ;;  %v5442_v43 = vpop.f32.mrb[112].mxu1  ;;  %v2995_v49 = vadd.f32 %v2994_v31, %v2896_v62  ;;  %v2897_v27 = vmul.f32 %v8063_v50, %v8063_v50  ;;  %v2857_v52 = vadd.f32 %v2856_v6, %v8063_v50 }
 0x331   :  { %v5699_v1 = vadd.f32 %v2342_v15, %v7947_v12  ;;  %v2344_v34 = vpop.f32.mrb[61].mxu0  ;;  %v5443_v38 = vpop.f32.mrb[113].mxu1  ;;  %v2899_v25 = vmul.f32 %v8059_v19, %v8059_v19 }
 0x332   :  { %10230 = vst [vmem:[#allocation33_spill] sm:$0xff] %v8067_v24  ;;  %v5700_v4 = vadd.f32 %v2344_v34, %v7950_v3  ;;  %v5444_v47 = vadd.f32 %v5443_v38, %v5442_v43  ;;  %v2346_v40 = vpop.f32.mrb[62].mxu0  ;;  %v5445_v20 = vpop.f32.mrb[114].mxu1  ;;  %v3025_v13 = vadd.f32 %v3024_v2, %v2897_v27  ;;  %v2900_v17 = vmul.f32 %v8067_v24, %v8067_v24 }
 0x333   :  { %v8080_v36 = vmax.f32 %v5699_v1, 0.0  ;;  %v5701_v62 = vadd.f32 %v2346_v40, %v7947_v12  ;;  %v2348_v44 = vpop.f32.mrb[63].mxu0  ;;  %v5446_v31 = vpop.f32.mrb[115].mxu1  ;;  %v2966_v43 = vadd.f32 %v2965_v21, %v2898_v48  ;;  %v2828_v38 = vadd.f32 %v2827_v39, %v8059_v19 }
 0x334   :  { %v8083_v15 = vmax.f32 %v5700_v4, 0.0  ;;  %v2636_v6 = vadd.f32 %v5444_v47, %v7964_v63  ;;  %v5702_v50 = vadd.f32 %v2348_v44, %v7950_v3  ;;  %v5447_v34 = vadd.f32 %v5446_v31, %v5445_v20 }
 0x335   :  { %10231 = vst [vmem:[#allocation37_spill] sm:$0xff] %v8080_v36  ;;  %v2901_v2 = vmul.f32 %v8080_v36, %v8080_v36  ;;  %v8090_v27 = vmax.f32 %v5701_v62, 0.0  ;;  %v2799_v1 = vadd.f32 %v2798_v42, %v8080_v36  ;;  %v2996_v63 = vadd.f32 %v2995_v49, %v2899_v25 }
 0x336   :  { %10232 = vst [vmem:[#allocation31_spill] sm:$0xff] %v8083_v15  ;;  %v2902_v40 = vmul.f32 %v8083_v15, %v8083_v15  ;;  %v8095_v4 = vmax.f32 %v2636_v6, 0.0  ;;  %v8097_v11 = vmax.f32 %v5702_v50, 0.0  ;;  %v2858_v47 = vadd.f32 %v2857_v52, %v8067_v24  ;;  %v6096_v24 = vld [vmem:[#allocation5 + $0x70] ss:$8 sps:$4 sm:$0xff]  }
 0x337   :  { %10233 = vst [vmem:[#allocation35_spill] sm:$0xff] %v8090_v27  ;;  %v2829_v21 = vadd.f32 %v2828_v38, %v8083_v15  ;;  %v2639_v39 = vadd.f32 %v5447_v34, %v7968_v0  ;;  %v3026_v48 = vadd.f32 %v3025_v13, %v2900_v17  ;;  %v2967_v20 = vadd.f32 %v2966_v43, %v2901_v2 }
 0x338   :  { %10234 = vst [vmem:[#allocation41_spill] sm:$0xff] %v8095_v4  ;;  %10235 = vst [vmem:[#allocation45_spill] sm:$0xff] %v8097_v11  ;;  %v2903_v62 = vmul.f32 %v8095_v4, %v8095_v4  ;;  %v2904_v42 = vmul.f32 %v8090_v27, %v8090_v27  ;;  %v2352_v44 = vpop.f32.mrb[64].mxu0  ;;  %v5448_v31 = vpop.f32.mrb[116].mxu1  ;;  %v2997_v6 = vadd.f32 %v2996_v63, %v2902_v40  ;;  %v6098_v40 = vld [vmem:[#allocation5 + $0x74] ss:$8 sps:$4 sm:$0xff]  }
 0x339   :  { %v2905_v50 = vmul.f32 %v8097_v11, %v8097_v11  ;;  %v8108_v49 = vmax.f32 %v2639_v39, 0.0  ;;  %v5703_v52 = vadd.f32 %v2352_v44, %v7947_v12  ;;  %v2354_v25 = vpop.f32.mrb[65].mxu0  ;;  %v5449_v0 = vpop.f32.mrb[117].mxu1  ;;  %v2859_v13 = vadd.f32 %v2858_v47, %v8095_v4  ;;  %3655 = vmatprep.subr.bf16.mxu0 %v6098_v40 }
 0x33a   :  { %v2800_v17 = vadd.f32 %v2799_v1, %v8090_v27  ;;  %v5704_v34 = vadd.f32 %v2354_v25, %v7950_v3  ;;  %v5450_v43 = vadd.f32 %v5449_v0, %v5448_v31  ;;  %v2356_v38 = vpop.f32.mrb[66].mxu0  ;;  %v5451_v2 = vpop.f32.mrb[118].mxu1  ;;  %v3027_v63 = vadd.f32 %v3026_v48, %v2903_v62  ;;  %v6101_v0 = vld [vmem:[#allocation5 + $0x84] ss:$8 sps:$4 sm:$0xff]   ;;  %3656 = vmatpush1.bf16.msra.mxu0 %v6096_v24 }
 0x33b   :  { %10236 = vst [vmem:[#allocation39_spill] sm:$0xff] %v8108_v49  ;;  %v2830_v32 = vadd.f32 %v2829_v21, %v8097_v11  ;;  %v2906_v39 = vmul.f32 %v8108_v49, %v8108_v49  ;;  %v8117_v44 = vmax.f32 %v5703_v52, 0.0  ;;  %v2358_v36 = vpop.f32.mrb[67].mxu0  ;;  %v5452_v15 = vpop.f32.mrb[119].mxu1  ;;  %v5705_v31 = vadd.f32 %v2356_v38, %v7947_v12  ;;  %v6099_v52 = vld [vmem:[#allocation5 + $0x80] ss:$8 sps:$4 sm:$0xff]   ;;  %3657 = vmatprep.subr.bf16.mxu0 %v6101_v0 }
 0x33c   :  { %v8119_v47 = vmax.f32 %v5704_v34, 0.0  ;;  %v2644_v1 = vadd.f32 %v5450_v43, %v7972_v23  ;;  %v5706_v25 = vadd.f32 %v2358_v36, %v7950_v3  ;;  %v2968_v48 = vadd.f32 %v2967_v20, %v2904_v42  ;;  %v6104_v36 = vld [vmem:[#allocation5 + $0x94] ss:$8 sps:$4 sm:$0xff]  }
 0x33d   :  { %10237 = vst [vmem:[#allocation43_spill] sm:$0xff] %v8117_v44  ;;  %v2998_v62 = vadd.f32 %v2997_v6, %v2905_v50  ;;  %v2907_v21 = vmul.f32 %v8117_v44, %v8117_v44  ;;  %v5453_v4 = vadd.f32 %v5452_v15, %v5451_v2  ;;  %v2801_v27 = vadd.f32 %v2800_v17, %v8117_v44 }
 0x33e   :  { %10238 = vst [vmem:[#allocation49_spill] sm:$0xff] %v8119_v47  ;;  %v2908_v34 = vmul.f32 %v8119_v47, %v8119_v47  ;;  %v8129_v23 = vmax.f32 %v2644_v1, 0.0  ;;  %v8131_v43 = vmax.f32 %v5705_v31, 0.0  ;;  %v2831_v20 = vadd.f32 %v2830_v32, %v8119_v47  ;;  %3658 = vmatpush1.bf16.msra.mxu0 %v6099_v52 }
 0x33f   :  { %v2969_v38 = vadd.f32 %v2968_v48, %v2907_v21  ;;  %v8134_v42 = vmax.f32 %v5706_v25, 0.0  ;;  %v2647_v15 = vadd.f32 %v5453_v4, %v7977_v56  ;;  %v8139_v24 = vadd.f32 %v7924_v22, %v7944_v5  ;;  %v6102_v25 = vld [vmem:[#allocation5 + $0x90] ss:$8 sps:$4 sm:$0xff]   ;;  %3659 = vmatprep.subr.bf16.mxu0 %v6104_v36  ;;  %v6107_v21 = vld [vmem:[#allocation5 + $0xa4] ss:$8 sps:$4 sm:$0xff]  }
 0x340   :  { %10239 = vst [vmem:[#allocation53_spill] sm:$0xff] %v8129_v23  ;;  %v2860_v6 = vadd.f32 %v2859_v13, %v8108_v49  ;;  %v3028_v50 = vadd.f32 %v3027_v63, %v2906_v39  ;;  %v2909_v17 = vmul.f32 %v8129_v23, %v8129_v23  ;;  %v2362_v2 = vpop.f32.mrb[68].mxu0  ;;  %v5454_v40 = vpop.f32.mrb[120].mxu1  ;;  %v2999_v1 = vadd.f32 %v2998_v62, %v2908_v34 }
 0x341   :  { %v2910_v32 = vmul.f32 %v8131_v43, %v8131_v43  ;;  %v2911_v31 = vmul.f32 %v8134_v42, %v8134_v42  ;;  %v8148_v56 = vmax.f32 %v2647_v15, 0.0  ;;  %v2364_v4 = vpop.f32.mrb[69].mxu0  ;;  %v5455_v22 = vpop.f32.mrb[121].mxu1  ;;  %v5707_v63 = vadd.f32 %v2362_v2, %v7947_v12 }
 0x342   :  { %v2861_v13 = vadd.f32 %v2860_v6, %v8129_v23  ;;  %v5708_v39 = vadd.f32 %v2364_v4, %v7950_v3  ;;  %v5456_v0 = vadd.f32 %v5455_v22, %v5454_v40  ;;  %v2366_v48 = vpop.f32.mrb[70].mxu0  ;;  %v5457_v62 = vpop.f32.mrb[122].mxu1  ;;  %v3029_v34 = vadd.f32 %v3028_v50, %v2909_v17  ;;  %3660 = vmatpush1.bf16.msra.mxu0 %v6102_v25 }
 0x343   :  { %10240 = vst [vmem:[#allocation47_spill] sm:$0xff] %v8148_v56  ;;  %v2802_v49 = vadd.f32 %v2801_v27, %v8131_v43  ;;  %v2970_v15 = vadd.f32 %v2969_v38, %v2910_v32  ;;  %v2832_v44 = vadd.f32 %v2831_v20, %v8134_v42  ;;  %v2368_v47 = vpop.f32.mrb[71].mxu0  ;;  %v5458_v52 = vpop.f32.mrb[123].mxu1  ;;  %v8155_v11 = vmax.f32 %v5707_v63, 0.0  ;;  %v6105_v38 = vld [vmem:[#allocation5 + $0xa0] ss:$8 sps:$4 sm:$0xff]   ;;  %3661 = vmatprep.subr.bf16.mxu0 %v6107_v21 }
 0x344   :  { %v8157_v6 = vmax.f32 %v5708_v39, 0.0  ;;  %v2652_v2 = vadd.f32 %v5456_v0, %v7982_v26  ;;  %v5709_v40 = vadd.f32 %v2366_v48, %v7947_v12  ;;  %v3000_v4 = vadd.f32 %v2999_v1, %v2911_v31  ;;  %v6110_v1 = vld [vmem:[#allocation5 + $0xb4] ss:$8 sps:$4 sm:$0xff]  }
 0x345   :  { %10241 = vst [vmem:[#allocation51_spill] sm:$0xff] %v8155_v11  ;;  %v2912_v36 = vmul.f32 %v8148_v56, %v8148_v56  ;;  %v5710_v50 = vadd.f32 %v2368_v47, %v7950_v3  ;;  %v5459_v27 = vadd.f32 %v5458_v52, %v5457_v62  ;;  %v2803_v20 = vadd.f32 %v2802_v49, %v8155_v11 }
 0x346   :  { %v2913_v17 = vmul.f32 %v8155_v11, %v8155_v11  ;;  %v2833_v32 = vadd.f32 %v2832_v44, %v8157_v6  ;;  %v2914_v26 = vmul.f32 %v8157_v6, %v8157_v6  ;;  %v8170_v31 = vmax.f32 %v2652_v2, 0.0  ;;  %3662 = vmatpush1.bf16.msra.mxu0 %v6105_v38 }
 0x347   :  { %v8172_v22 = vmax.f32 %v5709_v40, 0.0  ;;  %v8174_v47 = vmax.f32 %v5710_v50, 0.0  ;;  %v2655_v25 = vadd.f32 %v5459_v27, %v7992_v53  ;;  %v8179_v49 = vadd.f32 %v7926_v46, %v7944_v5  ;;  %v6108_v40 = vld [vmem:[#allocation5 + $0xb0] ss:$8 sps:$4 sm:$0xff]   ;;  %3663 = vmatprep.subr.bf16.mxu0 %v6110_v1  ;;  %v6113_v50 = vld [vmem:[#allocation5 + $0xc4] ss:$8 sps:$4 sm:$0xff]  }
 0x348   :  { %10242 = vst [vmem:[#allocation57_spill] sm:$0xff] %v8170_v31  ;;  %v8183_v44 = vadd.f32 %v7928_v54, %v7944_v5  ;;  %v2862_v63 = vadd.f32 %v2861_v13, %v8148_v56  ;;  %v2971_v39 = vadd.f32 %v2970_v15, %v2913_v17  ;;  %v2372_v0 = vpop.f32.mrb[72].mxu0  ;;  %v5460_v48 = vpop.f32.mrb[124].mxu1  ;;  %v3030_v62 = vadd.f32 %v3029_v34, %v2912_v36 }
 0x349   :  { %10243 = vst [vmem:[#allocation61_spill] sm:$0xff] %v8172_v22  ;;  %v3001_v21 = vadd.f32 %v3000_v4, %v2914_v26  ;;  %v2915_v52 = vmul.f32 %v8170_v31, %v8170_v31  ;;  %v2916_v53 = vmul.f32 %v8172_v22, %v8172_v22  ;;  %v2374_v2 = vpop.f32.mrb[73].mxu0  ;;  %v5461_v46 = vpop.f32.mrb[125].mxu1  ;;  %v2917_v13 = vmul.f32 %v8174_v47, %v8174_v47 }
 0x34a   :  { %v2863_v54 = vadd.f32 %v2862_v63, %v8170_v31  ;;  %v8193_v15 = vmax.f32 %v2655_v25, 0.0  ;;  %v5711_v34 = vadd.f32 %v2372_v0, %v7947_v12  ;;  %v2376_v4 = vpop.f32.mrb[74].mxu0  ;;  %v5463_v36 = vpop.f32.mrb[126].mxu1  ;;  %v2804_v27 = vadd.f32 %v2803_v20, %v8172_v22  ;;  %3664 = vmatpush1.bf16.msra.mxu0 %v6108_v40 }
 0x34b   :  { %v2834_v17 = vadd.f32 %v2833_v32, %v8174_v47  ;;  %v5712_v38 = vadd.f32 %v2374_v2, %v7950_v3  ;;  %v5462_v26 = vadd.f32 %v5461_v46, %v5460_v48  ;;  %v2378_v56 = vpop.f32.mrb[75].mxu0  ;;  %v5464_v63 = vpop.f32.mrb[127].mxu1  ;;  %v3031_v31 = vadd.f32 %v3030_v62, %v2915_v52  ;;  %v6111_v2 = vld [vmem:[#allocation5 + $0xc0] ss:$8 sps:$4 sm:$0xff]   ;;  %3665 = vmatprep.subr.bf16.mxu0 %v6113_v50  ;;  %v6116_v52 = vld [vmem:[#allocation5 + $0xd4] ss:$8 sps:$4 sm:$0xff]  }
 0x34c   :  { %10244 = vst [vmem:[#allocation55_spill] sm:$0xff] %v8193_v15  ;;  %v2972_v23 = vadd.f32 %v2971_v39, %v2916_v53  ;;  %v2918_v25 = vmul.f32 %v8193_v15, %v8193_v15  ;;  %v8201_v11 = vmax.f32 %v5711_v34, 0.0  ;;  %v5713_v20 = vadd.f32 %v2376_v4, %v7947_v12 }
 0x34d   :  { %v8203_v0 = vmax.f32 %v5712_v38, 0.0  ;;  %v2660_v1 = vadd.f32 %v5462_v26, %v8000_v57  ;;  %v5714_v32 = vadd.f32 %v2378_v56, %v7950_v3  ;;  %v3002_v48 = vadd.f32 %v3001_v21, %v2917_v13 }
 0x34e   :  { %10245 = vst [vmem:[#allocation59_spill] sm:$0xff] %v8201_v11  ;;  %v2864_v46 = vadd.f32 %v2863_v54, %v8193_v15  ;;  %v2919_v39 = vmul.f32 %v8201_v11, %v8201_v11  ;;  %v5465_v62 = vadd.f32 %v5464_v63, %v5463_v36  ;;  %v2805_v53 = vadd.f32 %v2804_v27, %v8201_v11 }
 0x34f   :  { %10246 = vst [vmem:[#allocation65_spill] sm:$0xff] %v8203_v0  ;;  %v2920_v57 = vmul.f32 %v8203_v0, %v8203_v0  ;;  %v8214_v34 = vmax.f32 %v2660_v1, 0.0  ;;  %v8216_v4 = vmax.f32 %v5713_v20, 0.0  ;;  %v2835_v21 = vadd.f32 %v2834_v17, %v8203_v0  ;;  %3666 = vmatpush1.bf16.msra.mxu0 %v6111_v2 }
 0x350   :  { %v2973_v56 = vadd.f32 %v2972_v23, %v2919_v39  ;;  %v8219_v40 = vmax.f32 %v5714_v32, 0.0  ;;  %v2663_v54 = vadd.f32 %v5465_v62, %v8004_v14  ;;  %v2382_v13 = vpop.f32.mrb[76].mxu0  ;;  %v5466_v36 = vpop.f32.mrb[128].mxu1  ;;  %v8224_v50 = vadd.f32 %v7930_v58, %v7944_v5  ;;  %v6114_v23 = vld [vmem:[#allocation5 + $0xd0] ss:$8 sps:$4 sm:$0xff]   ;;  %3667 = vmatprep.subr.bf16.mxu0 %v6116_v52 }
 0x351   :  { %10247 = vst [vmem:[#allocation69_spill] sm:$0xff] %v8214_v34  ;;  %v3032_v27 = vadd.f32 %v3031_v31, %v2918_v25  ;;  %v3003_v38 = vadd.f32 %v3002_v48, %v2920_v57  ;;  %v2921_v26 = vmul.f32 %v8214_v34, %v8214_v34  ;;  %v2384_v63 = vpop.f32.mrb[77].mxu0  ;;  %v5467_v1 = vpop.f32.mrb[129].mxu1  ;;  %v2865_v17 = vadd.f32 %v2864_v46, %v8214_v34  ;;  %v6119_v25 = vld [vmem:[#allocation5 + $0xe4] ss:$8 sps:$4 sm:$0xff]  }
 0x352   :  { %v2922_v14 = vmul.f32 %v8216_v4, %v8216_v4  ;;  %v2923_v20 = vmul.f32 %v8219_v40, %v8219_v40  ;;  %v8233_v32 = vmax.f32 %v2663_v54, 0.0  ;;  %v2386_v58 = vpop.f32.mrb[78].mxu0  ;;  %v5469_v31 = vpop.f32.mrb[130].mxu1  ;;  %v2806_v48 = vadd.f32 %v2805_v53, %v8216_v4 }
 0x353   :  { %v5715_v39 = vadd.f32 %v2382_v13, %v7947_v12  ;;  %v5716_v2 = vadd.f32 %v2384_v63, %v7950_v3  ;;  %v5468_v62 = vadd.f32 %v5467_v1, %v5466_v36  ;;  %v2388_v46 = vpop.f32.mrb[79].mxu0  ;;  %v5470_v57 = vpop.f32.mrb[131].mxu1  ;;  %v3033_v34 = vadd.f32 %v3032_v27, %v2921_v26  ;;  %3668 = vmatpush1.bf16.msra.mxu0 %v6114_v23  ;;  %v6117_v13 = vld [vmem:[#allocation5 + $0xe0] ss:$8 sps:$4 sm:$0xff]  }
 0x354   :  { %10248 = vst [vmem:[#allocation63_spill] sm:$0xff] %v8233_v32  ;;  %v2974_v15 = vadd.f32 %v2973_v56, %v2922_v14  ;;  %v2836_v11 = vadd.f32 %v2835_v21, %v8219_v40  ;;  %v3004_v0 = vadd.f32 %v3003_v38, %v2923_v20  ;;  %v5717_v53 = vadd.f32 %v2386_v58, %v7947_v12  ;;  %v6122_v21 = vld [vmem:[#allocation5 + $0xf4] ss:$8 sps:$4 sm:$0xff]  }
 0x355   :  { %v8239_v54 = vmax.f32 %v5715_v39, 0.0  ;;  %v8241_v22 = vmax.f32 %v5716_v2, 0.0  ;;  %v2668_v52 = vadd.f32 %v5468_v62, %v8008_v16  ;;  %v2866_v63 = vadd.f32 %v2865_v17, %v8233_v32  ;;  %3669 = vmatprep.subr.bf16.mxu0 %v6119_v25 }
 0x356   :  { %v2924_v36 = vmul.f32 %v8233_v32, %v8233_v32  ;;  %v5718_v56 = vadd.f32 %v2388_v46, %v7950_v3  ;;  %v5471_v27 = vadd.f32 %v5470_v57, %v5469_v31  ;;  %v8257_v17 = vmax.f32 %v5717_v53, 0.0  ;;  %v6120_v46 = vld [vmem:[#allocation5 + $0xf0] ss:$8 sps:$4 sm:$0xff]   ;;  %v6125_v53 = vld [vmem:[#allocation5 + $0x104] ss:$8 sps:$4 sm:$0xff]  }
 0x357   :  { %10249 = vst [vmem:[#allocation67_spill] sm:$0xff] %v8239_v54  ;;  %10250 = vst [vmem:[#allocation73_spill] sm:$0xff] %v8241_v22  ;;  %v2807_v38 = vadd.f32 %v2806_v48, %v8239_v54  ;;  %v2925_v26 = vmul.f32 %v8239_v54, %v8239_v54  ;;  %v2837_v16 = vadd.f32 %v2836_v11, %v8241_v22  ;;  %v8255_v23 = vmax.f32 %v2668_v52, 0.0 }
 0x358   :  { %v2926_v1 = vmul.f32 %v8241_v22, %v8241_v22  ;;  %v8259_v14 = vmax.f32 %v5718_v56, 0.0  ;;  %v2671_v20 = vadd.f32 %v5471_v27, %v8012_v55  ;;  %v2392_v58 = vpop.f32.mrb[80].mxu0  ;;  %v5472_v31 = vpop.f32.mrb[132].mxu1  ;;  %v8264_v25 = vadd.f32 %v7932_v28, %v7944_v5  ;;  %3670 = vmatpush1.bf16.msra.mxu0 %v6117_v13 }
 0x359   :  { %10251 = vst [vmem:[#allocation77_spill] sm:$0xff] %v8255_v23  ;;  %v2975_v48 = vadd.f32 %v2974_v15, %v2925_v26  ;;  %v5719_v11 = vadd.f32 %v2392_v58, %v7947_v12  ;;  %v2394_v2 = vpop.f32.mrb[81].mxu0  ;;  %v5473_v62 = vpop.f32.mrb[133].mxu1  ;;  %v8269_v57 = vadd.f32 %v7934_v8, %v7944_v5  ;;  %v2867_v55 = vadd.f32 %v2866_v63, %v8255_v23 }
 0x35a   :  { %v3005_v39 = vadd.f32 %v3004_v0, %v2926_v1  ;;  %v2927_v52 = vmul.f32 %v8255_v23, %v8255_v23  ;;  %v2928_v28 = vmul.f32 %v8257_v17, %v8257_v17  ;;  %v2396_v15 = vpop.f32.mrb[82].mxu0  ;;  %v5475_v0 = vpop.f32.mrb[134].mxu1  ;;  %3671 = vmatprep.subr.bf16.mxu0 %v6122_v21  ;;  %v3034_v56 = vadd.f32 %v3033_v34, %v2924_v36 }
 0x35b   :  { %v2929_v13 = vmul.f32 %v8259_v14, %v8259_v14  ;;  %v8278_v27 = vmax.f32 %v2671_v20, 0.0  ;;  %v8280_v8 = vmax.f32 %v5719_v11, 0.0  ;;  %v2398_v26 = vpop.f32.mrb[83].mxu0  ;;  %v5476_v63 = vpop.f32.mrb[135].mxu1  ;;  %v2808_v1 = vadd.f32 %v2807_v38, %v8257_v17 }
 0x35c   :  { %v2838_v58 = vadd.f32 %v2837_v16, %v8259_v14  ;;  %v5720_v23 = vadd.f32 %v2394_v2, %v7950_v3  ;;  %v5474_v32 = vadd.f32 %v5473_v62, %v5472_v31  ;;  %v3035_v54 = vadd.f32 %v3034_v56, %v2927_v52  ;;  %3672 = vmatpush1.bf16.msra.mxu0 %v6120_v46 }
 0x35d   :  { %10252 = vst [vmem:[#allocation71_spill] sm:$0xff] %v8278_v27  ;;  %10253 = vst [vmem:[#allocation75_spill] sm:$0xff] %v8280_v8  ;;  %v2976_v21 = vadd.f32 %v2975_v48, %v2928_v28  ;;  %v3006_v22 = vadd.f32 %v3005_v39, %v2929_v13  ;;  %v2868_v34 = vadd.f32 %v2867_v55, %v8278_v27  ;;  %3802 = vmatprep.subr.bf16.mxu0 %v6125_v53 }
 0x35e   :  { %v2931_v36 = vmul.f32 %v8280_v8, %v8280_v8  ;;  %v8288_v20 = vmax.f32 %v5720_v23, 0.0  ;;  %v2676_v11 = vadd.f32 %v5474_v32, %v8016_v9  ;;  %v5721_v38 = vadd.f32 %v2396_v15, %v7947_v12 }
 0x35f   :  { %v2930_v16 = vmul.f32 %v8278_v27, %v8278_v27  ;;  %v2809_v31 = vadd.f32 %v2808_v1, %v8280_v8  ;;  %v5722_v48 = vadd.f32 %v2398_v26, %v7950_v3  ;;  %v5477_v39 = vadd.f32 %v5476_v63, %v5475_v0 }
 0x360   :  { %v2977_v2 = vadd.f32 %v2976_v21, %v2931_v36  ;;  %v2839_v62 = vadd.f32 %v2838_v58, %v8288_v20  ;;  %v2932_v23 = vmul.f32 %v8288_v20, %v8288_v20  ;;  %v8299_v46 = vmax.f32 %v2676_v11, 0.0  ;;  %v2402_v9 = vpop.f32.mrb[84].mxu0  ;;  %v5478_v32 = vpop.f32.mrb[136].mxu1 }
 0x361   :  { %v8301_v55 = vmax.f32 %v5721_v38, 0.0  ;;  %v8303_v52 = vmax.f32 %v5722_v48, 0.0  ;;  %v2679_v28 = vadd.f32 %v5477_v39, %v8020_v33  ;;  %v5723_v15 = vadd.f32 %v2402_v9, %v7947_v12  ;;  %v2404_v53 = vpop.f32.mrb[85].mxu0  ;;  %v5479_v0 = vpop.f32.mrb[137].mxu1 }
 0x362   :  { %10254 = vst [vmem:[#allocation81_spill] sm:$0xff] %v8299_v46  ;;  %v3007_v56 = vadd.f32 %v3006_v22, %v2932_v23  ;;  %v2869_v13 = vadd.f32 %v2868_v34, %v8299_v46  ;;  %v2933_v26 = vmul.f32 %v8299_v46, %v8299_v46  ;;  %v5724_v63 = vadd.f32 %v2404_v53, %v7950_v3  ;;  %v2406_v1 = vpop.f32.mrb[86].mxu0  ;;  %v5481_v58 = vpop.f32.mrb[138].mxu1 }
 0x363   :  { %v8313_v21 = vadd.f32 %v7936_v60, %v7944_v5  ;;  %v3036_v36 = vadd.f32 %v3035_v54, %v2930_v16  ;;  %v2934_v33 = vmul.f32 %v8301_v55, %v8301_v55  ;;  %v2935_v22 = vmul.f32 %v8303_v52, %v8303_v52  ;;  %v2408_v11 = vpop.f32.mrb[87].mxu0  ;;  %v5482_v34 = vpop.f32.mrb[139].mxu1 }
 0x364   :  { %v2810_v38 = vadd.f32 %v2809_v31, %v8301_v55  ;;  %v8320_v48 = vmax.f32 %v2679_v28, 0.0  ;;  %v8322_v39 = vmax.f32 %v5723_v15, 0.0  ;;  %v8324_v23 = vmax.f32 %v5724_v63, 0.0 }
 0x365   :  { %v3037_v9 = vadd.f32 %v3036_v36, %v2933_v26  ;;  %v2840_v60 = vadd.f32 %v2839_v62, %v8303_v52  ;;  %v5480_v54 = vadd.f32 %v5479_v0, %v5478_v32  ;;  %v5725_v16 = vadd.f32 %v2406_v1, %v7947_v12 }
 0x366   :  { %10255 = vst [vmem:[#allocation85_spill] sm:$0xff] %v8320_v48  ;;  %v2978_v53 = vadd.f32 %v2977_v2, %v2934_v33  ;;  %v3008_v46 = vadd.f32 %v3007_v56, %v2935_v22  ;;  %v2870_v27 = vadd.f32 %v2869_v13, %v8320_v48  ;;  %v2937_v8 = vmul.f32 %v8322_v39, %v8322_v39 }
 0x367   :  { %v2936_v31 = vmul.f32 %v8320_v48, %v8320_v48  ;;  %v2938_v28 = vmul.f32 %v8324_v23, %v8324_v23  ;;  %v2684_v15 = vadd.f32 %v5480_v54, %v8024_v18  ;;  %v8336_v26 = vmax.f32 %v5725_v16, 0.0 }
 0x368   :  { %v2811_v62 = vadd.f32 %v2810_v38, %v8322_v39  ;;  %v2841_v2 = vadd.f32 %v2840_v60, %v8324_v23  ;;  %v5726_v32 = vadd.f32 %v2408_v11, %v7950_v3  ;;  %v5483_v0 = vadd.f32 %v5482_v34, %v5481_v58  ;;  %v2412_v56 = vpop.f32.mrb[88].mxu0  ;;  %v5484_v13 = vpop.f32.mrb[140].mxu1 }
 0x369   :  { %v2979_v63 = vadd.f32 %v2978_v53, %v2937_v8  ;;  %v3009_v1 = vadd.f32 %v3008_v46, %v2938_v28  ;;  %v8341_v36 = vmax.f32 %v2684_v15, 0.0  ;;  %v2940_v33 = vmul.f32 %v8336_v26, %v8336_v26  ;;  %v2414_v22 = vpop.f32.mrb[89].mxu0  ;;  %v5485_v18 = vpop.f32.mrb[141].mxu1 }
 0x36a   :  { %v8345_v54 = vmax.f32 %v5726_v32, 0.0  ;;  %v2687_v38 = vadd.f32 %v5483_v0, %v8139_v24  ;;  %v5727_v60 = vadd.f32 %v2412_v56, %v7947_v12  ;;  %v5728_v11 = vadd.f32 %v2414_v22, %v7950_v3  ;;  %v2416_v58 = vpop.f32.mrb[90].mxu0  ;;  %v5487_v34 = vpop.f32.mrb[142].mxu1 }
 0x36b   :  { %10256 = vst [vmem:[#allocation79_spill] sm:$0xff] %v8341_v36  ;;  %v3038_v16 = vadd.f32 %v3037_v9, %v2936_v31  ;;  %v2871_v8 = vadd.f32 %v2870_v27, %v8341_v36  ;;  %v2939_v46 = vmul.f32 %v8341_v36, %v8341_v36  ;;  %v5486_v53 = vadd.f32 %v5485_v18, %v5484_v13  ;;  %v2418_v28 = vpop.f32.mrb[91].mxu0  ;;  %v5488_v15 = vpop.f32.mrb[143].mxu1 }
 0x36c   :  { %v2812_v32 = vadd.f32 %v2811_v62, %v8336_v26  ;;  %v2941_v24 = vmul.f32 %v8345_v54, %v8345_v54  ;;  %v8356_v0 = vmax.f32 %v2687_v38, 0.0  ;;  %v8358_v56 = vmax.f32 %v5727_v60, 0.0 }
 0x36d   :  { %v3039_v22 = vadd.f32 %v3038_v16, %v2939_v46  ;;  %v8360_v48 = vmax.f32 %v5728_v11, 0.0  ;;  %v2692_v27 = vadd.f32 %v5486_v53, %v8179_v49  ;;  %v5729_v9 = vadd.f32 %v2416_v58, %v7947_v12 }
 0x36e   :  { %10257 = vst [vmem:[#allocation83_spill] sm:$0xff] %v8356_v0  ;;  %10258 = vst [vmem:[#allocation89_spill] sm:$0xff] %v8358_v56  ;;  %v2980_v31 = vadd.f32 %v2979_v63, %v2940_v33  ;;  %v2842_v13 = vadd.f32 %v2841_v2, %v8345_v54  ;;  %v3010_v18 = vadd.f32 %v3009_v1, %v2941_v24 }
 0x36f   :  { %10259 = vst [vmem:[#allocation92_spill] sm:$0xff] %v8360_v48  ;;  %v2942_v62 = vmul.f32 %v8356_v0, %v8356_v0  ;;  %v2872_v36 = vadd.f32 %v2871_v8, %v8356_v0  ;;  %v2943_v38 = vmul.f32 %v8358_v56, %v8358_v56  ;;  %v2944_v60 = vmul.f32 %v8360_v48, %v8360_v48 }
 0x370   :  { %v8372_v11 = vmax.f32 %v2692_v27, 0.0  ;;  %v2813_v49 = vadd.f32 %v2812_v32, %v8358_v56  ;;  %v8375_v58 = vmax.f32 %v5729_v9, 0.0  ;;  %v5730_v2 = vadd.f32 %v2418_v28, %v7950_v3  ;;  %v2422_v1 = vpop.f32.mrb[92].mxu0  ;;  %v5490_v33 = vpop.f32.mrb[144].mxu1 }
 0x371   :  { %v5489_v63 = vadd.f32 %v5488_v15, %v5487_v34  ;;  %v3040_v16 = vadd.f32 %v3039_v22, %v2942_v62  ;;  %v2981_v46 = vadd.f32 %v2980_v31, %v2943_v38  ;;  %v2843_v8 = vadd.f32 %v2842_v13, %v8360_v48  ;;  %v2424_v24 = vpop.f32.mrb[93].mxu0  ;;  %v5491_v0 = vpop.f32.mrb[145].mxu1 }
 0x372   :  { %10260 = vst [vmem:[#allocation107_spill] sm:$0xff] %v8372_v11  ;;  %10261 = vst [vmem:[#allocation104_spill] sm:$0xff] %v8375_v58  ;;  %v2945_v53 = vmul.f32 %v8372_v11, %v8372_v11  ;;  %v3011_v27 = vadd.f32 %v3010_v18, %v2944_v60  ;;  %v2946_v32 = vmul.f32 %v8375_v58, %v8375_v58  ;;  %v8383_v9 = vmax.f32 %v5730_v2, 0.0  ;;  %v2426_v34 = vpop.f32.mrb[94].mxu0  ;;  %v5493_v15 = vpop.f32.mrb[146].mxu1 }
 0x373   :  { %v2695_v28 = vadd.f32 %v5489_v63, %v8183_v44  ;;  %v2873_v22 = vadd.f32 %v2872_v36, %v8372_v11  ;;  %v5731_v31 = vadd.f32 %v2422_v1, %v7947_v12  ;;  %v5732_v13 = vadd.f32 %v2424_v24, %v7950_v3  ;;  %v2428_v38 = vpop.f32.mrb[95].mxu0  ;;  %v5494_v56 = vpop.f32.mrb[147].mxu1 }
 0x374   :  { %10262 = vst [vmem:[#allocation106_spill] sm:$0xff] %v8383_v9  ;;  %v5492_v62 = vadd.f32 %v5491_v0, %v5490_v33  ;;  %v3041_v48 = vadd.f32 %v3040_v16, %v2945_v53  ;;  %v2814_v18 = vadd.f32 %v2813_v49, %v8375_v58  ;;  %v2947_v60 = vmul.f32 %v8383_v9, %v8383_v9 }
 0x375   :  { %v8392_v2 = vmax.f32 %v2695_v28, 0.0  ;;  %v8394_v44 = vmax.f32 %v5731_v31, 0.0  ;;  %v8396_v63 = vmax.f32 %v5732_v13, 0.0  ;;  %v5733_v1 = vadd.f32 %v2426_v34, %v7947_v12 }
 0x376   :  { %v2700_v36 = vadd.f32 %v5492_v62, %v8224_v50  ;;  %v2982_v24 = vadd.f32 %v2981_v46, %v2946_v32  ;;  %v2844_v0 = vadd.f32 %v2843_v8, %v8383_v9  ;;  %v5734_v49 = vadd.f32 %v2428_v38, %v7950_v3 }
 0x377   :  { %10263 = vst [vmem:[#allocation103_spill] sm:$0xff] %v8392_v2  ;;  %10264 = vst [vmem:[#allocation18_spill] sm:$0xff] %v8394_v44  ;;  %v2948_v33 = vmul.f32 %v8392_v2, %v8392_v2  ;;  %v3012_v16 = vadd.f32 %v3011_v27, %v2947_v60  ;;  %v2815_v53 = vadd.f32 %v2814_v18, %v8394_v44  ;;  %v8412_v46 = vmax.f32 %v5733_v1, 0.0 }
 0x378   :  { %10265 = vst [vmem:[#allocation22_spill] sm:$0xff] %v8396_v63  ;;  %v2949_v28 = vmul.f32 %v8394_v44, %v8394_v44  ;;  %v2950_v31 = vmul.f32 %v8396_v63, %v8396_v63  ;;  %v2845_v50 = vadd.f32 %v2844_v0, %v8396_v63  ;;  %v8410_v34 = vmax.f32 %v2700_v36, 0.0  ;;  %v2432_v32 = vpop.f32.mrb[96].mxu0  ;;  %v5496_v13 = vpop.f32.mrb[148].mxu1 }
 0x379   :  { %v8414_v8 = vmax.f32 %v5734_v49, 0.0  ;;  %v2874_v27 = vadd.f32 %v2873_v22, %v8392_v2  ;;  %v5495_v38 = vadd.f32 %v5494_v56, %v5493_v15  ;;  %v5735_v18 = vadd.f32 %v2432_v32, %v7947_v12  ;;  %v2434_v60 = vpop.f32.mrb[97].mxu0  ;;  %v5497_v11 = vpop.f32.mrb[149].mxu1 }
 0x37a   :  { %10266 = vst [vmem:[#allocation16_spill] sm:$0xff] %v8410_v34  ;;  %v2983_v62 = vadd.f32 %v2982_v24, %v2949_v28  ;;  %v3042_v44 = vadd.f32 %v3041_v48, %v2948_v33  ;;  %v3013_v58 = vadd.f32 %v3012_v16, %v2950_v31  ;;  %v2951_v36 = vmul.f32 %v8410_v34, %v8410_v34  ;;  %v2436_v0 = vpop.f32.mrb[98].mxu0  ;;  %v5499_v49 = vpop.f32.mrb[150].mxu1 }
 0x37b   :  { %v2952_v1 = vmul.f32 %v8412_v46, %v8412_v46  ;;  %v2875_v63 = vadd.f32 %v2874_v27, %v8410_v34  ;;  %v2953_v22 = vmul.f32 %v8414_v8, %v8414_v8  ;;  %v2703_v56 = vadd.f32 %v5495_v38, %v8264_v25  ;;  %v2438_v24 = vpop.f32.mrb[99].mxu0  ;;  %v5500_v48 = vpop.f32.mrb[151].mxu1 }
 0x37c   :  { %v8426_v15 = vmax.f32 %v5735_v18, 0.0  ;;  %v2816_v33 = vadd.f32 %v2815_v53, %v8412_v46  ;;  %v2846_v16 = vadd.f32 %v2845_v50, %v8414_v8  ;;  %v5736_v28 = vadd.f32 %v2434_v60, %v7950_v3 }
 0x37d   :  { %v5498_v31 = vadd.f32 %v5497_v11, %v5496_v13  ;;  %v3043_v32 = vadd.f32 %v3042_v44, %v2951_v36  ;;  %v2984_v2 = vadd.f32 %v2983_v62, %v2952_v1  ;;  %v8431_v9 = vmax.f32 %v2703_v56, 0.0 }
 0x37e   :  { %v2955_v27 = vmul.f32 %v8426_v15, %v8426_v15  ;;  %v8435_v34 = vmax.f32 %v5736_v28, 0.0  ;;  %v5737_v38 = vadd.f32 %v2436_v0, %v7947_v12  ;;  %v5738_v53 = vadd.f32 %v2438_v24, %v7950_v3 }
 0x37f   :  { %10267 = vst [vmem:[#allocation102_spill] sm:$0xff] %v8431_v9  ;;  %v2708_v25 = vadd.f32 %v5498_v31, %v8269_v57  ;;  %v3014_v18 = vadd.f32 %v3013_v58, %v2953_v22  ;;  %v2954_v50 = vmul.f32 %v8431_v9, %v8431_v9  ;;  %v2817_v11 = vadd.f32 %v2816_v33, %v8426_v15 }
 0x380   :  { %v5501_v44 = vadd.f32 %v5500_v48, %v5499_v49  ;;  %v2985_v13 = vadd.f32 %v2984_v2, %v2955_v27  ;;  %v2956_v62 = vmul.f32 %v8435_v34, %v8435_v34  ;;  %v8447_v36 = vmax.f32 %v5737_v38, 0.0  ;;  %v2442_v57 = vpop.f32.mrb[100].mxu0  ;;  %v5502_v1 = vpop.f32.mrb[152].mxu1 }
 0x381   :  { %v8445_v60 = vmax.f32 %v2708_v25, 0.0  ;;  %v2847_v0 = vadd.f32 %v2846_v16, %v8435_v34  ;;  %v8450_v56 = vmax.f32 %v5738_v53, 0.0  ;;  %v5739_v22 = vadd.f32 %v2442_v57, %v7947_v12  ;;  %v2444_v24 = vpop.f32.mrb[101].mxu0  ;;  %v5503_v49 = vpop.f32.mrb[153].mxu1 }
 0x382   :  { %10269 = vst [vmem:[#allocation20_spill] sm:$0xff] %v8447_v36  ;;  %v2711_v58 = vadd.f32 %v5501_v44, %v8313_v21  ;;  %v2580_v2 = vadd.f32 %v7941_v10, %v7944_v5  ;;  %v2876_v48 = vadd.f32 %v2875_v63, %v8431_v9  ;;  %v3015_v33 = vadd.f32 %v3014_v18, %v2956_v62  ;;  %v2446_v28 = vpop.f32.mrb[102].mxu0  ;;  %v5505_v31 = vpop.f32.mrb[154].mxu1 }
 0x383   :  { %10268 = vst [vmem:[#allocation101_spill] sm:$0xff] %v8445_v60  ;;  %v2957_v27 = vmul.f32 %v8445_v60, %v8445_v60  ;;  %v2958_v16 = vmul.f32 %v8447_v36, %v8447_v36  ;;  %v2959_v21 = vmul.f32 %v8450_v56, %v8450_v56  ;;  %v2447_v25 = vpop.f32.mrb[103].mxu0  ;;  %v5506_v38 = vpop.f32.mrb[155].mxu1  ;;  %v2818_v10 = vadd.f32 %v2817_v11, %v8447_v36 }
 0x384   :  { %v8463_v12 = vmax.f32 %v2711_v58, 0.0  ;;  %v8466_v5 = vmax.f32 %v5739_v22, 0.0  ;;  %v5740_v63 = vadd.f32 %v2444_v24, %v7950_v3  ;;  %v5504_v53 = vadd.f32 %v5503_v49, %v5502_v1 }
 0x385   :  { %v3044_v18 = vadd.f32 %v3043_v32, %v2954_v50  ;;  %v2877_v44 = vadd.f32 %v2876_v48, %v8445_v60  ;;  %v2986_v62 = vadd.f32 %v2985_v13, %v2958_v16  ;;  %v2848_v57 = vadd.f32 %v2847_v0, %v8450_v56 }
 0x386   :  { %10270 = vst [vmem:[#allocation23_spill] sm:$0xff] %v8463_v12  ;;  %v2819_v28 = vadd.f32 %v2818_v10, %v8466_v5  ;;  %v2961_v58 = vmul.f32 %v8466_v5, %v8466_v5  ;;  %v8474_v31 = vmax.f32 %v5740_v63, 0.0  ;;  %v2716_v25 = vadd.f32 %v5504_v53, %v2580_v2 }
 0x387   :  { %v3045_v11 = vadd.f32 %v3044_v18, %v2957_v27  ;;  %v3016_v22 = vadd.f32 %v3015_v33, %v2959_v21  ;;  %v2960_v3 = vmul.f32 %v8463_v12, %v8463_v12  ;;  %v2878_v0 = vadd.f32 %v2877_v44, %v8463_v12 }
 0x388   :  { %v2820_v1 = vrot.slane %v2819_v28, 4  ;;  %v2987_v32 = vadd.f32 %v2986_v62, %v2961_v58  ;;  %v2849_v50 = vadd.f32 %v2848_v57, %v8474_v31  ;;  %v2962_v13 = vmul.f32 %v8474_v31, %v8474_v31 }
 0x389   :  { %v8482_v24 = vmax.f32 %v2716_v25, 0.0  ;;  %v3046_v27 = vadd.f32 %v3045_v11, %v2960_v3 }
 0x38a   :  { %v2821_v49 = vadd.f32 %v2820_v1, %v2819_v28  ;;  %v2988_v48 = vrot.slane %v2987_v32, 4  ;;  %v2850_v16 = vrot.slane %v2849_v50, 4  ;;  %v3017_v2 = vadd.f32 %v3016_v22, %v2962_v13 }
 0x38b   :  { %10271 = vst [vmem:[#allocation19_spill] sm:$0xff] %v8482_v24  ;;  %v2879_v33 = vadd.f32 %v2878_v0, %v8482_v24  ;;  %v2963_v21 = vmul.f32 %v8482_v24, %v8482_v24 }
 0x38c   :  { %v2822_v38 = vrot.slane %v2821_v49, 2  ;;  %v2989_v10 = vadd.f32 %v2988_v48, %v2987_v32  ;;  %v2851_v63 = vadd.f32 %v2850_v16, %v2849_v50  ;;  %v3018_v53 = vrot.slane %v3017_v2, 4 }
 0x38d   :  { %v2880_v18 = vrot.slane %v2879_v33, 4  ;;  %v3047_v62 = vadd.f32 %v3046_v27, %v2963_v21 }
 0x38e   :  { %v2823_v57 = vadd.f32 %v2822_v38, %v2821_v49  ;;  %v2990_v44 = vrot.slane %v2989_v10, 2  ;;  %v2852_v58 = vrot.slane %v2851_v63, 2  ;;  %v3019_v25 = vadd.f32 %v3018_v53, %v3017_v2 }
 0x38f   :  { %v2881_v28 = vadd.f32 %v2880_v18, %v2879_v33  ;;  %v3048_v1 = vrot.slane %v3047_v62, 4 }
 0x390   :  { %v2824_v12 = vrot.slane %v2823_v57, 1  ;;  %v2991_v22 = vadd.f32 %v2990_v44, %v2989_v10  ;;  %v2853_v11 = vadd.f32 %v2852_v58, %v2851_v63  ;;  %v3020_v3 = vrot.slane %v3019_v25, 2 }
 0x391   :  { %v2882_v13 = vrot.slane %v2881_v28, 2  ;;  %v3049_v0 = vadd.f32 %v3048_v1, %v3047_v62 }
 0x392   :  { %v2825_v60 = vadd.f32 %v2824_v12, %v2823_v57  ;;  %v2992_v24 = vrot.slane %v2991_v22, 1  ;;  %v2854_v9 = vrot.slane %v2853_v11, 1  ;;  %v3021_v32 = vadd.f32 %v3020_v3, %v3019_v25 }
 0x393   :  { %v2883_v50 = vadd.f32 %v2882_v13, %v2881_v28  ;;  %v3050_v48 = vrot.slane %v3049_v0, 2 }
 0x394   :  { %v2886_v16 = vmul.f32 0.005, %v2825_v60  ;;  %v2993_v27 = vadd.f32 %v2992_v24, %v2991_v22  ;;  %v2855_v49 = vadd.f32 %v2854_v9, %v2853_v11  ;;  %v3022_v21 = vrot.slane %v3021_v32, 1 }
 0x395   :  { %v2884_v38 = vrot.slane %v2883_v50, 1  ;;  %v3051_v2 = vadd.f32 %v3050_v48, %v3049_v0 }
 0x396   :  { %v3054_v33 = vmul.f32 0.005, %v2993_v27  ;;  %v3057_v53 = vmul.f32 %v2886_v16, %v2886_v16  ;;  %v2887_v18 = vmul.f32 0.005, %v2855_v49  ;;  %v3023_v10 = vadd.f32 %v3022_v21, %v3021_v32  ;;  %v3072_v32 = vld [vmem:[%s9867_s1 + $0xf] sm:$0x7] }
 0x397   :  { %v2885_v63 = vadd.f32 %v2884_v38, %v2883_v50  ;;  %v3052_v44 = vrot.slane %v3051_v2, 1  ;;  %v3077_v50 = vrot.slane %v3072_v32, %v10170_v29  ;;  %v3081_v48 = vrot.slane %v3072_v32, %v10226_v7 }
 0x398   :  { %v3060_v58 = vsub.f32 %v3054_v33, %v3057_v53  ;;  %v3055_v62 = vmul.f32 0.005, %v3023_v10  ;;  %v3058_v12 = vmul.f32 %v2887_v18, %v2887_v18  ;;  %v3085_v38 = vrot.slane %v3072_v32, %v10175_v51 }
 0x399   :  { %v2888_v57 = vmul.f32 0.005, %v2885_v63  ;;  %v3053_v1 = vadd.f32 %v3052_v44, %v3051_v2 }
 0x39a   :  { %v3063_v25 = vmax.f32 %v3060_v58, 0.0  ;;  %v3061_v28 = vsub.f32 %v3055_v62, %v3058_v12 }
 0x39b   :  { %v3056_v3 = vmul.f32 0.005, %v3053_v1  ;;  %v3059_v60 = vmul.f32 %v2888_v57, %v2888_v57 }
 0x39c   :  { %v3066_v24 = vadd.f32 1e-05, %v3063_v25  ;;  %v3064_v9 = vmax.f32 %v3061_v28, 0.0 }
 0x39d   :  { %v3062_v22 = vsub.f32 %v3056_v3, %v3059_v60  ;;  %v10275_v60 = vld [vmem:[#allocation105_spill] sm:$0xff] }
 0x39e   :  { %6179 = vrsqrt.f32 %v3066_v24  ;;  %v3067_v11 = vadd.f32 1e-05, %v3064_v9 }
 0x39f   :  { %v3065_v13 = vmax.f32 %v3062_v22, 0.0  ;;  %v10277_v22 = vld [vmem:[#allocation45_spill] sm:$0xff] }
 0x3a0   :  { %6181 = vrsqrt.f32 %v3067_v11  ;;  %v10278_v11 = vld [vmem:[#allocation37_spill] sm:$0xff] }
 0x3a1   :  { %v3068_v0 = vadd.f32 1e-05, %v3065_v13  ;;  %v10279_v13 = vld [vmem:[#allocation35_spill] sm:$0xff] }
 0x3a3   :  { %6183 = vrsqrt.f32 %v3068_v0 }
 0x3a8   :  { %v6180_v27 = vpop.eup %6179 }
 0x3a9   :  { %v3089_v49 = vmul.f32 %v6180_v27, %v3077_v50  ;;  %v10281_v50 = vld [vmem:[#allocation43_spill] sm:$0xff] }
 0x3aa   :  { %v6182_v21 = vpop.eup %6181 }
 0x3ab   :  { %v3093_v2 = vmul.f32 %v3089_v49, %v2886_v16  ;;  %v8494_v33 = vrot.slane %v3089_v49, %v10170_v29  ;;  %v3090_v53 = vmul.f32 %v6182_v21, %v3081_v48 }
 0x3ad   :  { %v6184_v10 = vpop.eup %6183  ;;  %v8498_v63 = vmul.f32 %v8494_v33, %v8466_v5  ;;  %v3094_v44 = vmul.f32 %v3090_v53, %v2887_v18  ;;  %v8501_v58 = vrot.slane %v3090_v53, %v10170_v29  ;;  %v3136_v62 = vmul.f32 %v8494_v33, %v7984_v61 }
 0x3ae   :  { %v3091_v12 = vmul.f32 %v6184_v10, %v3085_v38  ;;  %v3139_v16 = vmul.f32 %v8494_v33, %v7988_v59  ;;  %v3142_v1 = vmul.f32 %v8494_v33, %v8044_v30  ;;  %v3145_v25 = vmul.f32 %v8494_v33, %v8055_v35  ;;  %v10283_v10 = vld [vmem:[#allocation61_spill] sm:$0xff] }
 0x3af   :  { %10272 = vst [vmem:[#allocation21_spill] sm:$0xff] %v8498_v63  ;;  %v3099_v28 = vcombine.low %v3093_v2, %v3094_v44  ;;  %v8513_v5 = vmul.f32 %v8501_v58, %v8474_v31  ;;  %v3137_v18 = vmul.f32 %v8501_v58, %v7986_v37  ;;  %v3140_v61 = vmul.f32 %v8501_v58, %v7996_v41  ;;  %v10276_v31 = vld [vmem:[#allocation31_spill] sm:$0xff]  ;;  %v10284_v44 = vld [vmem:[#allocation65_spill] sm:$0xff] }
 0x3b0   :  { %v3095_v3 = vmul.f32 %v3091_v12, %v2888_v57  ;;  %v8520_v59 = vrot.slane %v3091_v12, %v10170_v29  ;;  %v3143_v30 = vmul.f32 %v8501_v58, %v8049_v45  ;;  %v3146_v35 = vmul.f32 %v8501_v58, %v8059_v19  ;;  %v10280_v45 = vld [vmem:[#allocation49_spill] sm:$0xff]  ;;  %v10282_v2 = vld [vmem:[#allocation51_spill] sm:$0xff] }
 0x3b1   :  { %10273 = vst [vmem:[#allocation26_spill] sm:$0xff] %v8513_v5  ;;  %v3106_v24 = vrot.slane %v3099_v28, %v10275_v60  ;;  %v3149_v9 = vmul.f32 %v8501_v58, %v10276_v31  ;;  %v3152_v37 = vmul.f32 %v8501_v58, %v10277_v22  ;;  %v3148_v41 = vmul.f32 %v8494_v33, %v10278_v11  ;;  %v6123_v63 = vld [vmem:[#allocation5 + $0x100] ss:$8 sps:$4 sm:$0xff]  }
 0x3b2   :  { %10274 = vst [vmem:[#allocation30_spill] sm:$0xff] %v8520_v59  ;;  %v3113_v57 = vrot.slane %v3095_v3, %v10275_v60  ;;  %v3151_v0 = vmul.f32 %v8494_v33, %v10279_v13  ;;  %v3155_v32 = vmul.f32 %v8501_v58, %v10280_v45  ;;  %v3158_v19 = vmul.f32 %v8501_v58, %v8134_v42 }
 0x3b3   :  { %v3154_v48 = vmul.f32 %v8494_v33, %v10281_v50  ;;  %v3157_v27 = vmul.f32 %v8494_v33, %v8131_v43  ;;  %v3161_v49 = vmul.f32 %v8501_v58, %v8157_v6  ;;  %v3164_v21 = vmul.f32 %v8501_v58, %v8174_v47  ;;  %v3092_v43 = vld [vmem:[%s9867_s1 + $0x12] sm:$0x7]  ;;  %v10285_v47 = vld [vmem:[#allocation59_spill] sm:$0xff] }
 0x3b4   :  { %v3114_v38 = vcombine.low %v3106_v24, %v3113_v57  ;;  %v8550_v53 = vmul.f32 %v8494_v33, %v10282_v2  ;;  %v8554_v42 = vmul.f32 %v8494_v33, %v10283_v10  ;;  %v8558_v12 = vmul.f32 %v8501_v58, %v10284_v44  ;;  %v10286_v24 = vld [vmem:[#allocation73_spill] sm:$0xff]  ;;  %v10288_v50 = vld [vmem:[#allocation75_spill] sm:$0xff]  ;;  %v10289_v44 = vld [vmem:[#allocation92_spill] sm:$0xff] }
 0x3b5   :  { %v8565_v6 = vmul.f32 %v8501_v58, %v8219_v40  ;;  %v8569_v28 = vmul.f32 %v8494_v33, %v10285_v47  ;;  %v8573_v3 = vmul.f32 %v8494_v33, %v8216_v4  ;;  %v8577_v31 = vmul.f32 %v8501_v58, %v10286_v24  ;;  %v10287_v40 = vld [vmem:[#allocation67_spill] sm:$0xff]  ;;  %v10291_v47 = vld [vmem:[#allocation89_spill] sm:$0xff] }
 0x3b6   :  { %v3121_v22 = vrot.slane %v3114_v38, %v10275_v60  ;;  %v8582_v11 = vmul.f32 %v8501_v58, %v8259_v14  ;;  %v8586_v57 = vmul.f32 %v8494_v33, %v10287_v40  ;;  %v8590_v13 = vmul.f32 %v8494_v33, %v8257_v17 }
 0x3b7   :  { %v8594_v4 = vmul.f32 %v8501_v58, %v8288_v20  ;;  %v8598_v45 = vmul.f32 %v8501_v58, %v8303_v52  ;;  %v8602_v14 = vmul.f32 %v8494_v33, %v10288_v50  ;;  %v8606_v38 = vmul.f32 %v8494_v33, %v8301_v55  ;;  %v10294_v50 = vld [vmem:[#allocation22_spill] sm:$0xff] }
 0x3b8   :  { %v3123_v2 = vsub.f32 %v3092_v43, %v3121_v22  ;;  %v8610_v17 = vmul.f32 %v8501_v58, %v8324_v23  ;;  %v8614_v20 = vmul.f32 %v8501_v58, %v8345_v54  ;;  %v8618_v52 = vmul.f32 %v8494_v33, %v8322_v39  ;;  %v10290_v43 = vld [vmem:[#allocation106_spill] sm:$0xff]  ;;  %v10293_v22 = vld [vmem:[#allocation104_spill] sm:$0xff] }
 0x3b9   :  { %v8622_v10 = vmul.f32 %v8494_v33, %v8336_v26  ;;  %v8626_v55 = vmul.f32 %v8501_v58, %v10289_v44  ;;  %v8630_v23 = vmul.f32 %v8501_v58, %v10290_v43  ;;  %v8634_v54 = vmul.f32 %v8494_v33, %v10291_v47  ;;  %v10295_v47 = vld [vmem:[#allocation18_spill] sm:$0xff] }
 0x3ba   :  { %v8637_v24 = vrot.slane %v3123_v2, %v10170_v29  ;;  %v8640_v39 = vrot.slane %v3123_v2, %v10226_v7  ;;  %v8643_v26 = vrot.slane %v3123_v2, %v10175_v51  ;;  %v8647_v40 = vmul.f32 %v8494_v33, %v10293_v22 }
 0x3bb   :  { %v8651_v44 = vmul.f32 %v8501_v58, %v10294_v50  ;;  %v8655_v43 = vmul.f32 %v8501_v58, %v8414_v8  ;;  %v8659_v60 = vmul.f32 %v8494_v33, %v10295_v47  ;;  %v8663_v51 = vmul.f32 %v8494_v33, %v8412_v46 }
 0x3bc   :  { %10292 = vst [vmem:[#allocation24_spill] sm:$0xff] %v8643_v26  ;;  %v3228_v2 = vadd.f32 %v8640_v39, %v3137_v18  ;;  %v3231_v22 = vadd.f32 %v8640_v39, %v3140_v61  ;;  %v3227_v7 = vadd.f32 %v8637_v24, %v3136_v62  ;;  %v3230_v50 = vadd.f32 %v8637_v24, %v3139_v16  ;;  %v6128_v62 = vld [vmem:[#allocation5 + $0x114] ss:$8 sps:$4 sm:$0xff]  }
 0x3bd   :  { %v3234_v29 = vadd.f32 %v8640_v39, %v3143_v30  ;;  %v3237_v8 = vadd.f32 %v8640_v39, %v3146_v35  ;;  %v3233_v26 = vadd.f32 %v8637_v24, %v3142_v1  ;;  %v3236_v47 = vadd.f32 %v8637_v24, %v3145_v25 }
 0x3be   :  { %v3303_v59 = vpack.c.bf16 %v3231_v22, %v3228_v2  ;;  %v3302_v46 = vpack.c.bf16 %v3230_v50, %v3227_v7  ;;  %v3240_v5 = vadd.f32 %v8640_v39, %v3149_v9  ;;  %v3243_v18 = vadd.f32 %v8640_v39, %v3152_v37 }
 0x3bf   :  { %v3306_v61 = vpack.c.bf16 %v3237_v8, %v3234_v29  ;;  %v3305_v36 = vpack.c.bf16 %v3236_v47, %v3233_v26  ;;  %v8676_v16 = vadd.f32 %v8637_v24, %v3148_v41  ;;  %v8679_v30 = vadd.f32 %v8637_v24, %v3151_v0  ;;  %v10311_v8 = vld [vmem:[#allocation69_spill] sm:$0xff] }
 0x3c0   :  { %3673 = vmatprep.mubr.bf16.mxu0 %v3303_v59  ;;  %v3309_v1 = vpack.c.bf16 %v3243_v18, %v3240_v5  ;;  %v8682_v25 = vadd.f32 %v8640_v39, %v3155_v32  ;;  %v8685_v7 = vadd.f32 %v8640_v39, %v3158_v19  ;;  %v8688_v35 = vadd.f32 %v8637_v24, %v3154_v48  ;;  %v6126_v59 = vld [vmem:[#allocation5 + $0x110] ss:$8 sps:$4 sm:$0xff]   ;;  %v6131_v48 = vld [vmem:[#allocation5 + $0x124] ss:$8 sps:$4 sm:$0xff]  }
 0x3c1   :  { %3674 = vmatmul.mubr.bf16.vlgmr.msra.gmra.mrb[104].mxu0 %v3302_v46  ;;  %v3308_v29 = vpack.c.bf16 %v8679_v30, %v8676_v16  ;;  %v8693_v9 = vadd.f32 %v8637_v24, %v3157_v27  ;;  %v8696_v37 = vadd.f32 %v8640_v39, %v3161_v49  ;;  %v8699_v5 = vadd.f32 %v8640_v39, %v3164_v21 }
 0x3c2   :  { %3803 = vmatpush1.bf16.msra.mxu0 %v6123_v63  ;;  %3683 = vmatprep.mubr.bf16.mxu0 %v3306_v61  ;;  %v3312_v41 = vpack.c.bf16 %v8685_v7, %v8682_v25  ;;  %v8705_v0 = vadd.f32 %v8637_v24, %v8550_v53  ;;  %v8709_v32 = vadd.f32 %v8637_v24, %v8554_v42  ;;  %v10307_v25 = vld [vmem:[#allocation53_spill] sm:$0xff] }
 0x3c3   :  { %3804 = vmatprep.subr.bf16.mxu0 %v6128_v62  ;;  %v3311_v19 = vpack.c.bf16 %v8693_v9, %v8688_v35  ;;  %v8717_v27 = vadd.f32 %v8640_v39, %v8558_v12  ;;  %v8721_v49 = vadd.f32 %v8640_v39, %v8565_v6  ;;  %v8727_v53 = vadd.f32 %v8637_v24, %v8569_v28  ;;  %v10316_v12 = vld [vmem:[#allocation71_spill] sm:$0xff]  ;;  %v10318_v63 = vld [vmem:[#allocation85_spill] sm:$0xff] }
 0x3c4   :  { %v8731_v42 = vadd.f32 %v8637_v24, %v8573_v3  ;;  %v8735_v26 = vadd.f32 %v8640_v39, %v8577_v31  ;;  %v8741_v6 = vadd.f32 %v8640_v39, %v8582_v11  ;;  %v8745_v2 = vadd.f32 %v8637_v24, %v8586_v57  ;;  %v6129_v3 = vld [vmem:[#allocation5 + $0x120] ss:$8 sps:$4 sm:$0xff]  }
 0x3c5   :  { %v8749_v28 = vadd.f32 %v8637_v24, %v8590_v13  ;;  %v8755_v22 = vadd.f32 %v8640_v39, %v8594_v4  ;;  %v8759_v11 = vadd.f32 %v8640_v39, %v8598_v45  ;;  %v8763_v57 = vadd.f32 %v8637_v24, %v8602_v14  ;;  %v6134_v13 = vld [vmem:[#allocation5 + $0x134] ss:$8 sps:$4 sm:$0xff]  }
 0x3c6   :  { %3805 = vmatpush1.bf16.msra.mxu0 %v6126_v59  ;;  %v8771_v4 = vadd.f32 %v8637_v24, %v8606_v38  ;;  %v8775_v45 = vadd.f32 %v8640_v39, %v8610_v17  ;;  %v8781_v47 = vadd.f32 %v8640_v39, %v8614_v20  ;;  %v8785_v46 = vadd.f32 %v8637_v24, %v8618_v52  ;;  %v10302_v38 = vld [vmem:[#allocation27_spill] sm:$0xff] }
 0x3c7   :  { %3806 = vmatprep.subr.bf16.mxu0 %v6131_v48  ;;  %v8789_v18 = vadd.f32 %v8637_v24, %v8622_v10  ;;  %v8795_v17 = vadd.f32 %v8640_v39, %v8626_v55  ;;  %v8799_v20 = vadd.f32 %v8640_v39, %v8630_v23  ;;  %v8803_v52 = vadd.f32 %v8637_v24, %v8634_v54  ;;  %v6132_v10 = vld [vmem:[#allocation5 + $0x130] ss:$8 sps:$4 sm:$0xff]   ;;  %v6137_v23 = vld [vmem:[#allocation5 + $0x144] ss:$8 sps:$4 sm:$0xff]  }
 0x3c8   :  { %v8811_v55 = vadd.f32 %v8637_v24, %v8647_v40  ;;  %v8817_v54 = vadd.f32 %v8640_v39, %v8651_v44  ;;  %v8825_v59 = vadd.f32 %v8637_v24, %v8659_v60  ;;  %v8831_v48 = vadd.f32 %v8637_v24, %v8663_v51  ;;  %v10297_v40 = vld [vmem:[#allocation26_spill] sm:$0xff] }
 0x3c9   :  { %3684 = vmatmul.mubr.bf16.gmra.mrb[108].mxu0 %v3305_v36  ;;  %v3206_v44 = vmul.f32 %v8501_v58, %v8450_v56  ;;  %v3202_v60 = vmul.f32 %v8494_v33, %v8426_v15  ;;  %v8845_v61 = vadd.f32 %v8640_v39, %v10297_v40  ;;  %v6135_v51 = vld [vmem:[#allocation5 + $0x140] ss:$8 sps:$4 sm:$0xff]  }
 0x3ca   :  { %3693 = vmatprep.mubr.bf16.mxu0 %v3309_v1  ;;  %3807 = vmatpush1.bf16.msra.mxu0 %v6129_v3  ;;  %v8821_v1 = vadd.f32 %v8640_v39, %v8655_v43  ;;  %v3203_v3 = vmul.f32 %v8501_v58, %v8435_v34  ;;  %v10298_v43 = vld [vmem:[#allocation21_spill] sm:$0xff]  ;;  %v10300_v34 = vld [vmem:[#allocation30_spill] sm:$0xff] }
 0x3cb   :  { %3808 = vmatprep.subr.bf16.mxu0 %v6134_v13  ;;  %v10296_v13 = vld [vmem:[#allocation20_spill] sm:$0xff]  ;;  %v8853_v58 = vadd.f32 %v8640_v39, %v3206_v44  ;;  %v8857_v15 = vadd.f32 %v8637_v24, %v10298_v43  ;;  %v8860_v40 = vadd.f32 %v8637_v24, %v3202_v60  ;;  %v3144_v43 = vmul.f32 %v10300_v34, %v10302_v38  ;;  %v10304_v60 = vld [vmem:[#allocation33_spill] sm:$0xff] }
 0x3cc   :  { %v3205_v62 = vmul.f32 %v8494_v33, %v10296_v13  ;;  %v8850_v56 = vadd.f32 %v8640_v39, %v3203_v3  ;;  %v6140_v33 = vld [vmem:[#allocation5 + $0x154] ss:$8 sps:$4 sm:$0xff]   ;;  %v6138_v38 = vld [vmem:[#allocation5 + $0x150] ss:$8 sps:$4 sm:$0xff]   ;;  %v3156_v7 = vmul.f32 %v10300_v34, %v10307_v25  ;;  %v3183_v31 = vmul.f32 %v10300_v34, %v10318_v63 }
 0x3cd   :  { %v10299_v13 = vld [vmem:[#allocation25_spill] sm:$0xff] }
 0x3ce   :  { %3809 = vmatpush1.bf16.msra.mxu0 %v6132_v10  ;;  %v8863_v10 = vadd.f32 %v8637_v24, %v3205_v62  ;;  %v3138_v36 = vmul.f32 %v10300_v34, %v10299_v13  ;;  %v10301_v39 = vld [vmem:[#allocation29_spill] sm:$0xff]  ;;  %v3147_v13 = vmul.f32 %v10300_v34, %v10304_v60 }
 0x3cf   :  { %3810 = vmatprep.subr.bf16.mxu0 %v6137_v23  ;;  %v3141_v44 = vmul.f32 %v10300_v34, %v10301_v39  ;;  %v10303_v23 = vld [vmem:[#allocation24_spill] sm:$0xff]  ;;  %v10305_v3 = vld [vmem:[#allocation41_spill] sm:$0xff]  ;;  %v6143_v39 = vld [vmem:[#allocation5 + $0x164] ss:$8 sps:$4 sm:$0xff]  }
 0x3d0   :  { %v8879_v62 = vadd.f32 %v10303_v23, %v3138_v36  ;;  %v3150_v14 = vmul.f32 %v10300_v34, %v10305_v3  ;;  %v8892_v30 = vadd.f32 %v10303_v23, %v3144_v43  ;;  %v8897_v60 = vadd.f32 %v10303_v23, %v3147_v13  ;;  %v10310_v13 = vld [vmem:[#allocation55_spill] sm:$0xff]  ;;  %v6144_v63 = vld [vmem:[#allocation5 + $0x170] ss:$8 sps:$4 sm:$0xff]  }
 0x3d1   :  { %3694 = vmatmul.mubr.bf16.gmra.mrb[112].mxu0 %v3308_v29  ;;  %v8889_v16 = vadd.f32 %v10303_v23, %v3141_v44  ;;  %v10306_v29 = vld [vmem:[#allocation39_spill] sm:$0xff]  ;;  %v3165_v24 = vmul.f32 %v10300_v34, %v10310_v13  ;;  %v8918_v25 = vadd.f32 %v10303_v23, %v3156_v7  ;;  %v3168_v44 = vmul.f32 %v10300_v34, %v10311_v8 }
 0x3d2   :  { %3703 = vmatprep.mubr.bf16.mxu0 %v3312_v41  ;;  %3811 = vmatpush1.bf16.msra.mxu0 %v6135_v51  ;;  %v3153_v36 = vmul.f32 %v10300_v34, %v10306_v29  ;;  %v8900_v3 = vadd.f32 %v10303_v23, %v3150_v14  ;;  %v10308_v41 = vld [vmem:[#allocation47_spill] sm:$0xff] }
 0x3d3   :  { %3812 = vmatprep.subr.bf16.mxu0 %v6140_v33  ;;  %v3159_v51 = vmul.f32 %v10300_v34, %v10308_v41  ;;  %v10309_v33 = vld [vmem:[#allocation57_spill] sm:$0xff]  ;;  %v8931_v13 = vadd.f32 %v10303_v23, %v3165_v24  ;;  %v10314_v14 = vld [vmem:[#allocation63_spill] sm:$0xff]  ;;  %v8938_v8 = vadd.f32 %v10303_v23, %v3168_v44 }
 0x3d4   :  { %v8909_v43 = vadd.f32 %v10303_v23, %v3153_v36  ;;  %v3162_v29 = vmul.f32 %v10300_v34, %v10309_v33  ;;  %v6141_v36 = vld [vmem:[#allocation5 + $0x160] ss:$8 sps:$4 sm:$0xff]   ;;  %v3171_v7 = vmul.f32 %v10300_v34, %v10314_v14 }
 0x3d5   :  { %v8921_v41 = vadd.f32 %v10303_v23, %v3159_v51  ;;  %10313 = vst [vmem:[#allocation34_spill] sm:$0xff] %v8931_v13  ;;  %v6146_v51 = vld [vmem:[#allocation5 + $0x174] ss:$8 sps:$4 sm:$0xff]   ;;  %v10320_v24 = vld [vmem:[#allocation83_spill] sm:$0xff] }
 0x3d6   :  { %3813 = vmatpush1.bf16.msra.mxu0 %v6138_v38  ;;  %v8928_v50 = vadd.f32 %v10303_v23, %v3162_v29  ;;  %v10315_v38 = vld [vmem:[#allocation77_spill] sm:$0xff]  ;;  %v3177_v29 = vmul.f32 %v10300_v34, %v10316_v12  ;;  %v8947_v21 = vadd.f32 %v10303_v23, %v3171_v7 }
 0x3d7   :  { %3814 = vmatprep.subr.bf16.mxu0 %v6143_v39  ;;  %v3174_v33 = vmul.f32 %v10300_v34, %v10315_v38  ;;  %v10317_v39 = vld [vmem:[#allocation81_spill] sm:$0xff]  ;;  %v10319_v38 = vld [vmem:[#allocation79_spill] sm:$0xff] }
 0x3d8   :  { %10312 = vst [vmem:[#allocation28_spill] sm:$0xff] %v8928_v50  ;;  %v3180_v14 = vmul.f32 %v10300_v34, %v10317_v39  ;;  %v8960_v12 = vadd.f32 %v10303_v23, %v3177_v29  ;;  %v3186_v7 = vmul.f32 %v10300_v34, %v10319_v38  ;;  %v3189_v50 = vmul.f32 %v10300_v34, %v10320_v24  ;;  %v10322_v38 = vld [vmem:[#allocation107_spill] sm:$0xff] }
 0x3d9   :  { %3704 = vmatmul.mubr.bf16.gmra.mrb[116].mxu0 %v3311_v19  ;;  %v8957_v44 = vadd.f32 %v10303_v23, %v3174_v33  ;;  %v10321_v39 = vpack.c.bf16 %v8699_v5, %v8696_v37  ;;  %v3319_v35 = vpack.c.bf16 %v8947_v21, %v8938_v8  ;;  %v3274_v19 = vadd.f32 %v10303_v23, %v3183_v31  ;;  %v10324_v21 = vld [vmem:[#allocation16_spill] sm:$0xff] }
 0x3da   :  { %3815 = vmatpush1.bf16.msra.mxu0 %v6141_v36  ;;  %v3271_v9 = vadd.f32 %v10303_v23, %v3180_v14  ;;  %v3277_v29 = vadd.f32 %v10303_v23, %v3186_v7  ;;  %v3280_v24 = vadd.f32 %v10303_v23, %v3189_v50  ;;  %v3192_v37 = vmul.f32 %v10300_v34, %v10322_v38  ;;  %v10323_v36 = vld [vmem:[#allocation103_spill] sm:$0xff]  ;;  %v10325_v14 = vld [vmem:[#allocation102_spill] sm:$0xff] }
 0x3db   :  { %3713 = vmatprep.mubr.bf16.mxu0 %v10321_v39  ;;  %3816 = vmatprep.subr.bf16.mxu0 %v6146_v51  ;;  %v3322_v33 = vpack.c.bf16 %v8960_v12, %v8957_v44  ;;  %v3195_v39 = vmul.f32 %v10300_v34, %v10323_v36  ;;  %v3198_v8 = vmul.f32 %v10300_v34, %v10324_v21  ;;  %v10326_v12 = vld [vmem:[#allocation101_spill] sm:$0xff]  ;;  %v10327_v50 = vld [vmem:[#allocation23_spill] sm:$0xff] }
 0x3dc   :  { %v3325_v5 = vpack.c.bf16 %v3274_v19, %v3271_v9  ;;  %v3201_v31 = vmul.f32 %v10300_v34, %v10325_v14  ;;  %v3328_v51 = vpack.c.bf16 %v3280_v24, %v3277_v29  ;;  %v3283_v44 = vadd.f32 %v10303_v23, %v3192_v37  ;;  %v10328_v36 = vld [vmem:[#allocation19_spill] sm:$0xff] }
 0x3dd   :  { %v3204_v7 = vmul.f32 %v10300_v34, %v10326_v12  ;;  %v3207_v13 = vmul.f32 %v10300_v34, %v10327_v50  ;;  %v3286_v9 = vadd.f32 %v10303_v23, %v3195_v39  ;;  %v3289_v19 = vadd.f32 %v10303_v23, %v3198_v8  ;;  %v10353_v50 = vld [vmem:[#allocation17_spill] sm:$0xff] }
 0x3de   :  { %3817 = vmatpush1.bf16.msra.mxu0 %v6144_v63  ;;  %v3292_v38 = vadd.f32 %v10303_v23, %v3201_v31  ;;  %v3210_v21 = vmul.f32 %v10300_v34, %v10328_v36  ;;  %v10329_v63 = vpack.c.bf16 %v8709_v32, %v8705_v0  ;;  %v10330_v8 = vpack.c.bf16 %v8721_v49, %v8717_v27 }
 0x3df   :  { %v3295_v29 = vadd.f32 %v10303_v23, %v3204_v7  ;;  %v3298_v24 = vadd.f32 %v10303_v23, %v3207_v13  ;;  %v3331_v37 = vpack.c.bf16 %v3286_v9, %v3283_v44  ;;  %v10331_v34 = vpack.c.bf16 %v8731_v42, %v8727_v53  ;;  %v6156_v44 = vld [vmem:[#allocation7 + $0x20] sm:$0xff]   ;;  %v6157_v7 = vld [vmem:[#allocation7 + $0x68] sm:$0xff]  }
 0x3e0   :  { %v3334_v14 = vpack.c.bf16 %v3292_v38, %v3289_v19  ;;  %v3301_v12 = vadd.f32 %v10303_v23, %v3210_v21  ;;  %v10332_v13 = vpack.c.bf16 %v8741_v6, %v8735_v26  ;;  %v10333_v23 = vpack.c.bf16 %v8749_v28, %v8745_v2  ;;  %v6158_v21 = vld [vmem:[#allocation7 + $0x28] sm:$0xff]  }
 0x3e1   :  { %3714 = vmatmul.mubr.bf16.gmra.mrb[120].mxu0 %v10329_v63  ;;  %v3337_v39 = vpack.c.bf16 %v3298_v24, %v3295_v29  ;;  %v10334_v0 = vpack.c.bf16 %v8759_v11, %v8755_v22  ;;  %v10335_v32 = vpack.c.bf16 %v8771_v4, %v8763_v57  ;;  %v10336_v27 = vpack.c.bf16 %v8781_v47, %v8775_v45 }
 0x3e2   :  { %3723 = vmatprep.mubr.bf16.mxu0 %v10330_v8  ;;  %v10337_v49 = vpack.c.bf16 %v8789_v18, %v8785_v46  ;;  %v10338_v53 = vpack.c.bf16 %v8799_v20, %v8795_v17  ;;  %v10339_v42 = vpack.c.bf16 %v8811_v55, %v8803_v52  ;;  %v10340_v26 = vpack.c.bf16 %v8821_v1, %v8817_v54  ;;  %v10349_v18 = vld [vmem:[#allocation34_spill] sm:$0xff]  ;;  %v10350_v17 = vld [vmem:[#allocation28_spill] sm:$0xff]  ;;  %v6149_v54 = vld [vmem:[#allocation7 + $0x48] sm:$0xff]  }
 0x3e3   :  { %v10341_v6 = vpack.c.bf16 %v8831_v48, %v8825_v59  ;;  %v10342_v2 = vpack.c.bf16 %v8853_v58, %v8850_v56  ;;  %v3339_v28 = vpack.c.bf16 %v8845_v61, %v8845_v61  ;;  %v10343_v22 = vpack.c.bf16 %v8863_v10, %v8860_v40  ;;  %v6147_v61 = vld [vmem:[#allocation7 + $0x40] sm:$0xff]   ;;  %v6150_v1 = vld [vmem:[#allocation7 + $0x8] sm:$0xff]   ;;  %v6151_v59 = vld [vmem:[#allocation7 + $0x50] sm:$0xff]  }
 0x3e4   :  { %v3338_v11 = vpack.c.bf16 %v8857_v15, %v8857_v15  ;;  %v10344_v57 = vmov 0   ;;  %v10345_v4 = vpack.c.bf16 %v8889_v16, %v8879_v62  ;;  %v10346_v45 = vpack.c.bf16 %v8897_v60, %v8892_v30  ;;  %v6148_v55 = vld [vmem:[#allocation7] sm:$0xff]   ;;  %5508 = vmatprep.subr.bf16.mxu1 %v6147_v61  ;;  %v6152_v48 = vld [vmem:[#allocation7 + $0x10] sm:$0xff]   ;;  %v6153_v56 = vld [vmem:[#allocation7 + $0x58] sm:$0xff]  }
 0x3e5   :  { %v10347_v47 = vpack.c.bf16 %v8909_v43, %v8900_v3  ;;  %v10348_v46 = vpack.c.bf16 %v8921_v41, %v8918_v25  ;;  %v10351_v20 = vpack.c.bf16 %v10349_v18, %v10350_v17  ;;  %v3340_v52 = vpack.c.bf16 %v3301_v12, %v3301_v12  ;;  %5509 = vmatpush3.bf16.msra.mxu1 %v6148_v55  ;;  %v6154_v58 = vld [vmem:[#allocation7 + $0x18] sm:$0xff]   ;;  %v3389_v41 = vld [vmem:[%s9867_s1 + $0x15] sm:$0x3] }
 0x3e6   :  { %5510 = vmatprep.subr.bf16.mxu1 %v6149_v54  ;;  %v9082_v9 = vrot.slane %v3389_v41, %v10353_v50 }
 0x3e9   :  { %3724 = vmatmul.mubr.bf16.gmra.mrb[124].mxu0 %v10331_v34  ;;  %5511 = vmatpush3.bf16.msra.mxu1 %v6150_v1 }
 0x3ea   :  { %3733 = vmatprep.mubr.bf16.mxu0 %v10332_v13  ;;  %5512 = vmatprep.subr.bf16.mxu1 %v6151_v59 }
 0x3ed   :  { %5513 = vmatpush3.bf16.msra.mxu1 %v6152_v48 }
 0x3ee   :  { %5514 = vmatprep.subr.bf16.mxu1 %v6153_v56 }
 0x3f1   :  { %3734 = vmatmul.mubr.bf16.gmra.mrb[128].mxu0 %v10333_v23  ;;  %5515 = vmatpush3.bf16.msra.mxu1 %v6154_v58  ;;  %v6160_v23 = vld [vmem:[#allocation7 + $0x30] sm:$0xff]  }
 0x3f2   :  { %3743 = vmatprep.mubr.bf16.mxu0 %v10334_v0 }
 0x3f9   :  { %3744 = vmatmul.mubr.bf16.gmra.mrb[132].mxu0 %v10335_v32 }
 0x3fa   :  { %3753 = vmatprep.mubr.bf16.mxu0 %v10336_v27 }
 0x401   :  { %3754 = vmatmul.mubr.bf16.gmra.mrb[136].mxu0 %v10337_v49  ;;  %v6161_v49 = vld [vmem:[#allocation7 + $0x78] sm:$0xff]  }
 0x402   :  { %3763 = vmatprep.mubr.bf16.mxu0 %v10338_v53 }
 0x409   :  { %3764 = vmatmul.mubr.bf16.gmra.mrb[140].mxu0 %v10339_v42 }
 0x40a   :  { %3773 = vmatprep.mubr.bf16.mxu0 %v10340_v26 }
 0x411   :  { %3774 = vmatmul.mubr.bf16.gmra.mrb[144].mxu0 %v10341_v6 }
 0x412   :  { %3783 = vmatprep.mubr.bf16.mxu0 %v10342_v2 }
 0x419   :  { %3784 = vmatmul.mubr.bf16.gmra.mrb[148].mxu0 %v10343_v22 }
 0x41a   :  { %3793 = vmatprep.mubr.bf16.mxu0 %v3339_v28 }
 0x421   :  { %3794 = vmatmul.mubr.bf16.gmra.mrb[152].mxu0 %v3338_v11 }
 0x422   :  { %3834 = vmatprep.mubr.bf16.mxu0 %v10344_v57 }
 0x429   :  { %3835 = vmatmul.mubr.bf16.vlgmr.msra.gmra.mrb[104].mxu0 %v10345_v4 }
 0x42a   :  { %3844 = vmatprep.mubr.bf16.mxu0 %v10344_v57 }
 0x431   :  { %3845 = vmatmul.mubr.bf16.gmra.mrb[108].mxu0 %v10346_v45 }
 0x432   :  { %3854 = vmatprep.mubr.bf16.mxu0 %v10344_v57 }
 0x439   :  { %3855 = vmatmul.mubr.bf16.gmra.mrb[112].mxu0 %v10347_v47 }
 0x43a   :  { %3864 = vmatprep.mubr.bf16.mxu0 %v10344_v57 }
 0x441   :  { %3865 = vmatmul.mubr.bf16.gmra.mrb[116].mxu0 %v10348_v46 }
 0x442   :  { %3874 = vmatprep.mubr.bf16.mxu0 %v10344_v57 }
 0x449   :  { %3875 = vmatmul.mubr.bf16.gmra.mrb[120].mxu0 %v10351_v20 }
 0x44a   :  { %3884 = vmatprep.mubr.bf16.mxu0 %v10344_v57 }
 0x451   :  { %3885 = vmatmul.mubr.bf16.gmra.mrb[124].mxu0 %v3319_v35 }
 0x452   :  { %3894 = vmatprep.mubr.bf16.mxu0 %v10344_v57 }
 0x459   :  { %3895 = vmatmul.mubr.bf16.gmra.mrb[128].mxu0 %v3322_v33 }
 0x45a   :  { %3904 = vmatprep.mubr.bf16.mxu0 %v10344_v57 }
 0x461   :  { %3905 = vmatmul.mubr.bf16.gmra.mrb[132].mxu0 %v3325_v5  ;;  %v10352_v5 = vld [vmem:[#allocation15_spill] sm:$0xff] }
 0x462   :  { %3914 = vmatprep.mubr.bf16.mxu0 %v10344_v57  ;;  %v9079_v31 = vrot.slane %v3389_v41, %v10352_v5 }
 0x469   :  { %3915 = vmatmul.mubr.bf16.gmra.mrb[136].mxu0 %v3328_v51  ;;  %v6155_v51 = vld [vmem:[#allocation7 + $0x60] sm:$0xff]  }
 0x46a   :  { %3924 = vmatprep.mubr.bf16.mxu0 %v10344_v57  ;;  %5516 = vmatprep.subr.bf16.mxu1 %v6155_v51 }
 0x46b   :  { %5517 = vmatpush3.bf16.msra.mxu1 %v6156_v44 }
 0x46c   :  { %5518 = vmatprep.subr.bf16.mxu1 %v6157_v7 }
 0x46f   :  { %5519 = vmatpush3.bf16.msra.mxu1 %v6158_v21 }
 0x471   :  { %3925 = vmatmul.mubr.bf16.gmra.mrb[140].mxu0 %v3331_v37 }
 0x472   :  { %3934 = vmatprep.mubr.bf16.mxu0 %v10344_v57 }
 0x479   :  { %3935 = vmatmul.mubr.bf16.gmra.mrb[144].mxu0 %v3334_v14  ;;  %v6159_v14 = vld [vmem:[#allocation7 + $0x70] sm:$0xff]  }
 0x47a   :  { %3944 = vmatprep.mubr.bf16.mxu0 %v10344_v57  ;;  %5520 = vmatprep.subr.bf16.mxu1 %v6159_v14 }
 0x47b   :  { %5521 = vmatpush3.bf16.msra.mxu1 %v6160_v23 }
 0x47c   :  { %5522 = vmatprep.subr.bf16.mxu1 %v6161_v49 }
 0x481   :  { %3945 = vmatmul.mubr.bf16.gmra.mrb[148].mxu0 %v3337_v39 }
 0x482   :  { %3954 = vmatprep.mubr.bf16.mxu0 %v10344_v57  ;;  %v6162_v57 = vld [vmem:[#allocation7 + $0x38] sm:$0xff]  }
 0x483   :  { %5523 = vmatpush3.bf16.msra.mxu1 %v6162_v57 }
 0x489   :  { %3955 = vmatmul.mubr.bf16.gmra.mrb[152].mxu0 %v3340_v52 }
 0x4fc   :  { %v3836_v15 = vpop.f32.mrb[104].mxu0 }
 0x4fd   :  { %v3838_v40 = vpop.f32.mrb[105].mxu0  ;;  %v5741_v29 = vadd.f32 %v3836_v15, %v9079_v31 }
 0x4fe   :  { %v3840_v10 = vpop.f32.mrb[106].mxu0  ;;  %v5742_v12 = vadd.f32 %v3838_v40, %v9082_v9 }
 0x4ff   :  { %v3842_v62 = vpop.f32.mrb[107].mxu0  ;;  %v5743_v19 = vadd.f32 %v3840_v10, %v9079_v31  ;;  %v9094_v0 = vmax.f32 %v5741_v29, 0.0 }
 0x500   :  { %v5744_v38 = vadd.f32 %v3842_v62, %v9082_v9  ;;  %v9099_v53 = vmax.f32 %v5742_v12, 0.0 }
 0x501   :  { %v9090_v8 = vmax.f32 %v5743_v19, 0.0  ;;  %v4075_v4 = vmul.f32 %v9094_v0, %v9094_v0 }
 0x502   :  { %v9092_v13 = vmax.f32 %v5744_v38, 0.0  ;;  %v4076_v17 = vmul.f32 %v9099_v53, %v9099_v53 }
 0x503   :  { %v4077_v6 = vmul.f32 %v9090_v8, %v9090_v8  ;;  %v4013_v45 = vadd.f32 %v9090_v8, %v9094_v0 }
 0x504   :  { %v3846_v16 = vpop.f32.mrb[108].mxu0  ;;  %v4078_v28 = vmul.f32 %v9092_v13, %v9092_v13  ;;  %v4043_v20 = vadd.f32 %v9092_v13, %v9099_v53 }
 0x505   :  { %v3848_v30 = vpop.f32.mrb[109].mxu0  ;;  %v5745_v24 = vadd.f32 %v3846_v16, %v9079_v31  ;;  %v4125_v54 = vadd.f32 %v4077_v6, %v4075_v4 }
 0x506   :  { %v3850_v60 = vpop.f32.mrb[110].mxu0  ;;  %v5746_v63 = vadd.f32 %v3848_v30, %v9082_v9  ;;  %v4155_v58 = vadd.f32 %v4078_v28, %v4076_v17 }
 0x507   :  { %v3852_v3 = vpop.f32.mrb[111].mxu0  ;;  %v9096_v32 = vmax.f32 %v5745_v24, 0.0  ;;  %v5747_v27 = vadd.f32 %v3850_v60, %v9079_v31 }
 0x508   :  { %v9101_v42 = vmax.f32 %v5746_v63, 0.0  ;;  %v5748_v26 = vadd.f32 %v3852_v3, %v9082_v9 }
 0x509   :  { %v4079_v47 = vmul.f32 %v9096_v32, %v9096_v32  ;;  %v9116_v46 = vmax.f32 %v5747_v27, 0.0  ;;  %v4014_v1 = vadd.f32 %v4013_v45, %v9096_v32 }
 0x50a   :  { %v4080_v52 = vmul.f32 %v9101_v42, %v9101_v42  ;;  %v9124_v61 = vmax.f32 %v5748_v26, 0.0  ;;  %v4044_v15 = vadd.f32 %v4043_v20, %v9101_v42 }
 0x50b   :  { %v4126_v62 = vadd.f32 %v4125_v54, %v4079_v47  ;;  %v4081_v16 = vmul.f32 %v9116_v46, %v9116_v46 }
 0x50c   :  { %v3856_v43 = vpop.f32.mrb[112].mxu0  ;;  %v4156_v60 = vadd.f32 %v4155_v58, %v4080_v52  ;;  %v4082_v3 = vmul.f32 %v9124_v61, %v9124_v61 }
 0x50d   :  { %v3858_v25 = vpop.f32.mrb[113].mxu0  ;;  %v5749_v2 = vadd.f32 %v3856_v43, %v9079_v31  ;;  %v4127_v19 = vadd.f32 %v4126_v62, %v4081_v16 }
 0x50e   :  { %v3860_v35 = vpop.f32.mrb[114].mxu0  ;;  %v5750_v22 = vadd.f32 %v3858_v25, %v9082_v9  ;;  %v4015_v25 = vadd.f32 %v4014_v1, %v9116_v46  ;;  %v4157_v24 = vadd.f32 %v4156_v60, %v4082_v3 }
 0x50f   :  { %v3862_v33 = vpop.f32.mrb[115].mxu0  ;;  %v9127_v59 = vmax.f32 %v5749_v2, 0.0  ;;  %v5751_v48 = vadd.f32 %v3860_v35, %v9079_v31 }
 0x510   :  { %v9131_v40 = vmax.f32 %v5750_v22, 0.0  ;;  %v5752_v10 = vadd.f32 %v3862_v33, %v9082_v9  ;;  %v4045_v33 = vadd.f32 %v4044_v15, %v9124_v61 }
 0x511   :  { %v4083_v41 = vmul.f32 %v9127_v59, %v9127_v59  ;;  %v9143_v35 = vmax.f32 %v5751_v48, 0.0  ;;  %v4016_v38 = vadd.f32 %v4015_v25, %v9127_v59 }
 0x512   :  { %v4084_v51 = vmul.f32 %v9131_v40, %v9131_v40  ;;  %v9148_v44 = vmax.f32 %v5752_v10, 0.0 }
 0x513   :  { %v4128_v23 = vadd.f32 %v4127_v19, %v4083_v41  ;;  %v4085_v27 = vmul.f32 %v9143_v35, %v9143_v35  ;;  %v4017_v28 = vadd.f32 %v4016_v38, %v9143_v35 }
 0x514   :  { %v3866_v36 = vpop.f32.mrb[116].mxu0  ;;  %v4158_v6 = vadd.f32 %v4157_v24, %v4084_v51 }
 0x515   :  { %v3868_v37 = vpop.f32.mrb[117].mxu0  ;;  %v5753_v30 = vadd.f32 %v3866_v36, %v9079_v31  ;;  %v4129_v45 = vadd.f32 %v4128_v23, %v4085_v27 }
 0x516   :  { %v3870_v39 = vpop.f32.mrb[118].mxu0  ;;  %v5754_v43 = vadd.f32 %v3868_v37, %v9082_v9  ;;  %v4046_v37 = vadd.f32 %v4045_v33, %v9131_v40 }
 0x517   :  { %v3872_v34 = vpop.f32.mrb[119].mxu0  ;;  %v9151_v36 = vmax.f32 %v5753_v30, 0.0  ;;  %v5755_v21 = vadd.f32 %v3870_v39, %v9079_v31  ;;  %v4086_v39 = vmul.f32 %v9148_v44, %v9148_v44 }
 0x518   :  { %v9155_v14 = vmax.f32 %v5754_v43, 0.0  ;;  %v5756_v12 = vadd.f32 %v3872_v34, %v9082_v9  ;;  %v4047_v57 = vadd.f32 %v4046_v37, %v9148_v44 }
 0x519   :  { %v4087_v22 = vmul.f32 %v9151_v36, %v9151_v36  ;;  %v9167_v34 = vmax.f32 %v5755_v21, 0.0  ;;  %v4018_v47 = vadd.f32 %v4017_v28, %v9151_v36  ;;  %v4159_v20 = vadd.f32 %v4158_v6, %v4086_v39 }
 0x51a   :  { %v4088_v4 = vmul.f32 %v9155_v14, %v9155_v14  ;;  %v4048_v52 = vadd.f32 %v4047_v57, %v9155_v14 }
 0x51b   :  { %v4130_v58 = vadd.f32 %v4129_v45, %v4087_v22  ;;  %v4089_v15 = vmul.f32 %v9167_v34, %v9167_v34  ;;  %v4019_v3 = vadd.f32 %v4018_v47, %v9167_v34 }
 0x51c   :  { %v3876_v11 = vpop.f32.mrb[120].mxu0  ;;  %v4160_v16 = vadd.f32 %v4159_v20, %v4088_v4 }
 0x51d   :  { %v3878_v18 = vpop.f32.mrb[121].mxu0  ;;  %v5757_v49 = vadd.f32 %v3876_v11, %v9079_v31  ;;  %v9172_v11 = vmax.f32 %v5756_v12, 0.0 }
 0x51e   :  { %v3880_v55 = vpop.f32.mrb[122].mxu0  ;;  %v5758_v2 = vadd.f32 %v3878_v18, %v9082_v9 }
 0x51f   :  { %v3882_v56 = vpop.f32.mrb[123].mxu0  ;;  %v9175_v17 = vmax.f32 %v5757_v49, 0.0  ;;  %v5759_v18 = vadd.f32 %v3880_v55, %v9079_v31  ;;  %v4090_v30 = vmul.f32 %v9172_v11, %v9172_v11  ;;  %v4049_v41 = vadd.f32 %v4048_v52, %v9172_v11 }
 0x520   :  { %v9179_v54 = vmax.f32 %v5758_v2, 0.0  ;;  %v5760_v1 = vadd.f32 %v3882_v56, %v9082_v9 }
 0x521   :  { %v4091_v56 = vmul.f32 %v9175_v17, %v9175_v17  ;;  %v9191_v43 = vmax.f32 %v5759_v18, 0.0  ;;  %v4020_v19 = vadd.f32 %v4019_v3, %v9175_v17 }
 0x522   :  { %v4092_v33 = vmul.f32 %v9179_v54, %v9179_v54  ;;  %v9196_v51 = vmax.f32 %v5760_v1, 0.0  ;;  %v4050_v24 = vadd.f32 %v4049_v41, %v9179_v54 }
 0x523   :  { %v4093_v27 = vmul.f32 %v9191_v43, %v9191_v43  ;;  %v4021_v28 = vadd.f32 %v4020_v19, %v9191_v43 }
 0x524   :  { %v3886_v7 = vpop.f32.mrb[124].mxu0  ;;  %v4094_v39 = vmul.f32 %v9196_v51, %v9196_v51  ;;  %v4051_v4 = vadd.f32 %v4050_v24, %v9196_v51 }
 0x525   :  { %v3888_v29 = vpop.f32.mrb[125].mxu0  ;;  %v5761_v10 = vadd.f32 %v3886_v7, %v9079_v31  ;;  %v4131_v7 = vadd.f32 %v4130_v58, %v4089_v15 }
 0x526   :  { %v3890_v63 = vpop.f32.mrb[126].mxu0  ;;  %v5762_v55 = vadd.f32 %v3888_v29, %v9082_v9  ;;  %v4161_v29 = vadd.f32 %v4160_v16, %v4090_v30 }
 0x527   :  { %v3892_v26 = vpop.f32.mrb[127].mxu0  ;;  %v9199_v38 = vmax.f32 %v5761_v10, 0.0  ;;  %v5763_v21 = vadd.f32 %v3890_v63, %v9079_v31  ;;  %v4132_v23 = vadd.f32 %v4131_v7, %v4091_v56 }
 0x528   :  { %v9203_v37 = vmax.f32 %v5762_v55, 0.0  ;;  %v5764_v12 = vadd.f32 %v3892_v26, %v9082_v9  ;;  %v4162_v6 = vadd.f32 %v4161_v29, %v4092_v33 }
 0x529   :  { %v4095_v22 = vmul.f32 %v9199_v38, %v9199_v38  ;;  %v9215_v57 = vmax.f32 %v5763_v21, 0.0  ;;  %v4133_v20 = vadd.f32 %v4132_v23, %v4093_v27  ;;  %v4022_v52 = vadd.f32 %v4021_v28, %v9199_v38 }
 0x52a   :  { %v4096_v45 = vmul.f32 %v9203_v37, %v9203_v37  ;;  %v9220_v47 = vmax.f32 %v5764_v12, 0.0  ;;  %v4163_v15 = vadd.f32 %v4162_v6, %v4094_v39  ;;  %v4052_v10 = vadd.f32 %v4051_v4, %v9203_v37 }
 0x52b   :  { %v4134_v30 = vadd.f32 %v4133_v20, %v4095_v22  ;;  %v4097_v55 = vmul.f32 %v9215_v57, %v9215_v57  ;;  %v4023_v33 = vadd.f32 %v4022_v52, %v9215_v57 }
 0x52c   :  { %v3896_v48 = vpop.f32.mrb[128].mxu0  ;;  %v4164_v56 = vadd.f32 %v4163_v15, %v4096_v45  ;;  %v4098_v41 = vmul.f32 %v9220_v47, %v9220_v47 }
 0x52d   :  { %v3898_v62 = vpop.f32.mrb[129].mxu0  ;;  %v5765_v49 = vadd.f32 %v3896_v48, %v9079_v31  ;;  %v4135_v12 = vadd.f32 %v4134_v30, %v4097_v55 }
 0x52e   :  { %v3900_v60 = vpop.f32.mrb[130].mxu0  ;;  %v5766_v2 = vadd.f32 %v3898_v62, %v9082_v9  ;;  %v4165_v39 = vadd.f32 %v4164_v56, %v4098_v41 }
 0x52f   :  { %v3902_v25 = vpop.f32.mrb[131].mxu0  ;;  %v9223_v1 = vmax.f32 %v5765_v49, 0.0  ;;  %v5767_v48 = vadd.f32 %v3900_v60, %v9079_v31 }
 0x530   :  { %v9227_v62 = vmax.f32 %v5766_v2, 0.0  ;;  %v5768_v16 = vadd.f32 %v3902_v25, %v9082_v9  ;;  %v4053_v25 = vadd.f32 %v4052_v10, %v9220_v47 }
 0x531   :  { %v4099_v7 = vmul.f32 %v9223_v1, %v9223_v1  ;;  %v9239_v19 = vmax.f32 %v5767_v48, 0.0  ;;  %v4024_v23 = vadd.f32 %v4023_v33, %v9223_v1 }
 0x532   :  { %v4100_v21 = vmul.f32 %v9227_v62, %v9227_v62  ;;  %v9244_v29 = vmax.f32 %v5768_v16, 0.0  ;;  %v4054_v2 = vadd.f32 %v4053_v25, %v9227_v62 }
 0x533   :  { %v4101_v4 = vmul.f32 %v9239_v19, %v9239_v19  ;;  %v4025_v15 = vadd.f32 %v4024_v23, %v9239_v19 }
 0x534   :  { %v3906_v63 = vpop.f32.mrb[132].mxu0  ;;  %v4166_v52 = vadd.f32 %v4165_v39, %v4100_v21  ;;  %v4055_v16 = vadd.f32 %v4054_v2, %v9244_v29 }
 0x535   :  { %v3908_v26 = vpop.f32.mrb[133].mxu0  ;;  %v5769_v3 = vadd.f32 %v3906_v63, %v9079_v31 }
 0x536   :  { %v3910_v18 = vpop.f32.mrb[134].mxu0  ;;  %v5770_v60 = vadd.f32 %v3908_v26, %v9082_v9  ;;  %v4136_v26 = vadd.f32 %v4135_v12, %v4099_v7 }
 0x537   :  { %v3912_v58 = vpop.f32.mrb[135].mxu0  ;;  %v9247_v27 = vmax.f32 %v5769_v3, 0.0  ;;  %v5771_v49 = vadd.f32 %v3910_v18, %v9079_v31  ;;  %v4102_v18 = vmul.f32 %v9244_v29, %v9244_v29 }
 0x538   :  { %v9251_v63 = vmax.f32 %v5770_v60, 0.0  ;;  %v5772_v28 = vadd.f32 %v3912_v58, %v9082_v9  ;;  %v4137_v3 = vadd.f32 %v4136_v26, %v4101_v4 }
 0x539   :  { %v4103_v10 = vmul.f32 %v9247_v27, %v9247_v27  ;;  %v9263_v58 = vmax.f32 %v5771_v49, 0.0  ;;  %v4026_v56 = vadd.f32 %v4025_v15, %v9247_v27  ;;  %v4167_v33 = vadd.f32 %v4166_v52, %v4102_v18 }
 0x53a   :  { %v4104_v30 = vmul.f32 %v9251_v63, %v9251_v63  ;;  %v9268_v55 = vmax.f32 %v5772_v28, 0.0  ;;  %v4056_v7 = vadd.f32 %v4055_v16, %v9251_v63 }
 0x53b   :  { %v4138_v12 = vadd.f32 %v4137_v3, %v4103_v10  ;;  %v4105_v23 = vmul.f32 %v9263_v58, %v9263_v58  ;;  %v4027_v26 = vadd.f32 %v4026_v56, %v9263_v58 }
 0x53c   :  { %v3916_v24 = vpop.f32.mrb[136].mxu0  ;;  %v4168_v39 = vadd.f32 %v4167_v33, %v4104_v30  ;;  %v4106_v2 = vmul.f32 %v9268_v55, %v9268_v55  ;;  %v4057_v52 = vadd.f32 %v4056_v7, %v9268_v55 }
 0x53d   :  { %v3918_v6 = vpop.f32.mrb[137].mxu0  ;;  %v5773_v45 = vadd.f32 %v3916_v24, %v9079_v31  ;;  %v4139_v15 = vadd.f32 %v4138_v12, %v4105_v23 }
 0x53e   :  { %v3920_v22 = vpop.f32.mrb[138].mxu0  ;;  %v5774_v48 = vadd.f32 %v3918_v6, %v9082_v9  ;;  %v4169_v3 = vadd.f32 %v4168_v39, %v4106_v2 }
 0x53f   :  { %v3922_v20 = vpop.f32.mrb[139].mxu0  ;;  %v9271_v41 = vmax.f32 %v5773_v45, 0.0  ;;  %v5775_v60 = vadd.f32 %v3920_v22, %v9079_v31 }
 0x540   :  { %v9275_v25 = vmax.f32 %v5774_v48, 0.0  ;;  %v5776_v21 = vadd.f32 %v3922_v20, %v9082_v9 }
 0x541   :  { %10354 = vst [vmem:[#allocation38_spill] sm:$0xff] %v9271_v41  ;;  %v4107_v4 = vmul.f32 %v9271_v41, %v9271_v41  ;;  %v9287_v45 = vmax.f32 %v5775_v60, 0.0  ;;  %v4028_v10 = vadd.f32 %v4027_v26, %v9271_v41 }
 0x542   :  { %v4108_v18 = vmul.f32 %v9275_v25, %v9275_v25  ;;  %v9292_v48 = vmax.f32 %v5776_v21, 0.0  ;;  %v4058_v56 = vadd.f32 %v4057_v52, %v9275_v25 }
 0x543   :  { %10355 = vst [vmem:[#allocation32_spill] sm:$0xff] %v9287_v45  ;;  %v4140_v7 = vadd.f32 %v4139_v15, %v4107_v4 }
 0x544   :  { %v3926_v24 = vpop.f32.mrb[140].mxu0  ;;  %10356 = vst [vmem:[#allocation36_spill] sm:$0xff] %v9292_v48  ;;  %v4170_v21 = vadd.f32 %v4169_v3, %v4108_v18  ;;  %v4110_v12 = vmul.f32 %v9292_v48, %v9292_v48 }
 0x545   :  { %v5777_v49 = vadd.f32 %v3926_v24, %v9079_v31  ;;  %v3928_v6 = vpop.f32.mrb[141].mxu0  ;;  %v4109_v24 = vmul.f32 %v9287_v45, %v9287_v45 }
 0x546   :  { %v5778_v28 = vadd.f32 %v3928_v6, %v9082_v9  ;;  %v3930_v22 = vpop.f32.mrb[142].mxu0 }
 0x547   :  { %v3932_v20 = vpop.f32.mrb[143].mxu0  ;;  %v9295_v16 = vmax.f32 %v5777_v49, 0.0  ;;  %v5779_v30 = vadd.f32 %v3930_v22, %v9079_v31  ;;  %v4029_v49 = vadd.f32 %v4028_v10, %v9287_v45  ;;  %v4059_v22 = vadd.f32 %v4058_v56, %v9292_v48 }
 0x548   :  { %v9299_v60 = vmax.f32 %v5778_v28, 0.0  ;;  %v5780_v33 = vadd.f32 %v3932_v20, %v9082_v9  ;;  %v4141_v18 = vadd.f32 %v4140_v7, %v4109_v24 }
 0x549   :  { %10357 = vst [vmem:[#allocation42_spill] sm:$0xff] %v9295_v16  ;;  %v4111_v6 = vmul.f32 %v9295_v16, %v9295_v16  ;;  %v9309_v39 = vmax.f32 %v5779_v30, 0.0  ;;  %v4030_v15 = vadd.f32 %v4029_v49, %v9295_v16 }
 0x54a   :  { %10358 = vst [vmem:[#allocation46_spill] sm:$0xff] %v9299_v60  ;;  %v4112_v26 = vmul.f32 %v9299_v60, %v9299_v60  ;;  %v9315_v4 = vmax.f32 %v5780_v33, 0.0  ;;  %v4060_v45 = vadd.f32 %v4059_v22, %v9299_v60 }
 0x54b   :  { %10359 = vst [vmem:[#allocation40_spill] sm:$0xff] %v9309_v39  ;;  %v4142_v33 = vadd.f32 %v4141_v18, %v4111_v6  ;;  %v4031_v24 = vadd.f32 %v4030_v15, %v9309_v39 }
 0x54c   :  { %v3936_v23 = vpop.f32.mrb[144].mxu0  ;;  %10360 = vst [vmem:[#allocation44_spill] sm:$0xff] %v9315_v4  ;;  %v4114_v7 = vmul.f32 %v9315_v4, %v9315_v4 }
 0x54d   :  { %v5781_v2 = vadd.f32 %v3936_v23, %v9079_v31  ;;  %v3938_v28 = vpop.f32.mrb[145].mxu0  ;;  %v4171_v23 = vadd.f32 %v4170_v21, %v4110_v12  ;;  %v4061_v12 = vadd.f32 %v4060_v45, %v9315_v4 }
 0x54e   :  { %v5782_v20 = vadd.f32 %v3938_v28, %v9082_v9  ;;  %v3940_v52 = vpop.f32.mrb[146].mxu0  ;;  %v4113_v28 = vmul.f32 %v9309_v39, %v9309_v39 }
 0x54f   :  { %v9319_v10 = vmax.f32 %v5781_v2, 0.0  ;;  %v5783_v30 = vadd.f32 %v3940_v52, %v9079_v31  ;;  %v3942_v3 = vpop.f32.mrb[147].mxu0  ;;  %v4172_v48 = vadd.f32 %v4171_v23, %v4112_v26 }
 0x550   :  { %v9323_v56 = vmax.f32 %v5782_v20, 0.0  ;;  %v5784_v41 = vadd.f32 %v3942_v3, %v9082_v9  ;;  %v4143_v20 = vadd.f32 %v4142_v33, %v4113_v28 }
 0x551   :  { %10361 = vst [vmem:[#allocation50_spill] sm:$0xff] %v9319_v10  ;;  %v4115_v49 = vmul.f32 %v9319_v10, %v9319_v10  ;;  %v9333_v21 = vmax.f32 %v5783_v30, 0.0  ;;  %v4032_v26 = vadd.f32 %v4031_v24, %v9319_v10  ;;  %v4173_v15 = vadd.f32 %v4172_v48, %v4114_v7 }
 0x552   :  { %10362 = vst [vmem:[#allocation54_spill] sm:$0xff] %v9323_v56  ;;  %v4116_v2 = vmul.f32 %v9323_v56, %v9323_v56  ;;  %v9338_v6 = vmax.f32 %v5784_v41, 0.0  ;;  %v4062_v3 = vadd.f32 %v4061_v12, %v9323_v56 }
 0x553   :  { %10363 = vst [vmem:[#allocation48_spill] sm:$0xff] %v9333_v21  ;;  %v4144_v39 = vadd.f32 %v4143_v20, %v4115_v49  ;;  %v4117_v45 = vmul.f32 %v9333_v21, %v9333_v21  ;;  %v4033_v7 = vadd.f32 %v4032_v26, %v9333_v21 }
 0x554   :  { %10364 = vst [vmem:[#allocation52_spill] sm:$0xff] %v9338_v6  ;;  %v3946_v22 = vpop.f32.mrb[148].mxu0  ;;  %v4174_v28 = vadd.f32 %v4173_v15, %v4116_v2  ;;  %v4118_v24 = vmul.f32 %v9338_v6, %v9338_v6  ;;  %v4063_v20 = vadd.f32 %v4062_v3, %v9338_v6 }
 0x555   :  { %v5785_v52 = vadd.f32 %v3946_v22, %v9079_v31  ;;  %v3948_v18 = vpop.f32.mrb[149].mxu0 }
 0x556   :  { %v5786_v30 = vadd.f32 %v3948_v18, %v9082_v9  ;;  %v3950_v23 = vpop.f32.mrb[150].mxu0  ;;  %v4145_v18 = vadd.f32 %v4144_v39, %v4117_v45 }
 0x557   :  { %v9346_v16 = vmax.f32 %v5785_v52, 0.0  ;;  %v5787_v41 = vadd.f32 %v3950_v23, %v9079_v31  ;;  %v3952_v33 = vpop.f32.mrb[151].mxu0 }
 0x558   :  { %v9351_v22 = vmax.f32 %v5786_v30, 0.0  ;;  %v5788_v48 = vadd.f32 %v3952_v33, %v9082_v9  ;;  %v4175_v30 = vadd.f32 %v4174_v28, %v4118_v24 }
 0x559   :  { %10365 = vst [vmem:[#allocation58_spill] sm:$0xff] %v9346_v16  ;;  %v4119_v49 = vmul.f32 %v9346_v16, %v9346_v16  ;;  %v9357_v12 = vmax.f32 %v5787_v41, 0.0  ;;  %v4034_v15 = vadd.f32 %v4033_v7, %v9346_v16 }
 0x55a   :  { %10366 = vst [vmem:[#allocation62_spill] sm:$0xff] %v9351_v22  ;;  %v4120_v52 = vmul.f32 %v9351_v22, %v9351_v22  ;;  %v9362_v2 = vmax.f32 %v5788_v48, 0.0  ;;  %v4064_v23 = vadd.f32 %v4063_v20, %v9351_v22 }
 0x55b   :  { %10367 = vst [vmem:[#allocation56_spill] sm:$0xff] %v9357_v12  ;;  %v4146_v26 = vadd.f32 %v4145_v18, %v4119_v49  ;;  %v4121_v21 = vmul.f32 %v9357_v12, %v9357_v12  ;;  %v4035_v45 = vadd.f32 %v4034_v15, %v9357_v12 }
 0x55c   :  { %10368 = vst [vmem:[#allocation60_spill] sm:$0xff] %v9362_v2  ;;  %v3956_v33 = vpop.f32.mrb[152].mxu0  ;;  %v4176_v3 = vadd.f32 %v4175_v30, %v4120_v52  ;;  %v4122_v6 = vmul.f32 %v9362_v2, %v9362_v2  ;;  %v4065_v7 = vadd.f32 %v4064_v23, %v9362_v2 }
 0x55d   :  { %v5789_v41 = vadd.f32 %v3956_v33, %v9079_v31  ;;  %v3958_v10 = vpop.f32.mrb[153].mxu0  ;;  %v4147_v20 = vadd.f32 %v4146_v26, %v4121_v21 }
 0x55e   :  { %v5790_v48 = vadd.f32 %v3958_v10, %v9082_v9  ;;  %v3960_v39 = vpop.f32.mrb[154].mxu0  ;;  %v4177_v31 = vadd.f32 %v4176_v3, %v4122_v6 }
 0x55f   :  { %v4011_v28 = vmax.f32 %v5789_v41, 0.0  ;;  %v3961_v24 = vpop.f32.mrb[155].mxu0 }
 0x560   :  { %v9374_v49 = vmax.f32 %v5790_v48, 0.0 }
 0x561   :  { %v4036_v18 = vadd.f32 %v4035_v45, %v4011_v28  ;;  %v4123_v16 = vmul.f32 %v4011_v28, %v4011_v28 }
 0x562   :  { %v4066_v52 = vadd.f32 %v4065_v7, %v9374_v49  ;;  %v4124_v30 = vmul.f32 %v9374_v49, %v9374_v49 }
 0x563   :  { %v4037_v33 = vrot.slane %v4036_v18, 4  ;;  %v4148_v9 = vadd.f32 %v4147_v20, %v4123_v16 }
 0x564   :  { %v4067_v10 = vrot.slane %v4066_v52, 4  ;;  %v4178_v39 = vadd.f32 %v4177_v31, %v4124_v30 }
 0x565   :  { %v4038_v15 = vadd.f32 %v4037_v33, %v4036_v18  ;;  %v4149_v41 = vrot.slane %v4148_v9, 4 }
 0x566   :  { %v4068_v24 = vadd.f32 %v4067_v10, %v4066_v52  ;;  %v4179_v12 = vrot.slane %v4178_v39, 4 }
 0x567   :  { %v4039_v23 = vrot.slane %v4038_v15, 2  ;;  %v4150_v48 = vadd.f32 %v4149_v41, %v4148_v9 }
 0x568   :  { %v4069_v2 = vrot.slane %v4068_v24, 2  ;;  %v4180_v21 = vadd.f32 %v4179_v12, %v4178_v39 }
 0x569   :  { %v4040_v26 = vadd.f32 %v4039_v23, %v4038_v15  ;;  %v4151_v45 = vrot.slane %v4150_v48, 2 }
 0x56a   :  { %v4070_v6 = vadd.f32 %v4069_v2, %v4068_v24  ;;  %v4181_v3 = vrot.slane %v4180_v21, 2 }
 0x56b   :  { %v4041_v7 = vrot.slane %v4040_v26, 1  ;;  %v4152_v22 = vadd.f32 %v4151_v45, %v4150_v48 }
 0x56c   :  { %v4071_v56 = vrot.slane %v4070_v6, 1  ;;  %v4182_v4 = vadd.f32 %v4181_v3, %v4180_v21 }
 0x56d   :  { %v4042_v60 = vadd.f32 %v4041_v7, %v4040_v26  ;;  %v4153_v16 = vrot.slane %v4152_v22, 1 }
 0x56e   :  { %v4072_v20 = vadd.f32 %v4071_v56, %v4070_v6  ;;  %v4183_v31 = vrot.slane %v4182_v4, 1  ;;  %v4197_v56 = vld [vmem:[%s9867_s1 + $0x17] sm:$0x3] }
 0x56f   :  { %v4073_v18 = vmul.f32 0.005, %v4042_v60  ;;  %v4154_v30 = vadd.f32 %v4153_v16, %v4152_v22  ;;  %v4202_v60 = vrot.slane %v4197_v56, %v10352_v5 }
 0x570   :  { %v4074_v52 = vmul.f32 0.005, %v4072_v20  ;;  %v4184_v33 = vadd.f32 %v4183_v31, %v4182_v4  ;;  %v4206_v4 = vrot.slane %v4197_v56, %v10353_v50 }
 0x571   :  { %v4185_v10 = vmul.f32 0.005, %v4154_v30  ;;  %v4187_v9 = vmul.f32 %v4073_v18, %v4073_v18 }
 0x572   :  { %v4186_v41 = vmul.f32 0.005, %v4184_v33  ;;  %v4188_v12 = vmul.f32 %v4074_v52, %v4074_v52 }
 0x573   :  { %v4189_v39 = vsub.f32 %v4185_v10, %v4187_v9 }
 0x574   :  { %v4190_v15 = vsub.f32 %v4186_v41, %v4188_v12 }
 0x575   :  { %v4191_v2 = vmax.f32 %v4189_v39, 0.0 }
 0x576   :  { %v4192_v24 = vmax.f32 %v4190_v15, 0.0 }
 0x577   :  { %v4193_v23 = vadd.f32 1e-05, %v4191_v2 }
 0x578   :  { %v4194_v48 = vadd.f32 1e-05, %v4192_v24  ;;  %v10370_v24 = vld [vmem:[#allocation36_spill] sm:$0xff] }
 0x579   :  { %6185 = vrsqrt.f32 %v4193_v23  ;;  %v10371_v23 = vld [vmem:[#allocation38_spill] sm:$0xff] }
 0x57a   :  { %6187 = vrsqrt.f32 %v4194_v48  ;;  %v10372_v48 = vld [vmem:[#allocation32_spill] sm:$0xff] }
 0x583   :  { %v6186_v22 = vpop.eup %6185 }
 0x584   :  { %v6188_v21 = vpop.eup %6187  ;;  %v4209_v26 = vmul.f32 %v6186_v22, %v4202_v60 }
 0x585   :  { %v4210_v45 = vmul.f32 %v6188_v21, %v4206_v4 }
 0x586   :  { %v4212_v6 = vmul.f32 %v4209_v26, %v4073_v18  ;;  %v9385_v3 = vrot.slane %v4209_v26, %v10352_v5 }
 0x587   :  { %v4213_v7 = vmul.f32 %v4210_v45, %v4074_v52  ;;  %v9388_v16 = vrot.slane %v4210_v45, %v10352_v5 }
 0x588   :  { %v9391_v20 = vmul.f32 %v9385_v3, %v4011_v28  ;;  %v4241_v31 = vmul.f32 %v9385_v3, %v9094_v0  ;;  %v4243_v30 = vmul.f32 %v9385_v3, %v9090_v8  ;;  %v4245_v33 = vmul.f32 %v9385_v3, %v9096_v32 }
 0x589   :  { %v4216_v18 = vcombine.low %v4212_v6, %v4213_v7  ;;  %v9401_v10 = vmul.f32 %v9388_v16, %v9374_v49  ;;  %v4242_v52 = vmul.f32 %v9388_v16, %v9099_v53  ;;  %v4244_v28 = vmul.f32 %v9388_v16, %v9092_v13  ;;  %v10369_v49 = vld [vmem:[#allocation105_spill] sm:$0xff] }
 0x58a   :  { %v4246_v0 = vmul.f32 %v9388_v16, %v9101_v42  ;;  %v4248_v8 = vmul.f32 %v9388_v16, %v9124_v61  ;;  %v4247_v32 = vmul.f32 %v9385_v3, %v9116_v46  ;;  %v4250_v9 = vmul.f32 %v9388_v16, %v9131_v40  ;;  %v4211_v61 = vld [vmem:[%s9867_s1 + $0x19] sm:$0x3] }
 0x58b   :  { %v4223_v41 = vrot.slane %v4216_v18, %v10369_v49  ;;  %v4252_v53 = vmul.f32 %v9388_v16, %v9148_v44  ;;  %v4249_v13 = vmul.f32 %v9385_v3, %v9127_v59  ;;  %v4251_v42 = vmul.f32 %v9385_v3, %v9143_v35 }
 0x58c   :  { %v4254_v46 = vmul.f32 %v9388_v16, %v9155_v14  ;;  %v4256_v40 = vmul.f32 %v9388_v16, %v9172_v11  ;;  %v4253_v12 = vmul.f32 %v9385_v3, %v9151_v36  ;;  %v4255_v44 = vmul.f32 %v9385_v3, %v9167_v34 }
 0x58d   :  { %v4230_v59 = vrot.slane %v4223_v41, %v10369_v49  ;;  %v4258_v35 = vmul.f32 %v9388_v16, %v9179_v54  ;;  %v4260_v39 = vmul.f32 %v9388_v16, %v9196_v51  ;;  %v4257_v14 = vmul.f32 %v9385_v3, %v9175_v17 }
 0x58e   :  { %v4259_v11 = vmul.f32 %v9385_v3, %v9191_v43  ;;  %v4262_v36 = vmul.f32 %v9388_v16, %v9203_v37  ;;  %v4264_v34 = vmul.f32 %v9388_v16, %v9220_v47  ;;  %v4261_v15 = vmul.f32 %v9385_v3, %v9199_v38 }
 0x58f   :  { %v4232_v2 = vsub.f32 %v4211_v61, %v4230_v59  ;;  %v4263_v54 = vmul.f32 %v9385_v3, %v9215_v57  ;;  %v4266_v51 = vmul.f32 %v9388_v16, %v9227_v62  ;;  %v4268_v17 = vmul.f32 %v9388_v16, %v9244_v29 }
 0x590   :  { %v4265_v43 = vmul.f32 %v9385_v3, %v9223_v1  ;;  %v4267_v37 = vmul.f32 %v9385_v3, %v9239_v19  ;;  %v4270_v47 = vmul.f32 %v9388_v16, %v9251_v63  ;;  %v4272_v38 = vmul.f32 %v9388_v16, %v9268_v55 }
 0x591   :  { %v9463_v57 = vrot.slane %v4232_v2, %v10352_v5  ;;  %v9466_v62 = vrot.slane %v4232_v2, %v10353_v50  ;;  %v4269_v29 = vmul.f32 %v9385_v3, %v9247_v27  ;;  %v4271_v1 = vmul.f32 %v9385_v3, %v9263_v58 }
 0x592   :  { %v4274_v19 = vmul.f32 %v9388_v16, %v9275_v25  ;;  %v4276_v63 = vmul.f32 %v9388_v16, %v10370_v24  ;;  %v4273_v55 = vmul.f32 %v9385_v3, %v10371_v23  ;;  %v4275_v56 = vmul.f32 %v9385_v3, %v10372_v48 }
 0x593   :  { %v4303_v50 = vadd.f32 %v9466_v62, %v4242_v52  ;;  %v4305_v60 = vadd.f32 %v9466_v62, %v4244_v28  ;;  %v4302_v27 = vadd.f32 %v9463_v57, %v4241_v31  ;;  %v4304_v58 = vadd.f32 %v9463_v57, %v4243_v30 }
 0x594   :  { %v4307_v4 = vadd.f32 %v9466_v62, %v4246_v0  ;;  %v4309_v25 = vadd.f32 %v9466_v62, %v4248_v8  ;;  %v4306_v22 = vadd.f32 %v9463_v57, %v4245_v33  ;;  %v4308_v21 = vadd.f32 %v9463_v57, %v4247_v32 }
 0x595   :  { %v4353_v26 = vpack.c.bf16 %v4305_v60, %v4303_v50  ;;  %v4352_v45 = vpack.c.bf16 %v4304_v58, %v4302_v27  ;;  %v4311_v6 = vadd.f32 %v9466_v62, %v4250_v9  ;;  %v4313_v7 = vadd.f32 %v9466_v62, %v4252_v53 }
 0x596   :  { %v4355_v18 = vpack.c.bf16 %v4309_v25, %v4307_v4  ;;  %v4354_v52 = vpack.c.bf16 %v4308_v21, %v4306_v22  ;;  %v9491_v31 = vadd.f32 %v9463_v57, %v4249_v13  ;;  %v9494_v30 = vadd.f32 %v9463_v57, %v4251_v42  ;;  %v10374_v4 = vld [vmem:[#allocation44_spill] sm:$0xff]  ;;  %v10375_v25 = vld [vmem:[#allocation42_spill] sm:$0xff] }
 0x597   :  { %4545 = vmatprep.mubr.bf16.mxu1 %v4353_v26  ;;  %v4357_v28 = vpack.c.bf16 %v4313_v7, %v4311_v6  ;;  %v9497_v33 = vadd.f32 %v9466_v62, %v4254_v46  ;;  %v9500_v0 = vadd.f32 %v9466_v62, %v4256_v40  ;;  %v9503_v8 = vadd.f32 %v9463_v57, %v4253_v12  ;;  %v10376_v22 = vld [vmem:[#allocation40_spill] sm:$0xff] }
 0x598   :  { %4546 = vmatmul.mubr.bf16.vlgmr.msra.gmra.mrb[156].mxu1 %v4352_v45  ;;  %v4356_v32 = vpack.c.bf16 %v9494_v30, %v9491_v31  ;;  %v9508_v9 = vadd.f32 %v9463_v57, %v4255_v44  ;;  %v9511_v49 = vadd.f32 %v9466_v62, %v4258_v35  ;;  %v9514_v41 = vadd.f32 %v9466_v62, %v4260_v39  ;;  %v10378_v6 = vld [vmem:[#allocation52_spill] sm:$0xff]  ;;  %v6164_v31 = vld [vmem:[#allocation8 + $0x8] sm:$0xff]  }
 0x599   :  { %4553 = vmatprep.mubr.bf16.mxu1 %v4355_v18  ;;  %v4359_v53 = vpack.c.bf16 %v9500_v0, %v9497_v33  ;;  %v9519_v13 = vadd.f32 %v9463_v57, %v4257_v14  ;;  %v9522_v42 = vadd.f32 %v9463_v57, %v4259_v11  ;;  %v9525_v61 = vadd.f32 %v9466_v62, %v4262_v36  ;;  %v10379_v18 = vld [vmem:[#allocation50_spill] sm:$0xff]  ;;  %v6165_v30 = vld [vmem:[#allocation8 + $0x10] sm:$0xff]   ;;  %v6166_v33 = vld [vmem:[#allocation8 + $0x18] sm:$0xff]  }
 0x59a   :  { %v4358_v46 = vpack.c.bf16 %v9508_v9, %v9503_v8  ;;  %v4361_v40 = vpack.c.bf16 %v9514_v41, %v9511_v49  ;;  %v9532_v12 = vadd.f32 %v9466_v62, %v4264_v34  ;;  %v9535_v44 = vadd.f32 %v9463_v57, %v4261_v15  ;;  %v10380_v9 = vld [vmem:[#allocation48_spill] sm:$0xff]  ;;  %v10381_v41 = vld [vmem:[#allocation62_spill] sm:$0xff] }
 0x59b   :  { %v4360_v59 = vpack.c.bf16 %v9522_v42, %v9519_v13  ;;  %v4324_v35 = vadd.f32 %v9463_v57, %v4263_v54  ;;  %v4327_v39 = vadd.f32 %v9466_v62, %v4266_v51  ;;  %v4329_v14 = vadd.f32 %v9466_v62, %v4268_v17 }
 0x59c   :  { %v4363_v11 = vpack.c.bf16 %v9532_v12, %v9525_v61  ;;  %v4326_v36 = vadd.f32 %v9463_v57, %v4265_v43  ;;  %v4328_v34 = vadd.f32 %v9463_v57, %v4267_v37  ;;  %v4331_v2 = vadd.f32 %v9466_v62, %v4270_v47  ;;  %v10373_v47 = vld [vmem:[#allocation46_spill] sm:$0xff] }
 0x59d   :  { %v4362_v15 = vpack.c.bf16 %v4324_v35, %v9535_v44  ;;  %v4365_v24 = vpack.c.bf16 %v4329_v14, %v4327_v39  ;;  %v4333_v23 = vadd.f32 %v9466_v62, %v4272_v38  ;;  %v4330_v54 = vadd.f32 %v9463_v57, %v4269_v29  ;;  %v10382_v44 = vld [vmem:[#allocation60_spill] sm:$0xff] }
 0x59e   :  { %v4364_v48 = vpack.c.bf16 %v4328_v34, %v4326_v36  ;;  %v4332_v51 = vadd.f32 %v9463_v57, %v4271_v1  ;;  %v4335_v17 = vadd.f32 %v9466_v62, %v4274_v19  ;;  %v4337_v50 = vadd.f32 %v9466_v62, %v4276_v63  ;;  %v10383_v34 = vld [vmem:[#allocation58_spill] sm:$0xff] }
 0x59f   :  { %v4367_v60 = vpack.c.bf16 %v4333_v23, %v4331_v2  ;;  %v4334_v43 = vadd.f32 %v9463_v57, %v4273_v55  ;;  %v4336_v37 = vadd.f32 %v9463_v57, %v4275_v56  ;;  %v4278_v27 = vmul.f32 %v9388_v16, %v10373_v47  ;;  %v10377_v56 = vld [vmem:[#allocation54_spill] sm:$0xff] }
 0x5a0   :  { %4554 = vmatmul.mubr.bf16.gmra.mrb[160].mxu1 %v4354_v52  ;;  %v4366_v58 = vpack.c.bf16 %v4332_v51, %v4330_v54  ;;  %v4369_v38 = vpack.c.bf16 %v4337_v50, %v4335_v17  ;;  %v4280_v29 = vmul.f32 %v9388_v16, %v10374_v4  ;;  %v4277_v1 = vmul.f32 %v9385_v3, %v10375_v25  ;;  %v10384_v51 = vld [vmem:[#allocation56_spill] sm:$0xff] }
 0x5a1   :  { %4561 = vmatprep.mubr.bf16.mxu1 %v4357_v28  ;;  %v4368_v19 = vpack.c.bf16 %v4336_v37, %v4334_v43  ;;  %v4339_v63 = vadd.f32 %v9466_v62, %v4278_v27  ;;  %v4279_v55 = vmul.f32 %v9385_v3, %v10376_v22  ;;  %v4282_v21 = vmul.f32 %v9388_v16, %v10377_v56  ;;  %v9611_v22 = vld [vmem:[%s9867_s1 + $0x1b] ss:$0 sm:$0xff] }
 0x5a2   :  { %v4341_v26 = vadd.f32 %v9466_v62, %v4280_v29  ;;  %v4338_v45 = vadd.f32 %v9463_v57, %v4277_v1  ;;  %v4284_v7 = vmul.f32 %v9388_v16, %v10378_v6  ;;  %v4281_v52 = vmul.f32 %v9385_v3, %v10379_v18 }
 0x5a3   :  { %v4340_v28 = vadd.f32 %v9463_v57, %v4279_v55  ;;  %v4343_v8 = vadd.f32 %v9466_v62, %v4282_v21  ;;  %v4283_v49 = vmul.f32 %v9385_v3, %v10380_v9  ;;  %v4286_v13 = vmul.f32 %v9388_v16, %v10381_v41  ;;  %v6168_v55 = vld [vmem:[#allocation8 + $0x28] sm:$0xff]  }
 0x5a4   :  { %v4371_v42 = vpack.c.bf16 %v4341_v26, %v4339_v63  ;;  %v4345_v61 = vadd.f32 %v9466_v62, %v4284_v7  ;;  %v4342_v12 = vadd.f32 %v9463_v57, %v4281_v52  ;;  %v4288_v35 = vmul.f32 %v9388_v16, %v10382_v44  ;;  %v6167_v63 = vld [vmem:[#allocation8 + $0x20] sm:$0xff]  }
 0x5a5   :  { %v4370_v39 = vpack.c.bf16 %v4340_v28, %v4338_v45  ;;  %v4344_v14 = vadd.f32 %v9463_v57, %v4283_v49  ;;  %v4347_v36 = vadd.f32 %v9466_v62, %v4286_v13  ;;  %v4285_v2 = vmul.f32 %v9385_v3, %v10383_v34  ;;  %v6169_v28 = vld [vmem:[#allocation8 + $0x30] sm:$0xff]  }
 0x5a6   :  { %v4373_v23 = vpack.c.bf16 %v4345_v61, %v4343_v8  ;;  %v4349_v54 = vadd.f32 %v9466_v62, %v4288_v35  ;;  %v4287_v17 = vmul.f32 %v9385_v3, %v10384_v51  ;;  %v4351_v50 = vadd.f32 %v9466_v62, %v9401_v10 }
 0x5a7   :  { %v4372_v43 = vpack.c.bf16 %v4344_v14, %v4342_v12  ;;  %v4346_v16 = vadd.f32 %v9463_v57, %v4285_v2  ;;  %v4350_v37 = vadd.f32 %v9463_v57, %v9391_v20  ;;  %v6321_v62 = vmov 0.0  }
 0x5a8   :  { %4562 = vmatmul.mubr.bf16.gmra.mrb[164].mxu1 %v4356_v32  ;;  %v4375_v47 = vpack.c.bf16 %v4349_v54, %v4347_v36  ;;  %v4348_v27 = vadd.f32 %v9463_v57, %v4287_v17  ;;  %v4377_v20 = vpack.c.bf16 %v4351_v50, %v4351_v50  ;;  %v6163_v57 = vld [vmem:[#allocation8] sm:$0xff]   ;;  %5623 = vmatprep.subr.bf16.mxu1 %v6321_v62 }
 0x5a9   :  { %4569 = vmatprep.mubr.bf16.mxu1 %v4359_v53  ;;  %v4376_v10 = vpack.c.bf16 %v4350_v37, %v4350_v37  ;;  %5624 = vmatpush3.bf16.msra.mxu1 %v6163_v57 }
 0x5aa   :  { %v4374_v3 = vpack.c.bf16 %v4348_v27, %v4346_v16  ;;  %5625 = vmatprep.subr.bf16.mxu1 %v6321_v62 }
 0x5ad   :  { %5626 = vmatpush3.bf16.msra.mxu1 %v6164_v31 }
 0x5ae   :  { %5627 = vmatprep.subr.bf16.mxu1 %v6321_v62 }
 0x5b0   :  { %4570 = vmatmul.mubr.bf16.gmra.mrb[168].mxu1 %v4358_v46 }
 0x5b1   :  { %4577 = vmatprep.mubr.bf16.mxu1 %v4361_v40  ;;  %5628 = vmatpush3.bf16.msra.mxu1 %v6165_v30 }
 0x5b2   :  { %5629 = vmatprep.subr.bf16.mxu1 %v6321_v62 }
 0x5b5   :  { %5630 = vmatpush3.bf16.msra.mxu1 %v6166_v33 }
 0x5b6   :  { %5631 = vmatprep.subr.bf16.mxu1 %v6321_v62 }
 0x5b8   :  { %4578 = vmatmul.mubr.bf16.gmra.mrb[172].mxu1 %v4360_v59 }
 0x5b9   :  { %4585 = vmatprep.mubr.bf16.mxu1 %v4363_v11  ;;  %5632 = vmatpush3.bf16.msra.mxu1 %v6167_v63 }
 0x5ba   :  { %5633 = vmatprep.subr.bf16.mxu1 %v6321_v62 }
 0x5bd   :  { %5634 = vmatpush3.bf16.msra.mxu1 %v6168_v55 }
 0x5be   :  { %5635 = vmatprep.subr.bf16.mxu1 %v6321_v62 }
 0x5c0   :  { %4586 = vmatmul.mubr.bf16.gmra.mrb[176].mxu1 %v4362_v15 }
 0x5c1   :  { %4593 = vmatprep.mubr.bf16.mxu1 %v4365_v24  ;;  %5636 = vmatpush3.bf16.msra.mxu1 %v6169_v28 }
 0x5c2   :  { %5637 = vmatprep.subr.bf16.mxu1 %v6321_v62 }
 0x5c8   :  { %4594 = vmatmul.mubr.bf16.gmra.mrb[180].mxu1 %v4364_v48 }
 0x5c9   :  { %4601 = vmatprep.mubr.bf16.mxu1 %v4367_v60 }
 0x5d0   :  { %4602 = vmatmul.mubr.bf16.gmra.mrb[184].mxu1 %v4366_v58 }
 0x5d1   :  { %4609 = vmatprep.mubr.bf16.mxu1 %v4369_v38 }
 0x5d8   :  { %4610 = vmatmul.mubr.bf16.gmra.mrb[188].mxu1 %v4368_v19 }
 0x5d9   :  { %4617 = vmatprep.mubr.bf16.mxu1 %v4371_v42  ;;  %v6170_v42 = vld [vmem:[#allocation8 + $0x38] sm:$0xff]  }
 0x5da   :  { %5638 = vmatpush3.bf16.msra.mxu1 %v6170_v42 }
 0x5e0   :  { %4618 = vmatmul.mubr.bf16.gmra.mrb[192].mxu1 %v4370_v39 }
 0x5e1   :  { %4625 = vmatprep.mubr.bf16.mxu1 %v4373_v23 }
 0x5e8   :  { %4626 = vmatmul.mubr.bf16.gmra.mrb[196].mxu1 %v4372_v43 }
 0x5e9   :  { %4633 = vmatprep.mubr.bf16.mxu1 %v4375_v47 }
 0x5f0   :  { %4634 = vmatmul.mubr.bf16.gmra.mrb[200].mxu1 %v4374_v3 }
 0x5f1   :  { %4641 = vmatprep.mubr.bf16.mxu1 %v4377_v20 }
 0x5f8   :  { %4642 = vmatmul.mubr.bf16.gmra.mrb[204].mxu1 %v4376_v10 }
 0x5f9   :  { %5639 = vmatprep.mubr.msk.bf16.mxu1 %vm6322_vm1, %v6321_v62 }
 0x66b   :  { %v5524_v0 = vpop.f32.mrb[156].mxu1 }
 0x66c   :  { %v5525_v32 = vpop.f32.mrb[157].mxu1 }
 0x66d   :  { %v5526_v53 = vadd.f32 %v5525_v32, %v5524_v0  ;;  %v5527_v46 = vpop.f32.mrb[158].mxu1 }
 0x66e   :  { %v5528_v40 = vpop.f32.mrb[159].mxu1 }
 0x66f   :  { %v5529_v59 = vadd.f32 %v5528_v40, %v5527_v46  ;;  %v4548_v45 = vadd.f32 %v5526_v53, %v9611_v22 }
 0x671   :  { %v4551_v56 = vadd.f32 %v5529_v59, %v9611_v22  ;;  %v9620_v49 = vmax.f32 %v4548_v45, 0.0 }
 0x673   :  { %v5530_v11 = vpop.f32.mrb[160].mxu1  ;;  %v9617_v8 = vmax.f32 %v4551_v56, 0.0  ;;  %v4705_v14 = vmul.f32 %v9620_v49, %v9620_v49 }
 0x674   :  { %v5531_v15 = vpop.f32.mrb[161].mxu1 }
 0x675   :  { %v5532_v24 = vadd.f32 %v5531_v15, %v5530_v11  ;;  %v5533_v48 = vpop.f32.mrb[162].mxu1  ;;  %v4706_v61 = vmul.f32 %v9617_v8, %v9617_v8  ;;  %v4674_v35 = vadd.f32 %v9617_v8, %v9620_v49 }
 0x676   :  { %v5534_v60 = vpop.f32.mrb[163].mxu1 }
 0x677   :  { %v5535_v58 = vadd.f32 %v5534_v60, %v5533_v48  ;;  %v4556_v6 = vadd.f32 %v5532_v24, %v9611_v22  ;;  %v4730_v17 = vadd.f32 %v4706_v61, %v4705_v14 }
 0x679   :  { %v9622_v41 = vmax.f32 %v4556_v6, 0.0  ;;  %v4559_v13 = vadd.f32 %v5535_v58, %v9611_v22 }
 0x67b   :  { %v5536_v38 = vpop.f32.mrb[164].mxu1  ;;  %v4707_v36 = vmul.f32 %v9622_v41, %v9622_v41  ;;  %v9635_v34 = vmax.f32 %v4559_v13, 0.0  ;;  %v4675_v54 = vadd.f32 %v4674_v35, %v9622_v41 }
 0x67c   :  { %v5537_v4 = vpop.f32.mrb[165].mxu1 }
 0x67d   :  { %v5538_v29 = vadd.f32 %v5537_v4, %v5536_v38  ;;  %v5539_v25 = vpop.f32.mrb[166].mxu1  ;;  %v4731_v37 = vadd.f32 %v4730_v17, %v4707_v36  ;;  %v4708_v47 = vmul.f32 %v9635_v34, %v9635_v34  ;;  %v4676_v3 = vadd.f32 %v4675_v54, %v9635_v34 }
 0x67e   :  { %v5540_v1 = vpop.f32.mrb[167].mxu1 }
 0x67f   :  { %v5541_v19 = vadd.f32 %v5540_v1, %v5539_v25  ;;  %v4564_v12 = vadd.f32 %v5538_v29, %v9611_v22  ;;  %v4732_v33 = vadd.f32 %v4731_v37, %v4708_v47 }
 0x681   :  { %v9638_v50 = vmax.f32 %v4564_v12, 0.0  ;;  %v4567_v43 = vadd.f32 %v5541_v19, %v9611_v22 }
 0x683   :  { %v5542_v21 = vpop.f32.mrb[168].mxu1  ;;  %v4709_v20 = vmul.f32 %v9638_v50, %v9638_v50  ;;  %v9647_v10 = vmax.f32 %v4567_v43, 0.0  ;;  %v4677_v31 = vadd.f32 %v4676_v3, %v9638_v50 }
 0x684   :  { %v5543_v26 = vpop.f32.mrb[169].mxu1 }
 0x685   :  { %v5544_v7 = vadd.f32 %v5543_v26, %v5542_v21  ;;  %v5545_v18 = vpop.f32.mrb[170].mxu1  ;;  %v4733_v59 = vadd.f32 %v4732_v33, %v4709_v20  ;;  %v4710_v11 = vmul.f32 %v9647_v10, %v9647_v10  ;;  %v4678_v48 = vadd.f32 %v4677_v31, %v9647_v10 }
 0x686   :  { %v5546_v52 = vpop.f32.mrb[171].mxu1 }
 0x687   :  { %v5547_v9 = vadd.f32 %v5546_v52, %v5545_v18  ;;  %v4572_v27 = vadd.f32 %v5544_v7, %v9611_v22  ;;  %v4734_v4 = vadd.f32 %v4733_v59, %v4710_v11 }
 0x689   :  { %v9650_v0 = vmax.f32 %v4572_v27, 0.0  ;;  %v4575_v32 = vadd.f32 %v5547_v9, %v9611_v22 }
 0x68b   :  { %v5548_v44 = vpop.f32.mrb[172].mxu1  ;;  %v4711_v60 = vmul.f32 %v9650_v0, %v9650_v0  ;;  %v9659_v58 = vmax.f32 %v4575_v32, 0.0  ;;  %v4679_v38 = vadd.f32 %v4678_v48, %v9650_v0 }
 0x68c   :  { %v5549_v39 = vpop.f32.mrb[173].mxu1 }
 0x68d   :  { %v5550_v2 = vadd.f32 %v5549_v39, %v5548_v44  ;;  %v5551_v23 = vpop.f32.mrb[174].mxu1  ;;  %v4735_v63 = vadd.f32 %v4734_v4, %v4711_v60  ;;  %v4712_v55 = vmul.f32 %v9659_v58, %v9659_v58  ;;  %v4680_v45 = vadd.f32 %v4679_v38, %v9659_v58 }
 0x68e   :  { %v5552_v51 = vpop.f32.mrb[175].mxu1 }
 0x68f   :  { %v5553_v16 = vadd.f32 %v5552_v51, %v5551_v23  ;;  %v4580_v15 = vadd.f32 %v5550_v2, %v9611_v22  ;;  %v4736_v9 = vadd.f32 %v4735_v63, %v4712_v55 }
 0x691   :  { %v9662_v29 = vmax.f32 %v4580_v15, 0.0  ;;  %v4583_v25 = vadd.f32 %v5553_v16, %v9611_v22 }
 0x693   :  { %v5554_v57 = vpop.f32.mrb[176].mxu1  ;;  %v4713_v7 = vmul.f32 %v9662_v29, %v9662_v29  ;;  %v9671_v18 = vmax.f32 %v4583_v25, 0.0  ;;  %v4681_v28 = vadd.f32 %v4680_v45, %v9662_v29 }
 0x694   :  { %v5555_v30 = vpop.f32.mrb[177].mxu1 }
 0x695   :  { %v5556_v53 = vadd.f32 %v5555_v30, %v5554_v57  ;;  %v5557_v46 = vpop.f32.mrb[178].mxu1  ;;  %v4737_v61 = vadd.f32 %v4736_v9, %v4713_v7  ;;  %v4714_v12 = vmul.f32 %v9671_v18, %v9671_v18  ;;  %v4682_v39 = vadd.f32 %v4681_v28, %v9671_v18 }
 0x696   :  { %v5558_v40 = vpop.f32.mrb[179].mxu1 }
 0x697   :  { %v5559_v24 = vadd.f32 %v5558_v40, %v5557_v46  ;;  %v4588_v56 = vadd.f32 %v5556_v53, %v9611_v22  ;;  %v4738_v43 = vadd.f32 %v4737_v61, %v4714_v12 }
 0x699   :  { %v9674_v13 = vmax.f32 %v4588_v56, 0.0  ;;  %v4591_v42 = vadd.f32 %v5559_v24, %v9611_v22 }
 0x69b   :  { %v5560_v1 = vpop.f32.mrb[180].mxu1  ;;  %v4715_v36 = vmul.f32 %v9674_v13, %v9674_v13  ;;  %v9683_v2 = vmax.f32 %v4591_v42, 0.0  ;;  %v4683_v51 = vadd.f32 %v4682_v39, %v9674_v13 }
 0x69c   :  { %v5561_v19 = vpop.f32.mrb[181].mxu1 }
 0x69d   :  { %v5562_v21 = vadd.f32 %v5561_v19, %v5560_v1  ;;  %v5563_v26 = vpop.f32.mrb[182].mxu1  ;;  %v4739_v27 = vadd.f32 %v4738_v43, %v4715_v36  ;;  %v4716_v3 = vmul.f32 %v9683_v2, %v9683_v2  ;;  %v4684_v57 = vadd.f32 %v4683_v51, %v9683_v2 }
 0x69e   :  { %v5564_v6 = vpop.f32.mrb[183].mxu1 }
 0x69f   :  { %v5565_v52 = vadd.f32 %v5564_v6, %v5563_v26  ;;  %v4596_v44 = vadd.f32 %v5562_v21, %v9611_v22  ;;  %v4740_v46 = vadd.f32 %v4739_v27, %v4716_v3 }
 0x6a1   :  { %v9686_v16 = vmax.f32 %v4596_v44, 0.0  ;;  %v4599_v37 = vadd.f32 %v5565_v52, %v9611_v22 }
 0x6a3   :  { %v5566_v35 = vpop.f32.mrb[184].mxu1  ;;  %v4717_v31 = vmul.f32 %v9686_v16, %v9686_v16  ;;  %v9695_v30 = vmax.f32 %v4599_v37, 0.0  ;;  %v4685_v32 = vadd.f32 %v4684_v57, %v9686_v16 }
 0x6a4   :  { %v5567_v14 = vpop.f32.mrb[185].mxu1 }
 0x6a5   :  { %v5568_v23 = vadd.f32 %v5567_v14, %v5566_v35  ;;  %v5569_v54 = vpop.f32.mrb[186].mxu1  ;;  %v4741_v48 = vadd.f32 %v4740_v46, %v4717_v31  ;;  %v4718_v60 = vmul.f32 %v9695_v30, %v9695_v30  ;;  %v4686_v25 = vadd.f32 %v4685_v32, %v9695_v30 }
 0x6a6   :  { %v5570_v17 = vpop.f32.mrb[187].mxu1 }
 0x6a7   :  { %v5571_v47 = vadd.f32 %v5570_v17, %v5569_v54  ;;  %v4604_v20 = vadd.f32 %v5568_v23, %v9611_v22  ;;  %v4742_v55 = vadd.f32 %v4741_v48, %v4718_v60 }
 0x6a9   :  { %v9698_v40 = vmax.f32 %v4604_v20, 0.0  ;;  %v4607_v59 = vadd.f32 %v5571_v47, %v9611_v22 }
 0x6ab   :  { %v5572_v33 = vpop.f32.mrb[188].mxu1  ;;  %v4719_v1 = vmul.f32 %v9698_v40, %v9698_v40  ;;  %v9707_v19 = vmax.f32 %v4607_v59, 0.0  ;;  %v4687_v63 = vadd.f32 %v4686_v25, %v9698_v40 }
 0x6ac   :  { %v5573_v53 = vpop.f32.mrb[189].mxu1 }
 0x6ad   :  { %v5574_v11 = vadd.f32 %v5573_v53, %v5572_v33  ;;  %v5575_v15 = vpop.f32.mrb[190].mxu1  ;;  %v4743_v6 = vadd.f32 %v4742_v55, %v4719_v1  ;;  %v4720_v7 = vmul.f32 %v9707_v19, %v9707_v19  ;;  %v4688_v9 = vadd.f32 %v4687_v63, %v9707_v19 }
 0x6ae   :  { %v5576_v24 = vpop.f32.mrb[191].mxu1 }
 0x6af   :  { %v4612_v38 = vadd.f32 %v5574_v11, %v9611_v22  ;;  %v5577_v4 = vadd.f32 %v5576_v24, %v5575_v15  ;;  %v4744_v39 = vadd.f32 %v4743_v6, %v4720_v7 }
 0x6b1   :  { %v9710_v56 = vmax.f32 %v4612_v38, 0.0  ;;  %v4615_v21 = vadd.f32 %v5577_v4, %v9611_v22 }
 0x6b3   :  { %v5578_v26 = vpop.f32.mrb[192].mxu1  ;;  %v4721_v61 = vmul.f32 %v9710_v56, %v9710_v56  ;;  %v9718_v12 = vmax.f32 %v4615_v21, 0.0  ;;  %v4689_v14 = vadd.f32 %v4688_v9, %v9710_v56 }
 0x6b4   :  { %v5579_v45 = vpop.f32.mrb[193].mxu1 }
 0x6b5   :  { %v5580_v52 = vadd.f32 %v5579_v45, %v5578_v26  ;;  %v5581_v28 = vpop.f32.mrb[194].mxu1  ;;  %v4745_v54 = vadd.f32 %v4744_v39, %v4721_v61  ;;  %v4722_v51 = vmul.f32 %v9718_v12, %v9718_v12  ;;  %v4690_v37 = vadd.f32 %v4689_v14, %v9718_v12 }
 0x6b6   :  { %v5582_v42 = vpop.f32.mrb[195].mxu1 }
 0x6b7   :  { %v4620_v44 = vadd.f32 %v5580_v52, %v9611_v22  ;;  %v5583_v35 = vadd.f32 %v5582_v42, %v5581_v28  ;;  %v4746_v31 = vadd.f32 %v4745_v54, %v4722_v51 }
 0x6b9   :  { %v9722_v36 = vmax.f32 %v4620_v44, 0.0  ;;  %v4623_v23 = vadd.f32 %v5583_v35, %v9611_v22 }
 0x6bb   :  { %v5584_v17 = vpop.f32.mrb[196].mxu1  ;;  %v4723_v47 = vmul.f32 %v9722_v36, %v9722_v36  ;;  %v9730_v27 = vmax.f32 %v4623_v23, 0.0  ;;  %v4691_v33 = vadd.f32 %v4690_v37, %v9722_v36 }
 0x6bc   :  { %v5585_v43 = vpop.f32.mrb[197].mxu1 }
 0x6bd   :  { %v5586_v3 = vadd.f32 %v5585_v43, %v5584_v17  ;;  %v5587_v20 = vpop.f32.mrb[198].mxu1  ;;  %v4747_v46 = vadd.f32 %v4746_v31, %v4723_v47  ;;  %v4724_v59 = vmul.f32 %v9730_v27, %v9730_v27  ;;  %v4692_v24 = vadd.f32 %v4691_v33, %v9730_v27 }
 0x6be   :  { %v5588_v57 = vpop.f32.mrb[199].mxu1 }
 0x6bf   :  { %v4628_v32 = vadd.f32 %v5586_v3, %v9611_v22  ;;  %v5589_v53 = vadd.f32 %v5588_v57, %v5587_v20  ;;  %v4748_v25 = vadd.f32 %v4747_v46, %v4724_v59 }
 0x6c1   :  { %v9736_v11 = vmax.f32 %v4628_v32, 0.0  ;;  %v4631_v15 = vadd.f32 %v5589_v53, %v9611_v22 }
 0x6c3   :  { %v4725_v48 = vmul.f32 %v9736_v11, %v9736_v11  ;;  %v9742_v60 = vmax.f32 %v4631_v15, 0.0  ;;  %v5590_v38 = vpop.f32.mrb[200].mxu1  ;;  %v4693_v1 = vadd.f32 %v4692_v24, %v9736_v11 }
 0x6c4   :  { %v5591_v4 = vpop.f32.mrb[201].mxu1 }
 0x6c5   :  { %v5592_v63 = vadd.f32 %v5591_v4, %v5590_v38  ;;  %v5593_v55 = vpop.f32.mrb[202].mxu1  ;;  %v4749_v26 = vadd.f32 %v4748_v25, %v4725_v48  ;;  %v4726_v45 = vmul.f32 %v9742_v60, %v9742_v60  ;;  %v4694_v52 = vadd.f32 %v4693_v1, %v9742_v60 }
 0x6c6   :  { %v5594_v21 = vpop.f32.mrb[203].mxu1 }
 0x6c7   :  { %v4636_v6 = vadd.f32 %v5592_v63, %v9611_v22  ;;  %v5595_v7 = vadd.f32 %v5594_v21, %v5593_v55  ;;  %v4750_v42 = vadd.f32 %v4749_v26, %v4726_v45 }
 0x6c9   :  { %v9749_v28 = vmax.f32 %v4636_v6, 0.0  ;;  %v4639_v9 = vadd.f32 %v5595_v7, %v9611_v22  ;;  %v4766_v7 = vld [vmem:[%s9867_s1 + $0x1c] sm:$0x1] }
 0x6cb   :  { %v4695_v61 = vadd.f32 %v4694_v52, %v9749_v28  ;;  %v4727_v44 = vmul.f32 %v9749_v28, %v9749_v28  ;;  %v9755_v35 = vmax.f32 %v4639_v9, 0.0  ;;  %v5596_v39 = vpop.f32.mrb[204].mxu1 }
 0x6cc   :  { %v5597_v14 = vpop.f32.mrb[205].mxu1 }
 0x6cd   :  { %v4751_v23 = vadd.f32 %v4750_v42, %v4727_v44  ;;  %v4696_v54 = vadd.f32 %v4695_v61, %v9755_v35  ;;  %v4728_v51 = vmul.f32 %v9755_v35, %v9755_v35  ;;  %v5598_v17 = vadd.f32 %v5597_v14, %v5596_v39  ;;  %v5599_v43 = vpop.f32.mrb[206].mxu1  ;;  %v4768_v42 = vld [vmem:[%s9867_s1 + $0x1d] sm:$0x1] }
 0x6ce   :  { %v5600_v37 = vpop.f32.mrb[207].mxu1 }
 0x6cf   :  { %v4752_v47 = vadd.f32 %v4751_v23, %v4728_v51  ;;  %v4644_v3 = vadd.f32 %v5598_v17, %v9611_v22 }
 0x6d1   :  { %v4673_v20 = vmax.f32 %v4644_v3, 0.0 }
 0x6d3   :  { %v4697_v57 = vadd.f32 %v4696_v54, %v4673_v20  ;;  %v4729_v31 = vmul.f32 %v4673_v20, %v4673_v20 }
 0x6d5   :  { %v4698_v33 = vrot.slane %v4697_v57, 4  ;;  %v4753_v32 = vadd.f32 %v4752_v47, %v4729_v31 }
 0x6d7   :  { %v4699_v53 = vadd.f32 %v4698_v33, %v4697_v57  ;;  %v4754_v46 = vrot.slane %v4753_v32, 4 }
 0x6d9   :  { %v4700_v59 = vrot.slane %v4699_v53, 2  ;;  %v4755_v15 = vadd.f32 %v4754_v46, %v4753_v32 }
 0x6db   :  { %v4701_v24 = vadd.f32 %v4700_v59, %v4699_v53  ;;  %v4756_v48 = vrot.slane %v4755_v15, 2 }
 0x6dd   :  { %v4702_v38 = vrot.slane %v4701_v24, 1  ;;  %v4757_v4 = vadd.f32 %v4756_v48, %v4755_v15 }
 0x6df   :  { %v4703_v25 = vadd.f32 %v4702_v38, %v4701_v24  ;;  %v4758_v1 = vrot.slane %v4757_v4, 1 }
 0x6e1   :  { %v4704_v63 = vmul.f32 0.005, %v4703_v25  ;;  %v4759_v55 = vadd.f32 %v4758_v1, %v4757_v4 }
 0x6e3   :  { %v4760_v21 = vmul.f32 0.005, %v4759_v55  ;;  %v4761_v26 = vmul.f32 %v4704_v63, %v4704_v63 }
 0x6e5   :  { %v4762_v22 = vsub.f32 %v4760_v21, %v4761_v26 }
 0x6e7   :  { %v4763_v45 = vmax.f32 %v4762_v22, 0.0 }
 0x6e9   :  { %v4764_v6 = vadd.f32 1e-05, %v4763_v45 }
 0x6eb   :  { %6189 = vrsqrt.f32 %v4764_v6 }
 0x6f5   :  { %v6190_v52 = vpop.eup %6189 }
 0x6f6   :  { %v4767_v9 = vmul.f32 %v6190_v52, %v4766_v7 }
 0x6f8   :  { %v4769_v61 = vmul.f32 %v4767_v9, %v4704_v63  ;;  %v4774_v44 = vrot.slane %v4767_v9, %v10352_v5 }
 0x6fa   :  { %v4770_v39 = vsub.f32 %v4768_v42, %v4769_v61  ;;  %v4799_v14 = vmul.f32 %v4774_v44, %v4673_v20  ;;  %v4775_v23 = vmul.f32 %v4774_v44, %v9620_v49  ;;  %v4776_v54 = vmul.f32 %v4774_v44, %v9617_v8 }
 0x6fb   :  { %v4777_v51 = vmul.f32 %v4774_v44, %v9622_v41  ;;  %v4778_v17 = vmul.f32 %v4774_v44, %v9635_v34  ;;  %v4779_v43 = vmul.f32 %v4774_v44, %v9638_v50  ;;  %v4780_v47 = vmul.f32 %v4774_v44, %v9647_v10 }
 0x6fc   :  { %v4804_v37 = vrot.slane %v4770_v39, %v10352_v5  ;;  %v4781_v3 = vmul.f32 %v4774_v44, %v9650_v0  ;;  %v4782_v57 = vmul.f32 %v4774_v44, %v9659_v58  ;;  %v4783_v20 = vmul.f32 %v4774_v44, %v9662_v29 }
 0x6fd   :  { %v4784_v49 = vmul.f32 %v4774_v44, %v9671_v18  ;;  %v4785_v8 = vmul.f32 %v4774_v44, %v9674_v13  ;;  %v4786_v41 = vmul.f32 %v4774_v44, %v9683_v2  ;;  %v4787_v29 = vmul.f32 %v4774_v44, %v9686_v16 }
 0x6fe   :  { %v9781_v31 = vadd.f32 %v4804_v37, %v4799_v14  ;;  %v4806_v34 = vadd.f32 %v4804_v37, %v4775_v23  ;;  %v4807_v50 = vadd.f32 %v4804_v37, %v4776_v54  ;;  %v4808_v33 = vadd.f32 %v4804_v37, %v4777_v51 }
 0x6ff   :  { %v4809_v5 = vadd.f32 %v4804_v37, %v4778_v17  ;;  %v4810_v32 = vadd.f32 %v4804_v37, %v4779_v43  ;;  %v4811_v10 = vadd.f32 %v4804_v37, %v4780_v47  ;;  %v4812_v53 = vadd.f32 %v4804_v37, %v4781_v3 }
 0x700   :  { %v4831_v0 = vpack.c.bf16 %v4807_v50, %v4806_v34  ;;  %v4813_v46 = vadd.f32 %v4804_v37, %v4782_v57  ;;  %v4814_v58 = vadd.f32 %v4804_v37, %v4783_v20  ;;  %v4815_v15 = vadd.f32 %v4804_v37, %v4784_v49 }
 0x701   :  { %v4832_v59 = vpack.c.bf16 %v4809_v5, %v4808_v33  ;;  %v4833_v18 = vpack.c.bf16 %v4811_v10, %v4810_v32  ;;  %v4816_v13 = vadd.f32 %v4804_v37, %v4785_v8  ;;  %v4817_v24 = vadd.f32 %v4804_v37, %v4786_v41 }
 0x702   :  { %5640 = vmatmul.mubr.bf16.vlgmr.msra.gmra.mrb[208].mxu1 %v4831_v0  ;;  %v4834_v2 = vpack.c.bf16 %v4813_v46, %v4812_v53  ;;  %v4788_v48 = vmul.f32 %v4774_v44, %v9695_v30  ;;  %v4818_v38 = vadd.f32 %v4804_v37, %v4787_v29  ;;  %v4835_v4 = vpack.c.bf16 %v4815_v15, %v4814_v58 }
 0x703   :  { %5643 = vmatprep.mubr.msk.bf16.mxu1 %vm6322_vm1, %v6321_v62  ;;  %v4789_v25 = vmul.f32 %v4774_v44, %v9698_v40  ;;  %v4790_v1 = vmul.f32 %v4774_v44, %v9707_v19  ;;  %v4791_v16 = vmul.f32 %v4774_v44, %v9710_v56  ;;  %v4836_v63 = vpack.c.bf16 %v4817_v24, %v4816_v13 }
 0x704   :  { %v4819_v55 = vadd.f32 %v4804_v37, %v4788_v48  ;;  %v4792_v21 = vmul.f32 %v4774_v44, %v9718_v12  ;;  %v4793_v26 = vmul.f32 %v4774_v44, %v9722_v36  ;;  %v4794_v6 = vmul.f32 %v4774_v44, %v9730_v27 }
 0x705   :  { %v4820_v22 = vadd.f32 %v4804_v37, %v4789_v25  ;;  %v4821_v45 = vadd.f32 %v4804_v37, %v4790_v1  ;;  %v4822_v30 = vadd.f32 %v4804_v37, %v4791_v16  ;;  %v4795_v40 = vmul.f32 %v4774_v44, %v9736_v11 }
 0x706   :  { %v4837_v7 = vpack.c.bf16 %v4819_v55, %v4818_v38  ;;  %v4823_v52 = vadd.f32 %v4804_v37, %v4792_v21  ;;  %v4824_v9 = vadd.f32 %v4804_v37, %v4793_v26  ;;  %v4825_v19 = vadd.f32 %v4804_v37, %v4794_v6 }
 0x707   :  { %v4838_v42 = vpack.c.bf16 %v4821_v45, %v4820_v22  ;;  %v4796_v56 = vmul.f32 %v4774_v44, %v9742_v60  ;;  %v4797_v61 = vmul.f32 %v4774_v44, %v9749_v28  ;;  %v4826_v12 = vadd.f32 %v4804_v37, %v4795_v40  ;;  %v9824_v28 = vld [vmem:[%s9867_s1 + $0x1e] ss:$0 sm:$0xff]  ;;  %s6323_s1 = smov [#allocation10]  }
 0x708   :  { %v4839_v39 = vpack.c.bf16 %v4823_v52, %v4822_v30  ;;  %v4798_v36 = vmul.f32 %v4774_v44, %v9755_v35  ;;  %v4840_v14 = vpack.c.bf16 %v4825_v19, %v4824_v9  ;;  %v4843_v60 = vpack.c.bf16 %v9781_v31, %v9781_v31  ;;  %s5081_s14 = sshll.u32 %s6323_s1, 4  ;;  %s5082_s14 = int_to_ptr.vmem [resolvable:$true] %s5081_s14 }
 0x709   :  { %v4827_v23 = vadd.f32 %v4804_v37, %v4796_v56  ;;  %v4828_v54 = vadd.f32 %v4804_v37, %v4797_v61  ;;  %s6279_s0 = scalar_lea.vmem %s5082_s14, 3200  ;;  %p6284_p5 = scmp.lt.s32.totalorder %s5082_s14, %s5082_s14 }
 0x70a   :  { %5644 = vmatmul.mubr.bf16.gmra.mrb[212].mxu1 %v4832_v59  ;;  %v4829_v27 = vadd.f32 %v4804_v37, %v4798_v36  ;;  %p6280_p4 = scmp.ne.s32.totalorder %s5082_s14, %s6279_s0  ;;  %p6285_p6 = scmp.lt.s32.totalorder %s6279_s0, %s6279_s0 }
 0x70b   :  { %5647 = vmatprep.mubr.msk.bf16.mxu1 %vm6322_vm1, %v6321_v62  ;;  %v4841_v51 = vpack.c.bf16 %v4827_v23, %v4826_v12 }
 0x70c   :  { %v4842_v11 = vpack.c.bf16 %v4829_v27, %v4828_v54  ;;  %p6286_p7 = por %p6285_p6, %p6284_p5 }
 0x70e   :  { %p6287_p8 = pnand %p6286_p7, %p6280_p4 }
 0x712   :  { %5648 = vmatmul.mubr.bf16.gmra.mrb[216].mxu1 %v4833_v18 }
 0x713   :  { %5651 = vmatprep.mubr.msk.bf16.mxu1 %vm6322_vm1, %v6321_v62 }
 0x71a   :  { %5652 = vmatmul.mubr.bf16.gmra.mrb[220].mxu1 %v4834_v2 }
 0x71b   :  { %5655 = vmatprep.mubr.msk.bf16.mxu1 %vm6322_vm1, %v6321_v62 }
 0x722   :  { %5656 = vmatmul.mubr.bf16.gmra.mrb[224].mxu1 %v4835_v4 }
 0x723   :  { %5659 = vmatprep.mubr.msk.bf16.mxu1 %vm6322_vm1, %v6321_v62 }
 0x72a   :  { %5660 = vmatmul.mubr.bf16.gmra.mrb[228].mxu1 %v4836_v63 }
 0x72b   :  { %5663 = vmatprep.mubr.msk.bf16.mxu1 %vm6322_vm1, %v6321_v62 }
 0x732   :  { %5664 = vmatmul.mubr.bf16.gmra.mrb[232].mxu1 %v4837_v7 }
 0x733   :  { %5667 = vmatprep.mubr.msk.bf16.mxu1 %vm6322_vm1, %v6321_v62 }
 0x73a   :  { %5668 = vmatmul.mubr.bf16.gmra.mrb[236].mxu1 %v4838_v42 }
 0x73b   :  { %5671 = vmatprep.mubr.msk.bf16.mxu1 %vm6322_vm1, %v6321_v62 }
 0x742   :  { %5672 = vmatmul.mubr.bf16.gmra.mrb[240].mxu1 %v4839_v39 }
 0x743   :  { %5675 = vmatprep.mubr.msk.bf16.mxu1 %vm6322_vm1, %v6321_v62 }
 0x74a   :  { %5676 = vmatmul.mubr.bf16.gmra.mrb[244].mxu1 %v4840_v14 }
 0x74b   :  { %5679 = vmatprep.mubr.msk.bf16.mxu1 %vm6322_vm1, %v6321_v62 }
 0x752   :  { %5680 = vmatmul.mubr.bf16.gmra.mrb[248].mxu1 %v4841_v51 }
 0x753   :  { %5683 = vmatprep.mubr.msk.bf16.mxu1 %vm6322_vm1, %v6321_v62 }
 0x75a   :  { %5684 = vmatmul.mubr.bf16.gmra.mrb[252].mxu1 %v4842_v11 }
 0x75b   :  { %5687 = vmatprep.mubr.msk.bf16.mxu1 %vm6322_vm1, %v6321_v62 }
 0x762   :  { %5688 = vmatmul.mubr.bf16.gmra.mrb[0].mxu1 %v4843_v60 }
 0x7d5   :  { %v4949_v35 = vpop.f32.mrb[208].mxu1 }
 0x7d6   :  { %v4950_v44 = vadd.f32 %v9824_v28, %v4949_v35  ;;  %v5641_v17 = vpop.f32.mrb[209].mxu1 }
 0x7d7   :  { %v4952_v43 = vpop.f32.mrb[210].mxu1 }
 0x7d8   :  { %5051 = vst [vmem:[#allocation10] sm:$0xff] %v4950_v44  ;;  %v4953_v37 = vadd.f32 %v9824_v28, %v4952_v43  ;;  %v5642_v47 = vpop.f32.mrb[211].mxu1 }
 0x7da   :  { %5052 = vst [vmem:[#allocation10 + $0x8] sm:$0xff] %v4953_v37 }
 0x7dd   :  { %v4957_v62 = vpop.f32.mrb[212].mxu1 }
 0x7de   :  { %v4958_v3 = vadd.f32 %v9824_v28, %v4957_v62  ;;  %v5645_v57 = vpop.f32.mrb[213].mxu1 }
 0x7df   :  { %v4960_v20 = vpop.f32.mrb[214].mxu1 }
 0x7e0   :  { %5053 = vst [vmem:[#allocation10 + $0x10] sm:$0xff] %v4958_v3  ;;  %v4961_v49 = vadd.f32 %v9824_v28, %v4960_v20  ;;  %v5646_v8 = vpop.f32.mrb[215].mxu1 }
 0x7e2   :  { %5054 = vst [vmem:[#allocation10 + $0x18] sm:$0xff] %v4961_v49 }
 0x7e5   :  { %v4965_v41 = vpop.f32.mrb[216].mxu1 }
 0x7e6   :  { %v4966_v31 = vadd.f32 %v9824_v28, %v4965_v41  ;;  %v5649_v34 = vpop.f32.mrb[217].mxu1 }
 0x7e7   :  { %v4968_v50 = vpop.f32.mrb[218].mxu1 }
 0x7e8   :  { %5055 = vst [vmem:[#allocation10 + $0x20] sm:$0xff] %v4966_v31  ;;  %v4969_v33 = vadd.f32 %v9824_v28, %v4968_v50  ;;  %v5650_v5 = vpop.f32.mrb[219].mxu1 }
 0x7ea   :  { %5056 = vst [vmem:[#allocation10 + $0x28] sm:$0xff] %v4969_v33 }
 0x7ed   :  { %v4973_v32 = vpop.f32.mrb[220].mxu1 }
 0x7ee   :  { %v4974_v10 = vadd.f32 %v9824_v28, %v4973_v32  ;;  %v5653_v53 = vpop.f32.mrb[221].mxu1 }
 0x7ef   :  { %v4976_v0 = vpop.f32.mrb[222].mxu1 }
 0x7f0   :  { %5057 = vst [vmem:[#allocation10 + $0x30] sm:$0xff] %v4974_v10  ;;  %v4977_v46 = vadd.f32 %v9824_v28, %v4976_v0  ;;  %v5654_v58 = vpop.f32.mrb[223].mxu1 }
 0x7f2   :  { %5058 = vst [vmem:[#allocation10 + $0x38] sm:$0xff] %v4977_v46 }
 0x7f5   :  { %v4981_v29 = vpop.f32.mrb[224].mxu1 }
 0x7f6   :  { %v4982_v59 = vadd.f32 %v9824_v28, %v4981_v29  ;;  %v5657_v18 = vpop.f32.mrb[225].mxu1 }
 0x7f7   :  { %v4984_v15 = vpop.f32.mrb[226].mxu1 }
 0x7f8   :  { %5059 = vst [vmem:[#allocation10 + $0x40] sm:$0xff] %v4982_v59  ;;  %v4985_v13 = vadd.f32 %v9824_v28, %v4984_v15  ;;  %v5658_v2 = vpop.f32.mrb[227].mxu1 }
 0x7fa   :  { %5060 = vst [vmem:[#allocation10 + $0x48] sm:$0xff] %v4985_v13 }
 0x7fd   :  { %v4989_v24 = vpop.f32.mrb[228].mxu1 }
 0x7fe   :  { %v4990_v48 = vadd.f32 %v9824_v28, %v4989_v24  ;;  %v5661_v38 = vpop.f32.mrb[229].mxu1 }
 0x7ff   :  { %v4992_v4 = vpop.f32.mrb[230].mxu1 }
 0x800   :  { %5061 = vst [vmem:[#allocation10 + $0x50] sm:$0xff] %v4990_v48  ;;  %v4993_v25 = vadd.f32 %v9824_v28, %v4992_v4  ;;  %v5662_v1 = vpop.f32.mrb[231].mxu1 }
 0x802   :  { %5062 = vst [vmem:[#allocation10 + $0x58] sm:$0xff] %v4993_v25 }
 0x805   :  { %v4997_v16 = vpop.f32.mrb[232].mxu1 }
 0x806   :  { %v4998_v63 = vadd.f32 %v9824_v28, %v4997_v16  ;;  %v5665_v55 = vpop.f32.mrb[233].mxu1 }
 0x807   :  { %v5000_v21 = vpop.f32.mrb[234].mxu1 }
 0x808   :  { %5063 = vst [vmem:[#allocation10 + $0x60] sm:$0xff] %v4998_v63  ;;  %v5001_v26 = vadd.f32 %v9824_v28, %v5000_v21  ;;  %v5666_v22 = vpop.f32.mrb[235].mxu1 }
 0x80a   :  { %5064 = vst [vmem:[#allocation10 + $0x68] sm:$0xff] %v5001_v26 }
 0x80d   :  { %v5005_v45 = vpop.f32.mrb[236].mxu1 }
 0x80e   :  { %v5006_v30 = vadd.f32 %v9824_v28, %v5005_v45  ;;  %v5669_v6 = vpop.f32.mrb[237].mxu1 }
 0x80f   :  { %v5008_v7 = vpop.f32.mrb[238].mxu1 }
 0x810   :  { %5065 = vst [vmem:[#allocation10 + $0x70] sm:$0xff] %v5006_v30  ;;  %v5009_v52 = vadd.f32 %v9824_v28, %v5008_v7  ;;  %v5670_v9 = vpop.f32.mrb[239].mxu1 }
 0x812   :  { %5066 = vst [vmem:[#allocation10 + $0x78] sm:$0xff] %v5009_v52 }
 0x815   :  { %v5013_v40 = vpop.f32.mrb[240].mxu1 }
 0x816   :  { %v5014_v42 = vadd.f32 %v9824_v28, %v5013_v40  ;;  %v5673_v19 = vpop.f32.mrb[241].mxu1 }
 0x817   :  { %v5016_v56 = vpop.f32.mrb[242].mxu1 }
 0x818   :  { %5067 = vst [vmem:[#allocation10 + $0x80] sm:$0xff] %v5014_v42  ;;  %v5017_v61 = vadd.f32 %v9824_v28, %v5016_v56  ;;  %v5674_v39 = vpop.f32.mrb[243].mxu1 }
 0x81a   :  { %5068 = vst [vmem:[#allocation10 + $0x88] sm:$0xff] %v5017_v61 }
 0x81d   :  { %v5021_v12 = vpop.f32.mrb[244].mxu1 }
 0x81e   :  { %v5022_v36 = vadd.f32 %v9824_v28, %v5021_v12  ;;  %v5677_v14 = vpop.f32.mrb[245].mxu1 }
 0x81f   :  { %v5024_v23 = vpop.f32.mrb[246].mxu1 }
 0x820   :  { %5069 = vst [vmem:[#allocation10 + $0x90] sm:$0xff] %v5022_v36  ;;  %v5025_v54 = vadd.f32 %v9824_v28, %v5024_v23  ;;  %v5678_v27 = vpop.f32.mrb[247].mxu1 }
 0x822   :  { %5070 = vst [vmem:[#allocation10 + $0x98] sm:$0xff] %v5025_v54 }
 0x825   :  { %v5029_v51 = vpop.f32.mrb[248].mxu1 }
 0x826   :  { %v5030_v11 = vadd.f32 %v9824_v28, %v5029_v51  ;;  %v5681_v60 = vpop.f32.mrb[249].mxu1 }
 0x827   :  { %v5032_v35 = vpop.f32.mrb[250].mxu1 }
 0x828   :  { %5071 = vst [vmem:[#allocation10 + $0xa0] sm:$0xff] %v5030_v11  ;;  %v5033_v44 = vadd.f32 %v9824_v28, %v5032_v35  ;;  %v5682_v17 = vpop.f32.mrb[251].mxu1 }
 0x82a   :  { %5072 = vst [vmem:[#allocation10 + $0xa8] sm:$0xff] %v5033_v44 }
 0x82d   :  { %v5037_v43 = vpop.f32.mrb[252].mxu1 }
 0x82e   :  { %v5038_v37 = vadd.f32 %v9824_v28, %v5037_v43  ;;  %v5685_v47 = vpop.f32.mrb[253].mxu1 }
 0x82f   :  { %v5040_v62 = vpop.f32.mrb[254].mxu1 }
 0x830   :  { %5073 = vst [vmem:[#allocation10 + $0xb0] sm:$0xff] %v5038_v37  ;;  %v5041_v3 = vadd.f32 %v9824_v28, %v5040_v62  ;;  %v5686_v57 = vpop.f32.mrb[255].mxu1 }
 0x832   :  { %5074 = vst [vmem:[#allocation10 + $0xb8] sm:$0xff] %v5041_v3 }
 0x835   :  { %v5045_v20 = vpop.f32.mrb[0].mxu1 }
 0x836   :  { %v5046_v49 = vadd.f32 %v9824_v28, %v5045_v20  ;;  %v5689_v8 = vpop.f32.mrb[1].mxu1 }
 0x837   :  { %v5048_v41 = vpop.f32.mrb[2].mxu1 }
 0x838   :  { %5075 = vst [vmem:[#allocation10 + $0xc0] sm:$0xff] %v5046_v49  ;;  %v5690_v31 = vpop.f32.mrb[3].mxu1 }
 0x839   :  { %6290 = shalt.err (!%p6287_p8)
}
 0x83a   :  { %s6291_s3 = scalar_lea.hbm %s9873_s7, 3200 }
 0x83b   :  { %p6292_p9 = scmp.ne.s32.totalorder %s9873_s7, %s6291_s3  ;;  %p6295_p10 = scmp.lt.u32.totalorder %s6291_s3, %s9873_s7 }
 0x83d   :  { %p6297_p11 = pnand %p6295_p10, %p6292_p9 }
 0x83f   :  { %6300 = shalt.err (!%p6297_p11)
}
 0x840   :  { %5087 = dma.vmem_to_hbm [thread:$0]  %s5082_s14, 3200, %s9873_s7, [#allocation4], %s6310_s11, %s6310_s11, %s6311_s12  }
 0x841   :  { %6307 = dma.done.wait [#allocation4], 3200  }
 0x842   :  { %6308 = vsyncadd [#allocation4], 4294964096 }
 0x843   :  { %5091 = vsyncpa [#allocation3], 1 }
 0x844   :  { %5092 = vsyncpa [#allocation6], 1 }
 0x845   :  { %5093 = vsyncpa [#allocation9], 1 }
 0x846   :  { %5094 = vsyncpa [#allocation4], 1 }

</bundles_post_ra>
